<compile_context>
chip_gen: v7x
topology: tpu7x:2x2x1
jax: 0.10.0
libtpu: 0.0.40
codegen_flags: <defaults>
</compile_context>

<pallas_src>
import numpy as np
import jax
import jax.numpy as jnp
from jax.experimental import pallas as pl
from jax.experimental.pallas import tpu as pltpu

NUM_ORGAN = 13
ORGAN_WEIGHT = [1.0] * NUM_ORGAN
EPS = 1e-5
NUM_STATS = 5                      # inter1, p1_sq, inter2, p2_sq, |target| per organ
_IN_BLOCK_BUDGET = 16 * 1024 * 1024  # double-buffered input-block budget (all gens)


def _pick_ts(s8, max_ts):
    """Rows per spatial chunk. Prefer a divisor of s8 (no ragged chunk, no mask)."""
    if s8 <= max_ts:
        return s8, False                      # single chunk == full dim (legal block)
    top = max(8, max_ts - max_ts % 8)
    for ts in range(top, 7, -8):              # multiples of 8, descending
        if s8 % ts == 0:
            if ts >= max(8, top // 4):
                return ts, False
            break
    return top, True                          # ragged last chunk -> mask in-kernel


def _make_dice_kernel(s8, ts, needs_mask):
    def kernel(p1_ref, p2_ref, tgt_ref, out_ref):
        # p1_ref / p2_ref : (1, C, TS, 128) preds in native dtype (channel 0 unused)
        # tgt_ref         : (1, TS, 128) integer labels 0..NUM_ORGAN
        # out_ref         : (1, 1, 8, 128) f32 partials; row = stat, lane = organ
        labels = tgt_ref[0].astype(jnp.int32)                      # (TS, 128)
        if needs_mask:
            c = pl.program_id(1)
            rows = jax.lax.broadcasted_iota(jnp.int32, (ts, 128), 0)
            valid = rows < (s8 - c * ts)      # rows past s8 hold OOB garbage
            labels = jnp.where(valid, labels, 0)                   # 0 = background

        stats = [[] for _ in range(NUM_STATS)]
        for o in range(NUM_ORGAN):                                 # static unroll
            onehot = (labels == (o + 1)).astype(jnp.float32)
            p1 = p1_ref[0, o + 1].astype(jnp.float32)
            p2 = p2_ref[0, o + 1].astype(jnp.float32)
            if needs_mask:
                p1 = jnp.where(valid, p1, 0.0)
                p2 = jnp.where(valid, p2, 0.0)
            stats[0].append(jnp.sum(p1 * onehot))
            stats[1].append(jnp.sum(p1 * p1))
            stats[2].append(jnp.sum(p2 * onehot))
            stats[3].append(jnp.sum(p2 * p2))
            stats[4].append(jnp.sum(onehot))   # onehot^2 == onehot

        # Assemble the 65 scalar partial sums into one lane-dense (8, 128) tile
        # (out[s, o] = stats[s][o]); the iota masks are compile-time constants
        # and this runs once per chunk, fully hidden under the next chunk's DMA.
        row = jax.lax.broadcasted_iota(jnp.int32, (8, 128), 0)
        lane = jax.lax.broadcasted_iota(jnp.int32, (8, 128), 1)
        out = jnp.zeros((8, 128), jnp.float32)
        for s in range(NUM_STATS):
            for o in range(NUM_ORGAN):
                out = out + jnp.where((row == s) & (lane == o), stats[s][o], 0.0)
        out_ref[0, 0] = out

    return kernel


def dice_loss(pred_stage1, pred_stage2, target, organ_weight=ORGAN_WEIGHT,
              max_ts=None):
    B, C, D, H, W = pred_stage1.shape
    assert C == NUM_ORGAN + 1
    assert pred_stage2.shape == pred_stage1.shape
    S = D * H * W

    if not jnp.issubdtype(target.dtype, jnp.integer):
        target = target.astype(jnp.int32)

    # Lane pad only if the volume is not a multiple of 128 (rare for 3D seg;
    # 48*256*256 divides evenly).  Pad values are semantics-neutral: pred 0
    # adds nothing to the sums and label 0 (background) is never counted.
    lane_pad = (-S) % 128
    S8 = (S + lane_pad) // 128

    pred_itemsize = jnp.dtype(pred_stage1.dtype).itemsize
    tgt_itemsize = jnp.dtype(target.dtype).itemsize
    if max_ts is None:
        per_row = 2 * 2 * C * 128 * pred_itemsize + 2 * 128 * tgt_itemsize
        max_ts = max(8, _IN_BLOCK_BUDGET // per_row)
    TS, needs_mask = _pick_ts(S8, max_ts)
    num_chunks = pl.cdiv(S8, TS)

    def prep_pred(p):
        p = p.reshape(B, C, S)                 # keep native dtype (f32 / bf16)
        if lane_pad:
            p = jnp.pad(p, ((0, 0), (0, 0), (0, lane_pad)))
        return p.reshape(B, C, S8, 128)

    p1 = prep_pred(pred_stage1)
    p2 = prep_pred(pred_stage2)

    tgt = target.reshape(B, S)
    if lane_pad:
        tgt = jnp.pad(tgt, ((0, 0), (0, lane_pad)))
    tgt = tgt.reshape(B, S8, 128)

    cost = pl.CostEstimate(
        flops=11 * B * NUM_ORGAN * S8 * 128,
        transcendentals=0,
        bytes_accessed=B * S8 * 128 * (2 * C * pred_itemsize + tgt_itemsize)
                       + B * num_chunks * 8 * 128 * 4,
    )

    partials = pl.pallas_call(
        _make_dice_kernel(S8, TS, needs_mask),
        out_shape=jax.ShapeDtypeStruct((B, num_chunks, 8, 128), jnp.float32),
        grid_spec=pltpu.PrefetchScalarGridSpec(
            num_scalar_prefetch=0,
            grid=(B, num_chunks),
            in_specs=[
                # Full channel window (reads unused channel 0: +7% bytes, but
                # lets one chunk serve all 13 organs with one label decode).
                pl.BlockSpec((1, C, TS, 128), lambda b, c: (b, 0, c, 0)),
                pl.BlockSpec((1, C, TS, 128), lambda b, c: (b, 0, c, 0)),
                pl.BlockSpec((1, TS, 128), lambda b, c: (b, c, 0)),
            ],
            out_specs=pl.BlockSpec((1, 1, 8, 128), lambda b, c: (b, c, 0, 0)),
        ),
        compiler_params=pltpu.CompilerParams(
            dimension_semantics=("parallel", "parallel"),
            vmem_limit_bytes=32 * 1024 * 1024,
        ),
        cost_estimate=cost,
    )(p1, p2, tgt)

    # Fold the tiny (B, chunks, 8, 128) partials exactly like the PyTorch loop:
    # num/den -> (acc + x) * weight per organ, EPS added once per organ.
    sums = partials.sum(axis=1)                     # (B, 8, 128)
    inter1 = sums[:, 0, :NUM_ORGAN]
    p1_sq = sums[:, 1, :NUM_ORGAN]
    inter2 = sums[:, 2, :NUM_ORGAN]
    p2_sq = sums[:, 3, :NUM_ORGAN]
    t_sq = sums[:, 4, :NUM_ORGAN]

    num1 = jnp.zeros((B,), jnp.float32)
    den1 = jnp.zeros((B,), jnp.float32)
    num2 = jnp.zeros((B,), jnp.float32)
    den2 = jnp.zeros((B,), jnp.float32)
    for j in range(NUM_ORGAN):
        wj = float(organ_weight[j])
        num1 = (num1 + 2.0 * inter1[:, j]) * wj
        den1 = (den1 + p1_sq[:, j] + t_sq[:, j] + EPS) * wj
        num2 = (num2 + 2.0 * inter2[:, j]) * wj
        den2 = (den2 + p2_sq[:, j] + t_sq[:, j] + EPS) * wj
    dice = num1 / den1 + num2 / den2
    return jnp.mean(2.0 - dice)


def dice_loss_ref(pred_stage1, pred_stage2, target, organ_weight=ORGAN_WEIGHT):
    """Pure-JAX reference mirroring the PyTorch forward exactly."""
    p1 = pred_stage1.astype(jnp.float32)
    p2 = pred_stage2.astype(jnp.float32)
    onehot = jax.nn.one_hot(target, NUM_ORGAN + 1, axis=1,
                            dtype=jnp.float32)[:, 1:]            # (B, 13, D, H, W)
    num1 = 0.0
    den1 = 0.0
    num2 = 0.0
    den2 = 0.0
    for i in range(NUM_ORGAN):
        w = organ_weight[i]
        num1 = (num1 + 2.0 * (p1[:, i + 1] * onehot[:, i]).sum(axis=(1, 2, 3))) * w
        den1 = (den1 + (p1[:, i + 1] ** 2).sum(axis=(1, 2, 3))
                + (onehot[:, i] ** 2).sum(axis=(1, 2, 3)) + EPS) * w
        num2 = (num2 + 2.0 * (p2[:, i + 1] * onehot[:, i]).sum(axis=(1, 2, 3))) * w
        den2 = (den2 + (p2[:, i + 1] ** 2).sum(axis=(1, 2, 3))
                + (onehot[:, i] ** 2).sum(axis=(1, 2, 3)) + EPS) * w
    dice = num1 / den1 + num2 / den2
    return (2.0 - dice).mean()


if __name__ == "__main__":
    B, C = 2, NUM_ORGAN + 1
    key = jax.random.PRNGKey(0)

    # Case 1: f32 preds, spatial rows divide the chunk evenly (divisor path).
    D, H, W = 4, 16, 16
    k1, k2, k3, key = jax.random.split(key, 4)
    p1 = jax.nn.softmax(jax.random.normal(k1, (B, C, D, H, W), jnp.float32), axis=1)
    p2 = jax.nn.softmax(jax.random.normal(k2, (B, C, D, H, W), jnp.float32), axis=1)
    tgt = jax.random.randint(k3, (B, D, H, W), 0, NUM_ORGAN + 1, dtype=jnp.int32)
    out = jax.block_until_ready(dice_loss(p1, p2, tgt))
    ref = jax.block_until_ready(dice_loss_ref(p1, p2, tgt))
    np.testing.assert_allclose(np.asarray(out), np.asarray(ref),
                               rtol=1e-5, atol=1e-5)

    # Case 2: bf16 preds + ragged spatial chunking (masked last chunk).
    D, H, W = 5, 16, 16
    k1, k2, k3, key = jax.random.split(key, 4)
    p1 = jax.nn.softmax(jax.random.normal(k1, (B, C, D, H, W), jnp.float32),
                        axis=1).astype(jnp.bfloat16)
    p2 = jax.nn.softmax(jax.random.normal(k2, (B, C, D, H, W), jnp.float32),
                        axis=1).astype(jnp.bfloat16)
    tgt = jax.random.randint(k3, (B, D, H, W), 0, NUM_ORGAN + 1, dtype=jnp.int32)
    out = jax.block_until_ready(dice_loss(p1, p2, tgt, max_ts=8))
    ref = jax.block_until_ready(dice_loss_ref(p1, p2, tgt))
    np.testing.assert_allclose(np.asarray(out), np.asarray(ref),
                               rtol=1e-5, atol=1e-5)

    print("KERNEL_OK")
</pallas_src>

<mosaic_0001>
module attributes {stable_mosaic.version = 11 : i64} {
  func.func @kernel(%arg0: i32, %arg1: i32, %arg2: memref<1x14x8x128xf32, #tpu.memory_space<vmem>>, %arg3: memref<1x14x8x128xf32, #tpu.memory_space<vmem>>, %arg4: memref<1x8x128xi32, #tpu.memory_space<vmem>>, %arg5: memref<1x1x8x128xf32, #tpu.memory_space<vmem>>) attributes {dimension_semantics = [#tpu.dimension_semantics<parallel>, #tpu.dimension_semantics<parallel>], iteration_bounds = array<i64: 2, 1>, scalar_prefetch = 0 : i64, scratch_operands = 0 : i64, tpu.core_type = #tpu.core_type<tc>, window_params = [{transform_indices = @transform_0, window_bounds = array<i64: 1, 14, 8, 128>}, {transform_indices = @transform_1, window_bounds = array<i64: 1, 14, 8, 128>}, {transform_indices = @transform_2, window_bounds = array<i64: 1, 8, 128>}, {transform_indices = @transform_3, window_bounds = array<i64: 1, 1, 8, 128>}]} {
    %c0 = arith.constant 0 : index
    %c0_0 = arith.constant 0 : index
    %c0_1 = arith.constant 0 : index
    %0 = vector.load %arg4[%c0, %c0_0, %c0_1] : memref<1x8x128xi32, #tpu.memory_space<vmem>>, vector<1x8x128xi32>
    %1 = vector.shape_cast %0 : vector<1x8x128xi32> to vector<8x128xi32>
    %c1_i32 = arith.constant 1 : i32
    %2 = vector.broadcast %c1_i32 : i32 to vector<8x128xi32>
    %3 = arith.cmpi eq, %1, %2 : vector<8x128xi32>
    %4 = arith.extui %3 : vector<8x128xi1> to vector<8x128xi32>
    %5 = arith.sitofp %4 : vector<8x128xi32> to vector<8x128xf32>
    %c0_2 = arith.constant 0 : index
    %c1 = arith.constant 1 : index
    %c0_3 = arith.constant 0 : index
    %c0_4 = arith.constant 0 : index
    %6 = vector.load %arg2[%c0_2, %c1, %c0_3, %c0_4] : memref<1x14x8x128xf32, #tpu.memory_space<vmem>>, vector<1x1x8x128xf32>
    %7 = vector.shape_cast %6 : vector<1x1x8x128xf32> to vector<8x128xf32>
    %c0_5 = arith.constant 0 : index
    %c1_6 = arith.constant 1 : index
    %c0_7 = arith.constant 0 : index
    %c0_8 = arith.constant 0 : index
    %8 = vector.load %arg3[%c0_5, %c1_6, %c0_7, %c0_8] : memref<1x14x8x128xf32, #tpu.memory_space<vmem>>, vector<1x1x8x128xf32>
    %9 = vector.shape_cast %8 : vector<1x1x8x128xf32> to vector<8x128xf32>
    %10 = arith.mulf %7, %5 : vector<8x128xf32>
    %11 = vector.shape_cast %10 : vector<8x128xf32> to vector<1x8x128xf32>
    %cst = arith.constant dense<0.000000e+00> : vector<1xf32>
    %12 = vector.multi_reduction <add>, %11, %cst [1, 2] : vector<1x8x128xf32> to vector<1xf32>
    %13 = vector.shape_cast %12 : vector<1xf32> to vector<1x1x1xf32>
    %14 = vector.extract %13[0, 0, 0] : f32 from vector<1x1x1xf32>
    %15 = arith.mulf %7, %7 : vector<8x128xf32>
    %16 = vector.shape_cast %15 : vector<8x128xf32> to vector<1x8x128xf32>
    %cst_9 = arith.constant dense<0.000000e+00> : vector<1xf32>
    %17 = vector.multi_reduction <add>, %16, %cst_9 [1, 2] : vector<1x8x128xf32> to vector<1xf32>
    %18 = vector.shape_cast %17 : vector<1xf32> to vector<1x1x1xf32>
    %19 = vector.extract %18[0, 0, 0] : f32 from vector<1x1x1xf32>
    %20 = arith.mulf %9, %5 : vector<8x128xf32>
    %21 = vector.shape_cast %20 : vector<8x128xf32> to vector<1x8x128xf32>
    %cst_10 = arith.constant dense<0.000000e+00> : vector<1xf32>
    %22 = vector.multi_reduction <add>, %21, %cst_10 [1, 2] : vector<1x8x128xf32> to vector<1xf32>
    %23 = vector.shape_cast %22 : vector<1xf32> to vector<1x1x1xf32>
    %24 = vector.extract %23[0, 0, 0] : f32 from vector<1x1x1xf32>
    %25 = arith.mulf %9, %9 : vector<8x128xf32>
    %26 = vector.shape_cast %25 : vector<8x128xf32> to vector<1x8x128xf32>
    %cst_11 = arith.constant dense<0.000000e+00> : vector<1xf32>
    %27 = vector.multi_reduction <add>, %26, %cst_11 [1, 2] : vector<1x8x128xf32> to vector<1xf32>
    %28 = vector.shape_cast %27 : vector<1xf32> to vector<1x1x1xf32>
    %29 = vector.extract %28[0, 0, 0] : f32 from vector<1x1x1xf32>
    %30 = vector.shape_cast %5 : vector<8x128xf32> to vector<1x8x128xf32>
    %cst_12 = arith.constant dense<0.000000e+00> : vector<1xf32>
    %31 = vector.multi_reduction <add>, %30, %cst_12 [1, 2] : vector<1x8x128xf32> to vector<1xf32>
    %32 = vector.shape_cast %31 : vector<1xf32> to vector<1x1x1xf32>
    %33 = vector.extract %32[0, 0, 0] : f32 from vector<1x1x1xf32>
    %c2_i32 = arith.constant 2 : i32
    %34 = vector.broadcast %c2_i32 : i32 to vector<8x128xi32>
    %35 = arith.cmpi eq, %1, %34 : vector<8x128xi32>
    %36 = arith.extui %35 : vector<8x128xi1> to vector<8x128xi32>
    %37 = arith.sitofp %36 : vector<8x128xi32> to vector<8x128xf32>
    %c0_13 = arith.constant 0 : index
    %c2 = arith.constant 2 : index
    %c0_14 = arith.constant 0 : index
    %c0_15 = arith.constant 0 : index
    %38 = vector.load %arg2[%c0_13, %c2, %c0_14, %c0_15] : memref<1x14x8x128xf32, #tpu.memory_space<vmem>>, vector<1x1x8x128xf32>
    %39 = vector.shape_cast %38 : vector<1x1x8x128xf32> to vector<8x128xf32>
    %c0_16 = arith.constant 0 : index
    %c2_17 = arith.constant 2 : index
    %c0_18 = arith.constant 0 : index
    %c0_19 = arith.constant 0 : index
    %40 = vector.load %arg3[%c0_16, %c2_17, %c0_18, %c0_19] : memref<1x14x8x128xf32, #tpu.memory_space<vmem>>, vector<1x1x8x128xf32>
    %41 = vector.shape_cast %40 : vector<1x1x8x128xf32> to vector<8x128xf32>
    %42 = arith.mulf %39, %37 : vector<8x128xf32>
    %43 = vector.shape_cast %42 : vector<8x128xf32> to vector<1x8x128xf32>
    %cst_20 = arith.constant dense<0.000000e+00> : vector<1xf32>
    %44 = vector.multi_reduction <add>, %43, %cst_20 [1, 2] : vector<1x8x128xf32> to vector<1xf32>
    %45 = vector.shape_cast %44 : vector<1xf32> to vector<1x1x1xf32>
    %46 = vector.extract %45[0, 0, 0] : f32 from vector<1x1x1xf32>
    %47 = arith.mulf %39, %39 : vector<8x128xf32>
    %48 = vector.shape_cast %47 : vector<8x128xf32> to vector<1x8x128xf32>
    %cst_21 = arith.constant dense<0.000000e+00> : vector<1xf32>
    %49 = vector.multi_reduction <add>, %48, %cst_21 [1, 2] : vector<1x8x128xf32> to vector<1xf32>
    %50 = vector.shape_cast %49 : vector<1xf32> to vector<1x1x1xf32>
    %51 = vector.extract %50[0, 0, 0] : f32 from vector<1x1x1xf32>
    %52 = arith.mulf %41, %37 : vector<8x128xf32>
    %53 = vector.shape_cast %52 : vector<8x128xf32> to vector<1x8x128xf32>
    %cst_22 = arith.constant dense<0.000000e+00> : vector<1xf32>
    %54 = vector.multi_reduction <add>, %53, %cst_22 [1, 2] : vector<1x8x128xf32> to vector<1xf32>
    %55 = vector.shape_cast %54 : vector<1xf32> to vector<1x1x1xf32>
    %56 = vector.extract %55[0, 0, 0] : f32 from vector<1x1x1xf32>
    %57 = arith.mulf %41, %41 : vector<8x128xf32>
    %58 = vector.shape_cast %57 : vector<8x128xf32> to vector<1x8x128xf32>
    %cst_23 = arith.constant dense<0.000000e+00> : vector<1xf32>
    %59 = vector.multi_reduction <add>, %58, %cst_23 [1, 2] : vector<1x8x128xf32> to vector<1xf32>
    %60 = vector.shape_cast %59 : vector<1xf32> to vector<1x1x1xf32>
    %61 = vector.extract %60[0, 0, 0] : f32 from vector<1x1x1xf32>
    %62 = vector.shape_cast %37 : vector<8x128xf32> to vector<1x8x128xf32>
    %cst_24 = arith.constant dense<0.000000e+00> : vector<1xf32>
    %63 = vector.multi_reduction <add>, %62, %cst_24 [1, 2] : vector<1x8x128xf32> to vector<1xf32>
    %64 = vector.shape_cast %63 : vector<1xf32> to vector<1x1x1xf32>
    %65 = vector.extract %64[0, 0, 0] : f32 from vector<1x1x1xf32>
    %c3_i32 = arith.constant 3 : i32
    %66 = vector.broadcast %c3_i32 : i32 to vector<8x128xi32>
    %67 = arith.cmpi eq, %1, %66 : vector<8x128xi32>
    %68 = arith.extui %67 : vector<8x128xi1> to vector<8x128xi32>
    %69 = arith.sitofp %68 : vector<8x128xi32> to vector<8x128xf32>
    %c0_25 = arith.constant 0 : index
    %c3 = arith.constant 3 : index
    %c0_26 = arith.constant 0 : index
    %c0_27 = arith.constant 0 : index
    %70 = vector.load %arg2[%c0_25, %c3, %c0_26, %c0_27] : memref<1x14x8x128xf32, #tpu.memory_space<vmem>>, vector<1x1x8x128xf32>
    %71 = vector.shape_cast %70 : vector<1x1x8x128xf32> to vector<8x128xf32>
    %c0_28 = arith.constant 0 : index
    %c3_29 = arith.constant 3 : index
    %c0_30 = arith.constant 0 : index
    %c0_31 = arith.constant 0 : index
    %72 = vector.load %arg3[%c0_28, %c3_29, %c0_30, %c0_31] : memref<1x14x8x128xf32, #tpu.memory_space<vmem>>, vector<1x1x8x128xf32>
    %73 = vector.shape_cast %72 : vector<1x1x8x128xf32> to vector<8x128xf32>
    %74 = arith.mulf %71, %69 : vector<8x128xf32>
    %75 = vector.shape_cast %74 : vector<8x128xf32> to vector<1x8x128xf32>
    %cst_32 = arith.constant dense<0.000000e+00> : vector<1xf32>
    %76 = vector.multi_reduction <add>, %75, %cst_32 [1, 2] : vector<1x8x128xf32> to vector<1xf32>
    %77 = vector.shape_cast %76 : vector<1xf32> to vector<1x1x1xf32>
    %78 = vector.extract %77[0, 0, 0] : f32 from vector<1x1x1xf32>
    %79 = arith.mulf %71, %71 : vector<8x128xf32>
    %80 = vector.shape_cast %79 : vector<8x128xf32> to vector<1x8x128xf32>
    %cst_33 = arith.constant dense<0.000000e+00> : vector<1xf32>
    %81 = vector.multi_reduction <add>, %80, %cst_33 [1, 2] : vector<1x8x128xf32> to vector<1xf32>
    %82 = vector.shape_cast %81 : vector<1xf32> to vector<1x1x1xf32>
    %83 = vector.extract %82[0, 0, 0] : f32 from vector<1x1x1xf32>
    %84 = arith.mulf %73, %69 : vector<8x128xf32>
    %85 = vector.shape_cast %84 : vector<8x128xf32> to vector<1x8x128xf32>
    %cst_34 = arith.constant dense<0.000000e+00> : vector<1xf32>
    %86 = vector.multi_reduction <add>, %85, %cst_34 [1, 2] : vector<1x8x128xf32> to vector<1xf32>
    %87 = vector.shape_cast %86 : vector<1xf32> to vector<1x1x1xf32>
    %88 = vector.extract %87[0, 0, 0] : f32 from vector<1x1x1xf32>
    %89 = arith.mulf %73, %73 : vector<8x128xf32>
    %90 = vector.shape_cast %89 : vector<8x128xf32> to vector<1x8x128xf32>
    %cst_35 = arith.constant dense<0.000000e+00> : vector<1xf32>
    %91 = vector.multi_reduction <add>, %90, %cst_35 [1, 2] : vector<1x8x128xf32> to vector<1xf32>
    %92 = vector.shape_cast %91 : vector<1xf32> to vector<1x1x1xf32>
    %93 = vector.extract %92[0, 0, 0] : f32 from vector<1x1x1xf32>
    %94 = vector.shape_cast %69 : vector<8x128xf32> to vector<1x8x128xf32>
    %cst_36 = arith.constant dense<0.000000e+00> : vector<1xf32>
    %95 = vector.multi_reduction <add>, %94, %cst_36 [1, 2] : vector<1x8x128xf32> to vector<1xf32>
    %96 = vector.shape_cast %95 : vector<1xf32> to vector<1x1x1xf32>
    %97 = vector.extract %96[0, 0, 0] : f32 from vector<1x1x1xf32>
    %c4_i32 = arith.constant 4 : i32
    %98 = vector.broadcast %c4_i32 : i32 to vector<8x128xi32>
    %99 = arith.cmpi eq, %1, %98 : vector<8x128xi32>
    %100 = arith.extui %99 : vector<8x128xi1> to vector<8x128xi32>
    %101 = arith.sitofp %100 : vector<8x128xi32> to vector<8x128xf32>
    %c0_37 = arith.constant 0 : index
    %c4 = arith.constant 4 : index
    %c0_38 = arith.constant 0 : index
    %c0_39 = arith.constant 0 : index
    %102 = vector.load %arg2[%c0_37, %c4, %c0_38, %c0_39] : memref<1x14x8x128xf32, #tpu.memory_space<vmem>>, vector<1x1x8x128xf32>
    %103 = vector.shape_cast %102 : vector<1x1x8x128xf32> to vector<8x128xf32>
    %c0_40 = arith.constant 0 : index
    %c4_41 = arith.constant 4 : index
    %c0_42 = arith.constant 0 : index
    %c0_43 = arith.constant 0 : index
    %104 = vector.load %arg3[%c0_40, %c4_41, %c0_42, %c0_43] : memref<1x14x8x128xf32, #tpu.memory_space<vmem>>, vector<1x1x8x128xf32>
    %105 = vector.shape_cast %104 : vector<1x1x8x128xf32> to vector<8x128xf32>
    %106 = arith.mulf %103, %101 : vector<8x128xf32>
    %107 = vector.shape_cast %106 : vector<8x128xf32> to vector<1x8x128xf32>
    %cst_44 = arith.constant dense<0.000000e+00> : vector<1xf32>
    %108 = vector.multi_reduction <add>, %107, %cst_44 [1, 2] : vector<1x8x128xf32> to vector<1xf32>
    %109 = vector.shape_cast %108 : vector<1xf32> to vector<1x1x1xf32>
    %110 = vector.extract %109[0, 0, 0] : f32 from vector<1x1x1xf32>
    %111 = arith.mulf %103, %103 : vector<8x128xf32>
    %112 = vector.shape_cast %111 : vector<8x128xf32> to vector<1x8x128xf32>
    %cst_45 = arith.constant dense<0.000000e+00> : vector<1xf32>
    %113 = vector.multi_reduction <add>, %112, %cst_45 [1, 2] : vector<1x8x128xf32> to vector<1xf32>
    %114 = vector.shape_cast %113 : vector<1xf32> to vector<1x1x1xf32>
    %115 = vector.extract %114[0, 0, 0] : f32 from vector<1x1x1xf32>
    %116 = arith.mulf %105, %101 : vector<8x128xf32>
    %117 = vector.shape_cast %116 : vector<8x128xf32> to vector<1x8x128xf32>
    %cst_46 = arith.constant dense<0.000000e+00> : vector<1xf32>
    %118 = vector.multi_reduction <add>, %117, %cst_46 [1, 2] : vector<1x8x128xf32> to vector<1xf32>
    %119 = vector.shape_cast %118 : vector<1xf32> to vector<1x1x1xf32>
    %120 = vector.extract %119[0, 0, 0] : f32 from vector<1x1x1xf32>
    %121 = arith.mulf %105, %105 : vector<8x128xf32>
    %122 = vector.shape_cast %121 : vector<8x128xf32> to vector<1x8x128xf32>
    %cst_47 = arith.constant dense<0.000000e+00> : vector<1xf32>
    %123 = vector.multi_reduction <add>, %122, %cst_47 [1, 2] : vector<1x8x128xf32> to vector<1xf32>
    %124 = vector.shape_cast %123 : vector<1xf32> to vector<1x1x1xf32>
    %125 = vector.extract %124[0, 0, 0] : f32 from vector<1x1x1xf32>
    %126 = vector.shape_cast %101 : vector<8x128xf32> to vector<1x8x128xf32>
    %cst_48 = arith.constant dense<0.000000e+00> : vector<1xf32>
    %127 = vector.multi_reduction <add>, %126, %cst_48 [1, 2] : vector<1x8x128xf32> to vector<1xf32>
    %128 = vector.shape_cast %127 : vector<1xf32> to vector<1x1x1xf32>
    %129 = vector.extract %128[0, 0, 0] : f32 from vector<1x1x1xf32>
    %c5_i32 = arith.constant 5 : i32
    %130 = vector.broadcast %c5_i32 : i32 to vector<8x128xi32>
    %131 = arith.cmpi eq, %1, %130 : vector<8x128xi32>
    %132 = arith.extui %131 : vector<8x128xi1> to vector<8x128xi32>
    %133 = arith.sitofp %132 : vector<8x128xi32> to vector<8x128xf32>
    %c0_49 = arith.constant 0 : index
    %c5 = arith.constant 5 : index
    %c0_50 = arith.constant 0 : index
    %c0_51 = arith.constant 0 : index
    %134 = vector.load %arg2[%c0_49, %c5, %c0_50, %c0_51] : memref<1x14x8x128xf32, #tpu.memory_space<vmem>>, vector<1x1x8x128xf32>
    %135 = vector.shape_cast %134 : vector<1x1x8x128xf32> to vector<8x128xf32>
    %c0_52 = arith.constant 0 : index
    %c5_53 = arith.constant 5 : index
    %c0_54 = arith.constant 0 : index
    %c0_55 = arith.constant 0 : index
    %136 = vector.load %arg3[%c0_52, %c5_53, %c0_54, %c0_55] : memref<1x14x8x128xf32, #tpu.memory_space<vmem>>, vector<1x1x8x128xf32>
    %137 = vector.shape_cast %136 : vector<1x1x8x128xf32> to vector<8x128xf32>
    %138 = arith.mulf %135, %133 : vector<8x128xf32>
    %139 = vector.shape_cast %138 : vector<8x128xf32> to vector<1x8x128xf32>
    %cst_56 = arith.constant dense<0.000000e+00> : vector<1xf32>
    %140 = vector.multi_reduction <add>, %139, %cst_56 [1, 2] : vector<1x8x128xf32> to vector<1xf32>
    %141 = vector.shape_cast %140 : vector<1xf32> to vector<1x1x1xf32>
    %142 = vector.extract %141[0, 0, 0] : f32 from vector<1x1x1xf32>
    %143 = arith.mulf %135, %135 : vector<8x128xf32>
    %144 = vector.shape_cast %143 : vector<8x128xf32> to vector<1x8x128xf32>
    %cst_57 = arith.constant dense<0.000000e+00> : vector<1xf32>
    %145 = vector.multi_reduction <add>, %144, %cst_57 [1, 2] : vector<1x8x128xf32> to vector<1xf32>
    %146 = vector.shape_cast %145 : vector<1xf32> to vector<1x1x1xf32>
    %147 = vector.extract %146[0, 0, 0] : f32 from vector<1x1x1xf32>
    %148 = arith.mulf %137, %133 : vector<8x128xf32>
    %149 = vector.shape_cast %148 : vector<8x128xf32> to vector<1x8x128xf32>
    %cst_58 = arith.constant dense<0.000000e+00> : vector<1xf32>
    %150 = vector.multi_reduction <add>, %149, %cst_58 [1, 2] : vector<1x8x128xf32> to vector<1xf32>
    %151 = vector.shape_cast %150 : vector<1xf32> to vector<1x1x1xf32>
    %152 = vector.extract %151[0, 0, 0] : f32 from vector<1x1x1xf32>
    %153 = arith.mulf %137, %137 : vector<8x128xf32>
    %154 = vector.shape_cast %153 : vector<8x128xf32> to vector<1x8x128xf32>
    %cst_59 = arith.constant dense<0.000000e+00> : vector<1xf32>
    %155 = vector.multi_reduction <add>, %154, %cst_59 [1, 2] : vector<1x8x128xf32> to vector<1xf32>
    %156 = vector.shape_cast %155 : vector<1xf32> to vector<1x1x1xf32>
    %157 = vector.extract %156[0, 0, 0] : f32 from vector<1x1x1xf32>
    %158 = vector.shape_cast %133 : vector<8x128xf32> to vector<1x8x128xf32>
    %cst_60 = arith.constant dense<0.000000e+00> : vector<1xf32>
    %159 = vector.multi_reduction <add>, %158, %cst_60 [1, 2] : vector<1x8x128xf32> to vector<1xf32>
    %160 = vector.shape_cast %159 : vector<1xf32> to vector<1x1x1xf32>
    %161 = vector.extract %160[0, 0, 0] : f32 from vector<1x1x1xf32>
    %c6_i32 = arith.constant 6 : i32
    %162 = vector.broadcast %c6_i32 : i32 to vector<8x128xi32>
    %163 = arith.cmpi eq, %1, %162 : vector<8x128xi32>
    %164 = arith.extui %163 : vector<8x128xi1> to vector<8x128xi32>
    %165 = arith.sitofp %164 : vector<8x128xi32> to vector<8x128xf32>
    %c0_61 = arith.constant 0 : index
    %c6 = arith.constant 6 : index
    %c0_62 = arith.constant 0 : index
    %c0_63 = arith.constant 0 : index
    %166 = vector.load %arg2[%c0_61, %c6, %c0_62, %c0_63] : memref<1x14x8x128xf32, #tpu.memory_space<vmem>>, vector<1x1x8x128xf32>
    %167 = vector.shape_cast %166 : vector<1x1x8x128xf32> to vector<8x128xf32>
    %c0_64 = arith.constant 0 : index
    %c6_65 = arith.constant 6 : index
    %c0_66 = arith.constant 0 : index
    %c0_67 = arith.constant 0 : index
    %168 = vector.load %arg3[%c0_64, %c6_65, %c0_66, %c0_67] : memref<1x14x8x128xf32, #tpu.memory_space<vmem>>, vector<1x1x8x128xf32>
    %169 = vector.shape_cast %168 : vector<1x1x8x128xf32> to vector<8x128xf32>
    %170 = arith.mulf %167, %165 : vector<8x128xf32>
    %171 = vector.shape_cast %170 : vector<8x128xf32> to vector<1x8x128xf32>
    %cst_68 = arith.constant dense<0.000000e+00> : vector<1xf32>
    %172 = vector.multi_reduction <add>, %171, %cst_68 [1, 2] : vector<1x8x128xf32> to vector<1xf32>
    %173 = vector.shape_cast %172 : vector<1xf32> to vector<1x1x1xf32>
    %174 = vector.extract %173[0, 0, 0] : f32 from vector<1x1x1xf32>
    %175 = arith.mulf %167, %167 : vector<8x128xf32>
    %176 = vector.shape_cast %175 : vector<8x128xf32> to vector<1x8x128xf32>
    %cst_69 = arith.constant dense<0.000000e+00> : vector<1xf32>
    %177 = vector.multi_reduction <add>, %176, %cst_69 [1, 2] : vector<1x8x128xf32> to vector<1xf32>
    %178 = vector.shape_cast %177 : vector<1xf32> to vector<1x1x1xf32>
    %179 = vector.extract %178[0, 0, 0] : f32 from vector<1x1x1xf32>
    %180 = arith.mulf %169, %165 : vector<8x128xf32>
    %181 = vector.shape_cast %180 : vector<8x128xf32> to vector<1x8x128xf32>
    %cst_70 = arith.constant dense<0.000000e+00> : vector<1xf32>
    %182 = vector.multi_reduction <add>, %181, %cst_70 [1, 2] : vector<1x8x128xf32> to vector<1xf32>
    %183 = vector.shape_cast %182 : vector<1xf32> to vector<1x1x1xf32>
    %184 = vector.extract %183[0, 0, 0] : f32 from vector<1x1x1xf32>
    %185 = arith.mulf %169, %169 : vector<8x128xf32>
    %186 = vector.shape_cast %185 : vector<8x128xf32> to vector<1x8x128xf32>
    %cst_71 = arith.constant dense<0.000000e+00> : vector<1xf32>
    %187 = vector.multi_reduction <add>, %186, %cst_71 [1, 2] : vector<1x8x128xf32> to vector<1xf32>
    %188 = vector.shape_cast %187 : vector<1xf32> to vector<1x1x1xf32>
    %189 = vector.extract %188[0, 0, 0] : f32 from vector<1x1x1xf32>
    %190 = vector.shape_cast %165 : vector<8x128xf32> to vector<1x8x128xf32>
    %cst_72 = arith.constant dense<0.000000e+00> : vector<1xf32>
    %191 = vector.multi_reduction <add>, %190, %cst_72 [1, 2] : vector<1x8x128xf32> to vector<1xf32>
    %192 = vector.shape_cast %191 : vector<1xf32> to vector<1x1x1xf32>
    %193 = vector.extract %192[0, 0, 0] : f32 from vector<1x1x1xf32>
    %c7_i32 = arith.constant 7 : i32
    %194 = vector.broadcast %c7_i32 : i32 to vector<8x128xi32>
    %195 = arith.cmpi eq, %1, %194 : vector<8x128xi32>
    %196 = arith.extui %195 : vector<8x128xi1> to vector<8x128xi32>
    %197 = arith.sitofp %196 : vector<8x128xi32> to vector<8x128xf32>
    %c0_73 = arith.constant 0 : index
    %c7 = arith.constant 7 : index
    %c0_74 = arith.constant 0 : index
    %c0_75 = arith.constant 0 : index
    %198 = vector.load %arg2[%c0_73, %c7, %c0_74, %c0_75] : memref<1x14x8x128xf32, #tpu.memory_space<vmem>>, vector<1x1x8x128xf32>
    %199 = vector.shape_cast %198 : vector<1x1x8x128xf32> to vector<8x128xf32>
    %c0_76 = arith.constant 0 : index
    %c7_77 = arith.constant 7 : index
    %c0_78 = arith.constant 0 : index
    %c0_79 = arith.constant 0 : index
    %200 = vector.load %arg3[%c0_76, %c7_77, %c0_78, %c0_79] : memref<1x14x8x128xf32, #tpu.memory_space<vmem>>, vector<1x1x8x128xf32>
    %201 = vector.shape_cast %200 : vector<1x1x8x128xf32> to vector<8x128xf32>
    %202 = arith.mulf %199, %197 : vector<8x128xf32>
    %203 = vector.shape_cast %202 : vector<8x128xf32> to vector<1x8x128xf32>
    %cst_80 = arith.constant dense<0.000000e+00> : vector<1xf32>
    %204 = vector.multi_reduction <add>, %203, %cst_80 [1, 2] : vector<1x8x128xf32> to vector<1xf32>
    %205 = vector.shape_cast %204 : vector<1xf32> to vector<1x1x1xf32>
    %206 = vector.extract %205[0, 0, 0] : f32 from vector<1x1x1xf32>
    %207 = arith.mulf %199, %199 : vector<8x128xf32>
    %208 = vector.shape_cast %207 : vector<8x128xf32> to vector<1x8x128xf32>
    %cst_81 = arith.constant dense<0.000000e+00> : vector<1xf32>
    %209 = vector.multi_reduction <add>, %208, %cst_81 [1, 2] : vector<1x8x128xf32> to vector<1xf32>
    %210 = vector.shape_cast %209 : vector<1xf32> to vector<1x1x1xf32>
    %211 = vector.extract %210[0, 0, 0] : f32 from vector<1x1x1xf32>
    %212 = arith.mulf %201, %197 : vector<8x128xf32>
    %213 = vector.shape_cast %212 : vector<8x128xf32> to vector<1x8x128xf32>
    %cst_82 = arith.constant dense<0.000000e+00> : vector<1xf32>
    %214 = vector.multi_reduction <add>, %213, %cst_82 [1, 2] : vector<1x8x128xf32> to vector<1xf32>
    %215 = vector.shape_cast %214 : vector<1xf32> to vector<1x1x1xf32>
    %216 = vector.extract %215[0, 0, 0] : f32 from vector<1x1x1xf32>
    %217 = arith.mulf %201, %201 : vector<8x128xf32>
    %218 = vector.shape_cast %217 : vector<8x128xf32> to vector<1x8x128xf32>
    %cst_83 = arith.constant dense<0.000000e+00> : vector<1xf32>
    %219 = vector.multi_reduction <add>, %218, %cst_83 [1, 2] : vector<1x8x128xf32> to vector<1xf32>
    %220 = vector.shape_cast %219 : vector<1xf32> to vector<1x1x1xf32>
    %221 = vector.extract %220[0, 0, 0] : f32 from vector<1x1x1xf32>
    %222 = vector.shape_cast %197 : vector<8x128xf32> to vector<1x8x128xf32>
    %cst_84 = arith.constant dense<0.000000e+00> : vector<1xf32>
    %223 = vector.multi_reduction <add>, %222, %cst_84 [1, 2] : vector<1x8x128xf32> to vector<1xf32>
    %224 = vector.shape_cast %223 : vector<1xf32> to vector<1x1x1xf32>
    %225 = vector.extract %224[0, 0, 0] : f32 from vector<1x1x1xf32>
    %c8_i32 = arith.constant 8 : i32
    %226 = vector.broadcast %c8_i32 : i32 to vector<8x128xi32>
    %227 = arith.cmpi eq, %1, %226 : vector<8x128xi32>
    %228 = arith.extui %227 : vector<8x128xi1> to vector<8x128xi32>
    %229 = arith.sitofp %228 : vector<8x128xi32> to vector<8x128xf32>
    %c0_85 = arith.constant 0 : index
    %c8 = arith.constant 8 : index
    %c0_86 = arith.constant 0 : index
    %c0_87 = arith.constant 0 : index
    %230 = vector.load %arg2[%c0_85, %c8, %c0_86, %c0_87] : memref<1x14x8x128xf32, #tpu.memory_space<vmem>>, vector<1x1x8x128xf32>
    %231 = vector.shape_cast %230 : vector<1x1x8x128xf32> to vector<8x128xf32>
    %c0_88 = arith.constant 0 : index
    %c8_89 = arith.constant 8 : index
    %c0_90 = arith.constant 0 : index
    %c0_91 = arith.constant 0 : index
    %232 = vector.load %arg3[%c0_88, %c8_89, %c0_90, %c0_91] : memref<1x14x8x128xf32, #tpu.memory_space<vmem>>, vector<1x1x8x128xf32>
    %233 = vector.shape_cast %232 : vector<1x1x8x128xf32> to vector<8x128xf32>
    %234 = arith.mulf %231, %229 : vector<8x128xf32>
    %235 = vector.shape_cast %234 : vector<8x128xf32> to vector<1x8x128xf32>
    %cst_92 = arith.constant dense<0.000000e+00> : vector<1xf32>
    %236 = vector.multi_reduction <add>, %235, %cst_92 [1, 2] : vector<1x8x128xf32> to vector<1xf32>
    %237 = vector.shape_cast %236 : vector<1xf32> to vector<1x1x1xf32>
    %238 = vector.extract %237[0, 0, 0] : f32 from vector<1x1x1xf32>
    %239 = arith.mulf %231, %231 : vector<8x128xf32>
    %240 = vector.shape_cast %239 : vector<8x128xf32> to vector<1x8x128xf32>
    %cst_93 = arith.constant dense<0.000000e+00> : vector<1xf32>
    %241 = vector.multi_reduction <add>, %240, %cst_93 [1, 2] : vector<1x8x128xf32> to vector<1xf32>
    %242 = vector.shape_cast %241 : vector<1xf32> to vector<1x1x1xf32>
    %243 = vector.extract %242[0, 0, 0] : f32 from vector<1x1x1xf32>
    %244 = arith.mulf %233, %229 : vector<8x128xf32>
    %245 = vector.shape_cast %244 : vector<8x128xf32> to vector<1x8x128xf32>
    %cst_94 = arith.constant dense<0.000000e+00> : vector<1xf32>
    %246 = vector.multi_reduction <add>, %245, %cst_94 [1, 2] : vector<1x8x128xf32> to vector<1xf32>
    %247 = vector.shape_cast %246 : vector<1xf32> to vector<1x1x1xf32>
    %248 = vector.extract %247[0, 0, 0] : f32 from vector<1x1x1xf32>
    %249 = arith.mulf %233, %233 : vector<8x128xf32>
    %250 = vector.shape_cast %249 : vector<8x128xf32> to vector<1x8x128xf32>
    %cst_95 = arith.constant dense<0.000000e+00> : vector<1xf32>
    %251 = vector.multi_reduction <add>, %250, %cst_95 [1, 2] : vector<1x8x128xf32> to vector<1xf32>
    %252 = vector.shape_cast %251 : vector<1xf32> to vector<1x1x1xf32>
    %253 = vector.extract %252[0, 0, 0] : f32 from vector<1x1x1xf32>
    %254 = vector.shape_cast %229 : vector<8x128xf32> to vector<1x8x128xf32>
    %cst_96 = arith.constant dense<0.000000e+00> : vector<1xf32>
    %255 = vector.multi_reduction <add>, %254, %cst_96 [1, 2] : vector<1x8x128xf32> to vector<1xf32>
    %256 = vector.shape_cast %255 : vector<1xf32> to vector<1x1x1xf32>
    %257 = vector.extract %256[0, 0, 0] : f32 from vector<1x1x1xf32>
    %c9_i32 = arith.constant 9 : i32
    %258 = vector.broadcast %c9_i32 : i32 to vector<8x128xi32>
    %259 = arith.cmpi eq, %1, %258 : vector<8x128xi32>
    %260 = arith.extui %259 : vector<8x128xi1> to vector<8x128xi32>
    %261 = arith.sitofp %260 : vector<8x128xi32> to vector<8x128xf32>
    %c0_97 = arith.constant 0 : index
    %c9 = arith.constant 9 : index
    %c0_98 = arith.constant 0 : index
    %c0_99 = arith.constant 0 : index
    %262 = vector.load %arg2[%c0_97, %c9, %c0_98, %c0_99] : memref<1x14x8x128xf32, #tpu.memory_space<vmem>>, vector<1x1x8x128xf32>
    %263 = vector.shape_cast %262 : vector<1x1x8x128xf32> to vector<8x128xf32>
    %c0_100 = arith.constant 0 : index
    %c9_101 = arith.constant 9 : index
    %c0_102 = arith.constant 0 : index
    %c0_103 = arith.constant 0 : index
    %264 = vector.load %arg3[%c0_100, %c9_101, %c0_102, %c0_103] : memref<1x14x8x128xf32, #tpu.memory_space<vmem>>, vector<1x1x8x128xf32>
    %265 = vector.shape_cast %264 : vector<1x1x8x128xf32> to vector<8x128xf32>
    %266 = arith.mulf %263, %261 : vector<8x128xf32>
    %267 = vector.shape_cast %266 : vector<8x128xf32> to vector<1x8x128xf32>
    %cst_104 = arith.constant dense<0.000000e+00> : vector<1xf32>
    %268 = vector.multi_reduction <add>, %267, %cst_104 [1, 2] : vector<1x8x128xf32> to vector<1xf32>
    %269 = vector.shape_cast %268 : vector<1xf32> to vector<1x1x1xf32>
    %270 = vector.extract %269[0, 0, 0] : f32 from vector<1x1x1xf32>
    %271 = arith.mulf %263, %263 : vector<8x128xf32>
    %272 = vector.shape_cast %271 : vector<8x128xf32> to vector<1x8x128xf32>
    %cst_105 = arith.constant dense<0.000000e+00> : vector<1xf32>
    %273 = vector.multi_reduction <add>, %272, %cst_105 [1, 2] : vector<1x8x128xf32> to vector<1xf32>
    %274 = vector.shape_cast %273 : vector<1xf32> to vector<1x1x1xf32>
    %275 = vector.extract %274[0, 0, 0] : f32 from vector<1x1x1xf32>
    %276 = arith.mulf %265, %261 : vector<8x128xf32>
    %277 = vector.shape_cast %276 : vector<8x128xf32> to vector<1x8x128xf32>
    %cst_106 = arith.constant dense<0.000000e+00> : vector<1xf32>
    %278 = vector.multi_reduction <add>, %277, %cst_106 [1, 2] : vector<1x8x128xf32> to vector<1xf32>
    %279 = vector.shape_cast %278 : vector<1xf32> to vector<1x1x1xf32>
    %280 = vector.extract %279[0, 0, 0] : f32 from vector<1x1x1xf32>
    %281 = arith.mulf %265, %265 : vector<8x128xf32>
    %282 = vector.shape_cast %281 : vector<8x128xf32> to vector<1x8x128xf32>
    %cst_107 = arith.constant dense<0.000000e+00> : vector<1xf32>
    %283 = vector.multi_reduction <add>, %282, %cst_107 [1, 2] : vector<1x8x128xf32> to vector<1xf32>
    %284 = vector.shape_cast %283 : vector<1xf32> to vector<1x1x1xf32>
    %285 = vector.extract %284[0, 0, 0] : f32 from vector<1x1x1xf32>
    %286 = vector.shape_cast %261 : vector<8x128xf32> to vector<1x8x128xf32>
    %cst_108 = arith.constant dense<0.000000e+00> : vector<1xf32>
    %287 = vector.multi_reduction <add>, %286, %cst_108 [1, 2] : vector<1x8x128xf32> to vector<1xf32>
    %288 = vector.shape_cast %287 : vector<1xf32> to vector<1x1x1xf32>
    %289 = vector.extract %288[0, 0, 0] : f32 from vector<1x1x1xf32>
    %c10_i32 = arith.constant 10 : i32
    %290 = vector.broadcast %c10_i32 : i32 to vector<8x128xi32>
    %291 = arith.cmpi eq, %1, %290 : vector<8x128xi32>
    %292 = arith.extui %291 : vector<8x128xi1> to vector<8x128xi32>
    %293 = arith.sitofp %292 : vector<8x128xi32> to vector<8x128xf32>
    %c0_109 = arith.constant 0 : index
    %c10 = arith.constant 10 : index
    %c0_110 = arith.constant 0 : index
    %c0_111 = arith.constant 0 : index
    %294 = vector.load %arg2[%c0_109, %c10, %c0_110, %c0_111] : memref<1x14x8x128xf32, #tpu.memory_space<vmem>>, vector<1x1x8x128xf32>
    %295 = vector.shape_cast %294 : vector<1x1x8x128xf32> to vector<8x128xf32>
    %c0_112 = arith.constant 0 : index
    %c10_113 = arith.constant 10 : index
    %c0_114 = arith.constant 0 : index
    %c0_115 = arith.constant 0 : index
    %296 = vector.load %arg3[%c0_112, %c10_113, %c0_114, %c0_115] : memref<1x14x8x128xf32, #tpu.memory_space<vmem>>, vector<1x1x8x128xf32>
    %297 = vector.shape_cast %296 : vector<1x1x8x128xf32> to vector<8x128xf32>
    %298 = arith.mulf %295, %293 : vector<8x128xf32>
    %299 = vector.shape_cast %298 : vector<8x128xf32> to vector<1x8x128xf32>
    %cst_116 = arith.constant dense<0.000000e+00> : vector<1xf32>
    %300 = vector.multi_reduction <add>, %299, %cst_116 [1, 2] : vector<1x8x128xf32> to vector<1xf32>
    %301 = vector.shape_cast %300 : vector<1xf32> to vector<1x1x1xf32>
    %302 = vector.extract %301[0, 0, 0] : f32 from vector<1x1x1xf32>
    %303 = arith.mulf %295, %295 : vector<8x128xf32>
    %304 = vector.shape_cast %303 : vector<8x128xf32> to vector<1x8x128xf32>
    %cst_117 = arith.constant dense<0.000000e+00> : vector<1xf32>
    %305 = vector.multi_reduction <add>, %304, %cst_117 [1, 2] : vector<1x8x128xf32> to vector<1xf32>
    %306 = vector.shape_cast %305 : vector<1xf32> to vector<1x1x1xf32>
    %307 = vector.extract %306[0, 0, 0] : f32 from vector<1x1x1xf32>
    %308 = arith.mulf %297, %293 : vector<8x128xf32>
    %309 = vector.shape_cast %308 : vector<8x128xf32> to vector<1x8x128xf32>
    %cst_118 = arith.constant dense<0.000000e+00> : vector<1xf32>
    %310 = vector.multi_reduction <add>, %309, %cst_118 [1, 2] : vector<1x8x128xf32> to vector<1xf32>
    %311 = vector.shape_cast %310 : vector<1xf32> to vector<1x1x1xf32>
    %312 = vector.extract %311[0, 0, 0] : f32 from vector<1x1x1xf32>
    %313 = arith.mulf %297, %297 : vector<8x128xf32>
    %314 = vector.shape_cast %313 : vector<8x128xf32> to vector<1x8x128xf32>
    %cst_119 = arith.constant dense<0.000000e+00> : vector<1xf32>
    %315 = vector.multi_reduction <add>, %314, %cst_119 [1, 2] : vector<1x8x128xf32> to vector<1xf32>
    %316 = vector.shape_cast %315 : vector<1xf32> to vector<1x1x1xf32>
    %317 = vector.extract %316[0, 0, 0] : f32 from vector<1x1x1xf32>
    %318 = vector.shape_cast %293 : vector<8x128xf32> to vector<1x8x128xf32>
    %cst_120 = arith.constant dense<0.000000e+00> : vector<1xf32>
    %319 = vector.multi_reduction <add>, %318, %cst_120 [1, 2] : vector<1x8x128xf32> to vector<1xf32>
    %320 = vector.shape_cast %319 : vector<1xf32> to vector<1x1x1xf32>
    %321 = vector.extract %320[0, 0, 0] : f32 from vector<1x1x1xf32>
    %c11_i32 = arith.constant 11 : i32
    %322 = vector.broadcast %c11_i32 : i32 to vector<8x128xi32>
    %323 = arith.cmpi eq, %1, %322 : vector<8x128xi32>
    %324 = arith.extui %323 : vector<8x128xi1> to vector<8x128xi32>
    %325 = arith.sitofp %324 : vector<8x128xi32> to vector<8x128xf32>
    %c0_121 = arith.constant 0 : index
    %c11 = arith.constant 11 : index
    %c0_122 = arith.constant 0 : index
    %c0_123 = arith.constant 0 : index
    %326 = vector.load %arg2[%c0_121, %c11, %c0_122, %c0_123] : memref<1x14x8x128xf32, #tpu.memory_space<vmem>>, vector<1x1x8x128xf32>
    %327 = vector.shape_cast %326 : vector<1x1x8x128xf32> to vector<8x128xf32>
    %c0_124 = arith.constant 0 : index
    %c11_125 = arith.constant 11 : index
    %c0_126 = arith.constant 0 : index
    %c0_127 = arith.constant 0 : index
    %328 = vector.load %arg3[%c0_124, %c11_125, %c0_126, %c0_127] : memref<1x14x8x128xf32, #tpu.memory_space<vmem>>, vector<1x1x8x128xf32>
    %329 = vector.shape_cast %328 : vector<1x1x8x128xf32> to vector<8x128xf32>
    %330 = arith.mulf %327, %325 : vector<8x128xf32>
    %331 = vector.shape_cast %330 : vector<8x128xf32> to vector<1x8x128xf32>
    %cst_128 = arith.constant dense<0.000000e+00> : vector<1xf32>
    %332 = vector.multi_reduction <add>, %331, %cst_128 [1, 2] : vector<1x8x128xf32> to vector<1xf32>
    %333 = vector.shape_cast %332 : vector<1xf32> to vector<1x1x1xf32>
    %334 = vector.extract %333[0, 0, 0] : f32 from vector<1x1x1xf32>
    %335 = arith.mulf %327, %327 : vector<8x128xf32>
    %336 = vector.shape_cast %335 : vector<8x128xf32> to vector<1x8x128xf32>
    %cst_129 = arith.constant dense<0.000000e+00> : vector<1xf32>
    %337 = vector.multi_reduction <add>, %336, %cst_129 [1, 2] : vector<1x8x128xf32> to vector<1xf32>
    %338 = vector.shape_cast %337 : vector<1xf32> to vector<1x1x1xf32>
    %339 = vector.extract %338[0, 0, 0] : f32 from vector<1x1x1xf32>
    %340 = arith.mulf %329, %325 : vector<8x128xf32>
    %341 = vector.shape_cast %340 : vector<8x128xf32> to vector<1x8x128xf32>
    %cst_130 = arith.constant dense<0.000000e+00> : vector<1xf32>
    %342 = vector.multi_reduction <add>, %341, %cst_130 [1, 2] : vector<1x8x128xf32> to vector<1xf32>
    %343 = vector.shape_cast %342 : vector<1xf32> to vector<1x1x1xf32>
    %344 = vector.extract %343[0, 0, 0] : f32 from vector<1x1x1xf32>
    %345 = arith.mulf %329, %329 : vector<8x128xf32>
    %346 = vector.shape_cast %345 : vector<8x128xf32> to vector<1x8x128xf32>
    %cst_131 = arith.constant dense<0.000000e+00> : vector<1xf32>
    %347 = vector.multi_reduction <add>, %346, %cst_131 [1, 2] : vector<1x8x128xf32> to vector<1xf32>
    %348 = vector.shape_cast %347 : vector<1xf32> to vector<1x1x1xf32>
    %349 = vector.extract %348[0, 0, 0] : f32 from vector<1x1x1xf32>
    %350 = vector.shape_cast %325 : vector<8x128xf32> to vector<1x8x128xf32>
    %cst_132 = arith.constant dense<0.000000e+00> : vector<1xf32>
    %351 = vector.multi_reduction <add>, %350, %cst_132 [1, 2] : vector<1x8x128xf32> to vector<1xf32>
    %352 = vector.shape_cast %351 : vector<1xf32> to vector<1x1x1xf32>
    %353 = vector.extract %352[0, 0, 0] : f32 from vector<1x1x1xf32>
    %c12_i32 = arith.constant 12 : i32
    %354 = vector.broadcast %c12_i32 : i32 to vector<8x128xi32>
    %355 = arith.cmpi eq, %1, %354 : vector<8x128xi32>
    %356 = arith.extui %355 : vector<8x128xi1> to vector<8x128xi32>
    %357 = arith.sitofp %356 : vector<8x128xi32> to vector<8x128xf32>
    %c0_133 = arith.constant 0 : index
    %c12 = arith.constant 12 : index
    %c0_134 = arith.constant 0 : index
    %c0_135 = arith.constant 0 : index
    %358 = vector.load %arg2[%c0_133, %c12, %c0_134, %c0_135] : memref<1x14x8x128xf32, #tpu.memory_space<vmem>>, vector<1x1x8x128xf32>
    %359 = vector.shape_cast %358 : vector<1x1x8x128xf32> to vector<8x128xf32>
    %c0_136 = arith.constant 0 : index
    %c12_137 = arith.constant 12 : index
    %c0_138 = arith.constant 0 : index
    %c0_139 = arith.constant 0 : index
    %360 = vector.load %arg3[%c0_136, %c12_137, %c0_138, %c0_139] : memref<1x14x8x128xf32, #tpu.memory_space<vmem>>, vector<1x1x8x128xf32>
    %361 = vector.shape_cast %360 : vector<1x1x8x128xf32> to vector<8x128xf32>
    %362 = arith.mulf %359, %357 : vector<8x128xf32>
    %363 = vector.shape_cast %362 : vector<8x128xf32> to vector<1x8x128xf32>
    %cst_140 = arith.constant dense<0.000000e+00> : vector<1xf32>
    %364 = vector.multi_reduction <add>, %363, %cst_140 [1, 2] : vector<1x8x128xf32> to vector<1xf32>
    %365 = vector.shape_cast %364 : vector<1xf32> to vector<1x1x1xf32>
    %366 = vector.extract %365[0, 0, 0] : f32 from vector<1x1x1xf32>
    %367 = arith.mulf %359, %359 : vector<8x128xf32>
    %368 = vector.shape_cast %367 : vector<8x128xf32> to vector<1x8x128xf32>
    %cst_141 = arith.constant dense<0.000000e+00> : vector<1xf32>
    %369 = vector.multi_reduction <add>, %368, %cst_141 [1, 2] : vector<1x8x128xf32> to vector<1xf32>
    %370 = vector.shape_cast %369 : vector<1xf32> to vector<1x1x1xf32>
    %371 = vector.extract %370[0, 0, 0] : f32 from vector<1x1x1xf32>
    %372 = arith.mulf %361, %357 : vector<8x128xf32>
    %373 = vector.shape_cast %372 : vector<8x128xf32> to vector<1x8x128xf32>
    %cst_142 = arith.constant dense<0.000000e+00> : vector<1xf32>
    %374 = vector.multi_reduction <add>, %373, %cst_142 [1, 2] : vector<1x8x128xf32> to vector<1xf32>
    %375 = vector.shape_cast %374 : vector<1xf32> to vector<1x1x1xf32>
    %376 = vector.extract %375[0, 0, 0] : f32 from vector<1x1x1xf32>
    %377 = arith.mulf %361, %361 : vector<8x128xf32>
    %378 = vector.shape_cast %377 : vector<8x128xf32> to vector<1x8x128xf32>
    %cst_143 = arith.constant dense<0.000000e+00> : vector<1xf32>
    %379 = vector.multi_reduction <add>, %378, %cst_143 [1, 2] : vector<1x8x128xf32> to vector<1xf32>
    %380 = vector.shape_cast %379 : vector<1xf32> to vector<1x1x1xf32>
    %381 = vector.extract %380[0, 0, 0] : f32 from vector<1x1x1xf32>
    %382 = vector.shape_cast %357 : vector<8x128xf32> to vector<1x8x128xf32>
    %cst_144 = arith.constant dense<0.000000e+00> : vector<1xf32>
    %383 = vector.multi_reduction <add>, %382, %cst_144 [1, 2] : vector<1x8x128xf32> to vector<1xf32>
    %384 = vector.shape_cast %383 : vector<1xf32> to vector<1x1x1xf32>
    %385 = vector.extract %384[0, 0, 0] : f32 from vector<1x1x1xf32>
    %c13_i32 = arith.constant 13 : i32
    %386 = vector.broadcast %c13_i32 : i32 to vector<8x128xi32>
    %387 = arith.cmpi eq, %1, %386 : vector<8x128xi32>
    %388 = arith.extui %387 : vector<8x128xi1> to vector<8x128xi32>
    %389 = arith.sitofp %388 : vector<8x128xi32> to vector<8x128xf32>
    %c0_145 = arith.constant 0 : index
    %c13 = arith.constant 13 : index
    %c0_146 = arith.constant 0 : index
    %c0_147 = arith.constant 0 : index
    %390 = vector.load %arg2[%c0_145, %c13, %c0_146, %c0_147] : memref<1x14x8x128xf32, #tpu.memory_space<vmem>>, vector<1x1x8x128xf32>
    %391 = vector.shape_cast %390 : vector<1x1x8x128xf32> to vector<8x128xf32>
    %c0_148 = arith.constant 0 : index
    %c13_149 = arith.constant 13 : index
    %c0_150 = arith.constant 0 : index
    %c0_151 = arith.constant 0 : index
    %392 = vector.load %arg3[%c0_148, %c13_149, %c0_150, %c0_151] : memref<1x14x8x128xf32, #tpu.memory_space<vmem>>, vector<1x1x8x128xf32>
    %393 = vector.shape_cast %392 : vector<1x1x8x128xf32> to vector<8x128xf32>
    %394 = arith.mulf %391, %389 : vector<8x128xf32>
    %395 = vector.shape_cast %394 : vector<8x128xf32> to vector<1x8x128xf32>
    %cst_152 = arith.constant dense<0.000000e+00> : vector<1xf32>
    %396 = vector.multi_reduction <add>, %395, %cst_152 [1, 2] : vector<1x8x128xf32> to vector<1xf32>
    %397 = vector.shape_cast %396 : vector<1xf32> to vector<1x1x1xf32>
    %398 = vector.extract %397[0, 0, 0] : f32 from vector<1x1x1xf32>
    %399 = arith.mulf %391, %391 : vector<8x128xf32>
    %400 = vector.shape_cast %399 : vector<8x128xf32> to vector<1x8x128xf32>
    %cst_153 = arith.constant dense<0.000000e+00> : vector<1xf32>
    %401 = vector.multi_reduction <add>, %400, %cst_153 [1, 2] : vector<1x8x128xf32> to vector<1xf32>
    %402 = vector.shape_cast %401 : vector<1xf32> to vector<1x1x1xf32>
    %403 = vector.extract %402[0, 0, 0] : f32 from vector<1x1x1xf32>
    %404 = arith.mulf %393, %389 : vector<8x128xf32>
    %405 = vector.shape_cast %404 : vector<8x128xf32> to vector<1x8x128xf32>
    %cst_154 = arith.constant dense<0.000000e+00> : vector<1xf32>
    %406 = vector.multi_reduction <add>, %405, %cst_154 [1, 2] : vector<1x8x128xf32> to vector<1xf32>
    %407 = vector.shape_cast %406 : vector<1xf32> to vector<1x1x1xf32>
    %408 = vector.extract %407[0, 0, 0] : f32 from vector<1x1x1xf32>
    %409 = arith.mulf %393, %393 : vector<8x128xf32>
    %410 = vector.shape_cast %409 : vector<8x128xf32> to vector<1x8x128xf32>
    %cst_155 = arith.constant dense<0.000000e+00> : vector<1xf32>
    %411 = vector.multi_reduction <add>, %410, %cst_155 [1, 2] : vector<1x8x128xf32> to vector<1xf32>
    %412 = vector.shape_cast %411 : vector<1xf32> to vector<1x1x1xf32>
    %413 = vector.extract %412[0, 0, 0] : f32 from vector<1x1x1xf32>
    %414 = vector.shape_cast %389 : vector<8x128xf32> to vector<1x8x128xf32>
    %cst_156 = arith.constant dense<0.000000e+00> : vector<1xf32>
    %415 = vector.multi_reduction <add>, %414, %cst_156 [1, 2] : vector<1x8x128xf32> to vector<1xf32>
    %416 = vector.shape_cast %415 : vector<1xf32> to vector<1x1x1xf32>
    %417 = vector.extract %416[0, 0, 0] : f32 from vector<1x1x1xf32>
    %418 = tpu.iota {dimensions = array<i32: 0>} : vector<8x128xi32>
    %419 = tpu.iota {dimensions = array<i32: 1>} : vector<8x128xi32>
    %cst_157 = arith.constant 0.000000e+00 : f32
    %420 = vector.broadcast %cst_157 : f32 to vector<8x128xf32>
    %c0_i32 = arith.constant 0 : i32
    %421 = vector.broadcast %c0_i32 : i32 to vector<8x128xi32>
    %422 = arith.cmpi eq, %418, %421 : vector<8x128xi32>
    %c0_i32_158 = arith.constant 0 : i32
    %423 = vector.broadcast %c0_i32_158 : i32 to vector<8x128xi32>
    %424 = arith.cmpi eq, %419, %423 : vector<8x128xi32>
    %425 = arith.andi %422, %424 : vector<8x128xi1>
    %cst_159 = arith.constant 0.000000e+00 : f32
    %426 = vector.broadcast %14 : f32 to vector<8x128xf32>
    %427 = vector.broadcast %cst_159 : f32 to vector<8x128xf32>
    %428 = arith.select %425, %426, %427 : vector<8x128xi1>, vector<8x128xf32>
    %429 = arith.addf %420, %428 : vector<8x128xf32>
    %c0_i32_160 = arith.constant 0 : i32
    %430 = vector.broadcast %c0_i32_160 : i32 to vector<8x128xi32>
    %431 = arith.cmpi eq, %418, %430 : vector<8x128xi32>
    %c1_i32_161 = arith.constant 1 : i32
    %432 = vector.broadcast %c1_i32_161 : i32 to vector<8x128xi32>
    %433 = arith.cmpi eq, %419, %432 : vector<8x128xi32>
    %434 = arith.andi %431, %433 : vector<8x128xi1>
    %cst_162 = arith.constant 0.000000e+00 : f32
    %435 = vector.broadcast %46 : f32 to vector<8x128xf32>
    %436 = vector.broadcast %cst_162 : f32 to vector<8x128xf32>
    %437 = arith.select %434, %435, %436 : vector<8x128xi1>, vector<8x128xf32>
    %438 = arith.addf %429, %437 : vector<8x128xf32>
    %c0_i32_163 = arith.constant 0 : i32
    %439 = vector.broadcast %c0_i32_163 : i32 to vector<8x128xi32>
    %440 = arith.cmpi eq, %418, %439 : vector<8x128xi32>
    %c2_i32_164 = arith.constant 2 : i32
    %441 = vector.broadcast %c2_i32_164 : i32 to vector<8x128xi32>
    %442 = arith.cmpi eq, %419, %441 : vector<8x128xi32>
    %443 = arith.andi %440, %442 : vector<8x128xi1>
    %cst_165 = arith.constant 0.000000e+00 : f32
    %444 = vector.broadcast %78 : f32 to vector<8x128xf32>
    %445 = vector.broadcast %cst_165 : f32 to vector<8x128xf32>
    %446 = arith.select %443, %444, %445 : vector<8x128xi1>, vector<8x128xf32>
    %447 = arith.addf %438, %446 : vector<8x128xf32>
    %c0_i32_166 = arith.constant 0 : i32
    %448 = vector.broadcast %c0_i32_166 : i32 to vector<8x128xi32>
    %449 = arith.cmpi eq, %418, %448 : vector<8x128xi32>
    %c3_i32_167 = arith.constant 3 : i32
    %450 = vector.broadcast %c3_i32_167 : i32 to vector<8x128xi32>
    %451 = arith.cmpi eq, %419, %450 : vector<8x128xi32>
    %452 = arith.andi %449, %451 : vector<8x128xi1>
    %cst_168 = arith.constant 0.000000e+00 : f32
    %453 = vector.broadcast %110 : f32 to vector<8x128xf32>
    %454 = vector.broadcast %cst_168 : f32 to vector<8x128xf32>
    %455 = arith.select %452, %453, %454 : vector<8x128xi1>, vector<8x128xf32>
    %456 = arith.addf %447, %455 : vector<8x128xf32>
    %c0_i32_169 = arith.constant 0 : i32
    %457 = vector.broadcast %c0_i32_169 : i32 to vector<8x128xi32>
    %458 = arith.cmpi eq, %418, %457 : vector<8x128xi32>
    %c4_i32_170 = arith.constant 4 : i32
    %459 = vector.broadcast %c4_i32_170 : i32 to vector<8x128xi32>
    %460 = arith.cmpi eq, %419, %459 : vector<8x128xi32>
    %461 = arith.andi %458, %460 : vector<8x128xi1>
    %cst_171 = arith.constant 0.000000e+00 : f32
    %462 = vector.broadcast %142 : f32 to vector<8x128xf32>
    %463 = vector.broadcast %cst_171 : f32 to vector<8x128xf32>
    %464 = arith.select %461, %462, %463 : vector<8x128xi1>, vector<8x128xf32>
    %465 = arith.addf %456, %464 : vector<8x128xf32>
    %c0_i32_172 = arith.constant 0 : i32
    %466 = vector.broadcast %c0_i32_172 : i32 to vector<8x128xi32>
    %467 = arith.cmpi eq, %418, %466 : vector<8x128xi32>
    %c5_i32_173 = arith.constant 5 : i32
    %468 = vector.broadcast %c5_i32_173 : i32 to vector<8x128xi32>
    %469 = arith.cmpi eq, %419, %468 : vector<8x128xi32>
    %470 = arith.andi %467, %469 : vector<8x128xi1>
    %cst_174 = arith.constant 0.000000e+00 : f32
    %471 = vector.broadcast %174 : f32 to vector<8x128xf32>
    %472 = vector.broadcast %cst_174 : f32 to vector<8x128xf32>
    %473 = arith.select %470, %471, %472 : vector<8x128xi1>, vector<8x128xf32>
    %474 = arith.addf %465, %473 : vector<8x128xf32>
    %c0_i32_175 = arith.constant 0 : i32
    %475 = vector.broadcast %c0_i32_175 : i32 to vector<8x128xi32>
    %476 = arith.cmpi eq, %418, %475 : vector<8x128xi32>
    %c6_i32_176 = arith.constant 6 : i32
    %477 = vector.broadcast %c6_i32_176 : i32 to vector<8x128xi32>
    %478 = arith.cmpi eq, %419, %477 : vector<8x128xi32>
    %479 = arith.andi %476, %478 : vector<8x128xi1>
    %cst_177 = arith.constant 0.000000e+00 : f32
    %480 = vector.broadcast %206 : f32 to vector<8x128xf32>
    %481 = vector.broadcast %cst_177 : f32 to vector<8x128xf32>
    %482 = arith.select %479, %480, %481 : vector<8x128xi1>, vector<8x128xf32>
    %483 = arith.addf %474, %482 : vector<8x128xf32>
    %c0_i32_178 = arith.constant 0 : i32
    %484 = vector.broadcast %c0_i32_178 : i32 to vector<8x128xi32>
    %485 = arith.cmpi eq, %418, %484 : vector<8x128xi32>
    %c7_i32_179 = arith.constant 7 : i32
    %486 = vector.broadcast %c7_i32_179 : i32 to vector<8x128xi32>
    %487 = arith.cmpi eq, %419, %486 : vector<8x128xi32>
    %488 = arith.andi %485, %487 : vector<8x128xi1>
    %cst_180 = arith.constant 0.000000e+00 : f32
    %489 = vector.broadcast %238 : f32 to vector<8x128xf32>
    %490 = vector.broadcast %cst_180 : f32 to vector<8x128xf32>
    %491 = arith.select %488, %489, %490 : vector<8x128xi1>, vector<8x128xf32>
    %492 = arith.addf %483, %491 : vector<8x128xf32>
    %c0_i32_181 = arith.constant 0 : i32
    %493 = vector.broadcast %c0_i32_181 : i32 to vector<8x128xi32>
    %494 = arith.cmpi eq, %418, %493 : vector<8x128xi32>
    %c8_i32_182 = arith.constant 8 : i32
    %495 = vector.broadcast %c8_i32_182 : i32 to vector<8x128xi32>
    %496 = arith.cmpi eq, %419, %495 : vector<8x128xi32>
    %497 = arith.andi %494, %496 : vector<8x128xi1>
    %cst_183 = arith.constant 0.000000e+00 : f32
    %498 = vector.broadcast %270 : f32 to vector<8x128xf32>
    %499 = vector.broadcast %cst_183 : f32 to vector<8x128xf32>
    %500 = arith.select %497, %498, %499 : vector<8x128xi1>, vector<8x128xf32>
    %501 = arith.addf %492, %500 : vector<8x128xf32>
    %c0_i32_184 = arith.constant 0 : i32
    %502 = vector.broadcast %c0_i32_184 : i32 to vector<8x128xi32>
    %503 = arith.cmpi eq, %418, %502 : vector<8x128xi32>
    %c9_i32_185 = arith.constant 9 : i32
    %504 = vector.broadcast %c9_i32_185 : i32 to vector<8x128xi32>
    %505 = arith.cmpi eq, %419, %504 : vector<8x128xi32>
    %506 = arith.andi %503, %505 : vector<8x128xi1>
    %cst_186 = arith.constant 0.000000e+00 : f32
    %507 = vector.broadcast %302 : f32 to vector<8x128xf32>
    %508 = vector.broadcast %cst_186 : f32 to vector<8x128xf32>
    %509 = arith.select %506, %507, %508 : vector<8x128xi1>, vector<8x128xf32>
    %510 = arith.addf %501, %509 : vector<8x128xf32>
    %c0_i32_187 = arith.constant 0 : i32
    %511 = vector.broadcast %c0_i32_187 : i32 to vector<8x128xi32>
    %512 = arith.cmpi eq, %418, %511 : vector<8x128xi32>
    %c10_i32_188 = arith.constant 10 : i32
    %513 = vector.broadcast %c10_i32_188 : i32 to vector<8x128xi32>
    %514 = arith.cmpi eq, %419, %513 : vector<8x128xi32>
    %515 = arith.andi %512, %514 : vector<8x128xi1>
    %cst_189 = arith.constant 0.000000e+00 : f32
    %516 = vector.broadcast %334 : f32 to vector<8x128xf32>
    %517 = vector.broadcast %cst_189 : f32 to vector<8x128xf32>
    %518 = arith.select %515, %516, %517 : vector<8x128xi1>, vector<8x128xf32>
    %519 = arith.addf %510, %518 : vector<8x128xf32>
    %c0_i32_190 = arith.constant 0 : i32
    %520 = vector.broadcast %c0_i32_190 : i32 to vector<8x128xi32>
    %521 = arith.cmpi eq, %418, %520 : vector<8x128xi32>
    %c11_i32_191 = arith.constant 11 : i32
    %522 = vector.broadcast %c11_i32_191 : i32 to vector<8x128xi32>
    %523 = arith.cmpi eq, %419, %522 : vector<8x128xi32>
    %524 = arith.andi %521, %523 : vector<8x128xi1>
    %cst_192 = arith.constant 0.000000e+00 : f32
    %525 = vector.broadcast %366 : f32 to vector<8x128xf32>
    %526 = vector.broadcast %cst_192 : f32 to vector<8x128xf32>
    %527 = arith.select %524, %525, %526 : vector<8x128xi1>, vector<8x128xf32>
    %528 = arith.addf %519, %527 : vector<8x128xf32>
    %c0_i32_193 = arith.constant 0 : i32
    %529 = vector.broadcast %c0_i32_193 : i32 to vector<8x128xi32>
    %530 = arith.cmpi eq, %418, %529 : vector<8x128xi32>
    %c12_i32_194 = arith.constant 12 : i32
    %531 = vector.broadcast %c12_i32_194 : i32 to vector<8x128xi32>
    %532 = arith.cmpi eq, %419, %531 : vector<8x128xi32>
    %533 = arith.andi %530, %532 : vector<8x128xi1>
    %cst_195 = arith.constant 0.000000e+00 : f32
    %534 = vector.broadcast %398 : f32 to vector<8x128xf32>
    %535 = vector.broadcast %cst_195 : f32 to vector<8x128xf32>
    %536 = arith.select %533, %534, %535 : vector<8x128xi1>, vector<8x128xf32>
    %537 = arith.addf %528, %536 : vector<8x128xf32>
    %c1_i32_196 = arith.constant 1 : i32
    %538 = vector.broadcast %c1_i32_196 : i32 to vector<8x128xi32>
    %539 = arith.cmpi eq, %418, %538 : vector<8x128xi32>
    %c0_i32_197 = arith.constant 0 : i32
    %540 = vector.broadcast %c0_i32_197 : i32 to vector<8x128xi32>
    %541 = arith.cmpi eq, %419, %540 : vector<8x128xi32>
    %542 = arith.andi %539, %541 : vector<8x128xi1>
    %cst_198 = arith.constant 0.000000e+00 : f32
    %543 = vector.broadcast %19 : f32 to vector<8x128xf32>
    %544 = vector.broadcast %cst_198 : f32 to vector<8x128xf32>
    %545 = arith.select %542, %543, %544 : vector<8x128xi1>, vector<8x128xf32>
    %546 = arith.addf %537, %545 : vector<8x128xf32>
    %c1_i32_199 = arith.constant 1 : i32
    %547 = vector.broadcast %c1_i32_199 : i32 to vector<8x128xi32>
    %548 = arith.cmpi eq, %418, %547 : vector<8x128xi32>
    %c1_i32_200 = arith.constant 1 : i32
    %549 = vector.broadcast %c1_i32_200 : i32 to vector<8x128xi32>
    %550 = arith.cmpi eq, %419, %549 : vector<8x128xi32>
    %551 = arith.andi %548, %550 : vector<8x128xi1>
    %cst_201 = arith.constant 0.000000e+00 : f32
    %552 = vector.broadcast %51 : f32 to vector<8x128xf32>
    %553 = vector.broadcast %cst_201 : f32 to vector<8x128xf32>
    %554 = arith.select %551, %552, %553 : vector<8x128xi1>, vector<8x128xf32>
    %555 = arith.addf %546, %554 : vector<8x128xf32>
    %c1_i32_202 = arith.constant 1 : i32
    %556 = vector.broadcast %c1_i32_202 : i32 to vector<8x128xi32>
    %557 = arith.cmpi eq, %418, %556 : vector<8x128xi32>
    %c2_i32_203 = arith.constant 2 : i32
    %558 = vector.broadcast %c2_i32_203 : i32 to vector<8x128xi32>
    %559 = arith.cmpi eq, %419, %558 : vector<8x128xi32>
    %560 = arith.andi %557, %559 : vector<8x128xi1>
    %cst_204 = arith.constant 0.000000e+00 : f32
    %561 = vector.broadcast %83 : f32 to vector<8x128xf32>
    %562 = vector.broadcast %cst_204 : f32 to vector<8x128xf32>
    %563 = arith.select %560, %561, %562 : vector<8x128xi1>, vector<8x128xf32>
    %564 = arith.addf %555, %563 : vector<8x128xf32>
    %c1_i32_205 = arith.constant 1 : i32
    %565 = vector.broadcast %c1_i32_205 : i32 to vector<8x128xi32>
    %566 = arith.cmpi eq, %418, %565 : vector<8x128xi32>
    %c3_i32_206 = arith.constant 3 : i32
    %567 = vector.broadcast %c3_i32_206 : i32 to vector<8x128xi32>
    %568 = arith.cmpi eq, %419, %567 : vector<8x128xi32>
    %569 = arith.andi %566, %568 : vector<8x128xi1>
    %cst_207 = arith.constant 0.000000e+00 : f32
    %570 = vector.broadcast %115 : f32 to vector<8x128xf32>
    %571 = vector.broadcast %cst_207 : f32 to vector<8x128xf32>
    %572 = arith.select %569, %570, %571 : vector<8x128xi1>, vector<8x128xf32>
    %573 = arith.addf %564, %572 : vector<8x128xf32>
    %c1_i32_208 = arith.constant 1 : i32
    %574 = vector.broadcast %c1_i32_208 : i32 to vector<8x128xi32>
    %575 = arith.cmpi eq, %418, %574 : vector<8x128xi32>
    %c4_i32_209 = arith.constant 4 : i32
    %576 = vector.broadcast %c4_i32_209 : i32 to vector<8x128xi32>
    %577 = arith.cmpi eq, %419, %576 : vector<8x128xi32>
    %578 = arith.andi %575, %577 : vector<8x128xi1>
    %cst_210 = arith.constant 0.000000e+00 : f32
    %579 = vector.broadcast %147 : f32 to vector<8x128xf32>
    %580 = vector.broadcast %cst_210 : f32 to vector<8x128xf32>
    %581 = arith.select %578, %579, %580 : vector<8x128xi1>, vector<8x128xf32>
    %582 = arith.addf %573, %581 : vector<8x128xf32>
    %c1_i32_211 = arith.constant 1 : i32
    %583 = vector.broadcast %c1_i32_211 : i32 to vector<8x128xi32>
    %584 = arith.cmpi eq, %418, %583 : vector<8x128xi32>
    %c5_i32_212 = arith.constant 5 : i32
    %585 = vector.broadcast %c5_i32_212 : i32 to vector<8x128xi32>
    %586 = arith.cmpi eq, %419, %585 : vector<8x128xi32>
    %587 = arith.andi %584, %586 : vector<8x128xi1>
    %cst_213 = arith.constant 0.000000e+00 : f32
    %588 = vector.broadcast %179 : f32 to vector<8x128xf32>
    %589 = vector.broadcast %cst_213 : f32 to vector<8x128xf32>
    %590 = arith.select %587, %588, %589 : vector<8x128xi1>, vector<8x128xf32>
    %591 = arith.addf %582, %590 : vector<8x128xf32>
    %c1_i32_214 = arith.constant 1 : i32
    %592 = vector.broadcast %c1_i32_214 : i32 to vector<8x128xi32>
    %593 = arith.cmpi eq, %418, %592 : vector<8x128xi32>
    %c6_i32_215 = arith.constant 6 : i32
    %594 = vector.broadcast %c6_i32_215 : i32 to vector<8x128xi32>
    %595 = arith.cmpi eq, %419, %594 : vector<8x128xi32>
    %596 = arith.andi %593, %595 : vector<8x128xi1>
    %cst_216 = arith.constant 0.000000e+00 : f32
    %597 = vector.broadcast %211 : f32 to vector<8x128xf32>
    %598 = vector.broadcast %cst_216 : f32 to vector<8x128xf32>
    %599 = arith.select %596, %597, %598 : vector<8x128xi1>, vector<8x128xf32>
    %600 = arith.addf %591, %599 : vector<8x128xf32>
    %c1_i32_217 = arith.constant 1 : i32
    %601 = vector.broadcast %c1_i32_217 : i32 to vector<8x128xi32>
    %602 = arith.cmpi eq, %418, %601 : vector<8x128xi32>
    %c7_i32_218 = arith.constant 7 : i32
    %603 = vector.broadcast %c7_i32_218 : i32 to vector<8x128xi32>
    %604 = arith.cmpi eq, %419, %603 : vector<8x128xi32>
    %605 = arith.andi %602, %604 : vector<8x128xi1>
    %cst_219 = arith.constant 0.000000e+00 : f32
    %606 = vector.broadcast %243 : f32 to vector<8x128xf32>
    %607 = vector.broadcast %cst_219 : f32 to vector<8x128xf32>
    %608 = arith.select %605, %606, %607 : vector<8x128xi1>, vector<8x128xf32>
    %609 = arith.addf %600, %608 : vector<8x128xf32>
    %c1_i32_220 = arith.constant 1 : i32
    %610 = vector.broadcast %c1_i32_220 : i32 to vector<8x128xi32>
    %611 = arith.cmpi eq, %418, %610 : vector<8x128xi32>
    %c8_i32_221 = arith.constant 8 : i32
    %612 = vector.broadcast %c8_i32_221 : i32 to vector<8x128xi32>
    %613 = arith.cmpi eq, %419, %612 : vector<8x128xi32>
    %614 = arith.andi %611, %613 : vector<8x128xi1>
    %cst_222 = arith.constant 0.000000e+00 : f32
    %615 = vector.broadcast %275 : f32 to vector<8x128xf32>
    %616 = vector.broadcast %cst_222 : f32 to vector<8x128xf32>
    %617 = arith.select %614, %615, %616 : vector<8x128xi1>, vector<8x128xf32>
    %618 = arith.addf %609, %617 : vector<8x128xf32>
    %c1_i32_223 = arith.constant 1 : i32
    %619 = vector.broadcast %c1_i32_223 : i32 to vector<8x128xi32>
    %620 = arith.cmpi eq, %418, %619 : vector<8x128xi32>
    %c9_i32_224 = arith.constant 9 : i32
    %621 = vector.broadcast %c9_i32_224 : i32 to vector<8x128xi32>
    %622 = arith.cmpi eq, %419, %621 : vector<8x128xi32>
    %623 = arith.andi %620, %622 : vector<8x128xi1>
    %cst_225 = arith.constant 0.000000e+00 : f32
    %624 = vector.broadcast %307 : f32 to vector<8x128xf32>
    %625 = vector.broadcast %cst_225 : f32 to vector<8x128xf32>
    %626 = arith.select %623, %624, %625 : vector<8x128xi1>, vector<8x128xf32>
    %627 = arith.addf %618, %626 : vector<8x128xf32>
    %c1_i32_226 = arith.constant 1 : i32
    %628 = vector.broadcast %c1_i32_226 : i32 to vector<8x128xi32>
    %629 = arith.cmpi eq, %418, %628 : vector<8x128xi32>
    %c10_i32_227 = arith.constant 10 : i32
    %630 = vector.broadcast %c10_i32_227 : i32 to vector<8x128xi32>
    %631 = arith.cmpi eq, %419, %630 : vector<8x128xi32>
    %632 = arith.andi %629, %631 : vector<8x128xi1>
    %cst_228 = arith.constant 0.000000e+00 : f32
    %633 = vector.broadcast %339 : f32 to vector<8x128xf32>
    %634 = vector.broadcast %cst_228 : f32 to vector<8x128xf32>
    %635 = arith.select %632, %633, %634 : vector<8x128xi1>, vector<8x128xf32>
    %636 = arith.addf %627, %635 : vector<8x128xf32>
    %c1_i32_229 = arith.constant 1 : i32
    %637 = vector.broadcast %c1_i32_229 : i32 to vector<8x128xi32>
    %638 = arith.cmpi eq, %418, %637 : vector<8x128xi32>
    %c11_i32_230 = arith.constant 11 : i32
    %639 = vector.broadcast %c11_i32_230 : i32 to vector<8x128xi32>
    %640 = arith.cmpi eq, %419, %639 : vector<8x128xi32>
    %641 = arith.andi %638, %640 : vector<8x128xi1>
    %cst_231 = arith.constant 0.000000e+00 : f32
    %642 = vector.broadcast %371 : f32 to vector<8x128xf32>
    %643 = vector.broadcast %cst_231 : f32 to vector<8x128xf32>
    %644 = arith.select %641, %642, %643 : vector<8x128xi1>, vector<8x128xf32>
    %645 = arith.addf %636, %644 : vector<8x128xf32>
    %c1_i32_232 = arith.constant 1 : i32
    %646 = vector.broadcast %c1_i32_232 : i32 to vector<8x128xi32>
    %647 = arith.cmpi eq, %418, %646 : vector<8x128xi32>
    %c12_i32_233 = arith.constant 12 : i32
    %648 = vector.broadcast %c12_i32_233 : i32 to vector<8x128xi32>
    %649 = arith.cmpi eq, %419, %648 : vector<8x128xi32>
    %650 = arith.andi %647, %649 : vector<8x128xi1>
    %cst_234 = arith.constant 0.000000e+00 : f32
    %651 = vector.broadcast %403 : f32 to vector<8x128xf32>
    %652 = vector.broadcast %cst_234 : f32 to vector<8x128xf32>
    %653 = arith.select %650, %651, %652 : vector<8x128xi1>, vector<8x128xf32>
    %654 = arith.addf %645, %653 : vector<8x128xf32>
    %c2_i32_235 = arith.constant 2 : i32
    %655 = vector.broadcast %c2_i32_235 : i32 to vector<8x128xi32>
    %656 = arith.cmpi eq, %418, %655 : vector<8x128xi32>
    %c0_i32_236 = arith.constant 0 : i32
    %657 = vector.broadcast %c0_i32_236 : i32 to vector<8x128xi32>
    %658 = arith.cmpi eq, %419, %657 : vector<8x128xi32>
    %659 = arith.andi %656, %658 : vector<8x128xi1>
    %cst_237 = arith.constant 0.000000e+00 : f32
    %660 = vector.broadcast %24 : f32 to vector<8x128xf32>
    %661 = vector.broadcast %cst_237 : f32 to vector<8x128xf32>
    %662 = arith.select %659, %660, %661 : vector<8x128xi1>, vector<8x128xf32>
    %663 = arith.addf %654, %662 : vector<8x128xf32>
    %c2_i32_238 = arith.constant 2 : i32
    %664 = vector.broadcast %c2_i32_238 : i32 to vector<8x128xi32>
    %665 = arith.cmpi eq, %418, %664 : vector<8x128xi32>
    %c1_i32_239 = arith.constant 1 : i32
    %666 = vector.broadcast %c1_i32_239 : i32 to vector<8x128xi32>
    %667 = arith.cmpi eq, %419, %666 : vector<8x128xi32>
    %668 = arith.andi %665, %667 : vector<8x128xi1>
    %cst_240 = arith.constant 0.000000e+00 : f32
    %669 = vector.broadcast %56 : f32 to vector<8x128xf32>
    %670 = vector.broadcast %cst_240 : f32 to vector<8x128xf32>
    %671 = arith.select %668, %669, %670 : vector<8x128xi1>, vector<8x128xf32>
    %672 = arith.addf %663, %671 : vector<8x128xf32>
    %c2_i32_241 = arith.constant 2 : i32
    %673 = vector.broadcast %c2_i32_241 : i32 to vector<8x128xi32>
    %674 = arith.cmpi eq, %418, %673 : vector<8x128xi32>
    %c2_i32_242 = arith.constant 2 : i32
    %675 = vector.broadcast %c2_i32_242 : i32 to vector<8x128xi32>
    %676 = arith.cmpi eq, %419, %675 : vector<8x128xi32>
    %677 = arith.andi %674, %676 : vector<8x128xi1>
    %cst_243 = arith.constant 0.000000e+00 : f32
    %678 = vector.broadcast %88 : f32 to vector<8x128xf32>
    %679 = vector.broadcast %cst_243 : f32 to vector<8x128xf32>
    %680 = arith.select %677, %678, %679 : vector<8x128xi1>, vector<8x128xf32>
    %681 = arith.addf %672, %680 : vector<8x128xf32>
    %c2_i32_244 = arith.constant 2 : i32
    %682 = vector.broadcast %c2_i32_244 : i32 to vector<8x128xi32>
    %683 = arith.cmpi eq, %418, %682 : vector<8x128xi32>
    %c3_i32_245 = arith.constant 3 : i32
    %684 = vector.broadcast %c3_i32_245 : i32 to vector<8x128xi32>
    %685 = arith.cmpi eq, %419, %684 : vector<8x128xi32>
    %686 = arith.andi %683, %685 : vector<8x128xi1>
    %cst_246 = arith.constant 0.000000e+00 : f32
    %687 = vector.broadcast %120 : f32 to vector<8x128xf32>
    %688 = vector.broadcast %cst_246 : f32 to vector<8x128xf32>
    %689 = arith.select %686, %687, %688 : vector<8x128xi1>, vector<8x128xf32>
    %690 = arith.addf %681, %689 : vector<8x128xf32>
    %c2_i32_247 = arith.constant 2 : i32
    %691 = vector.broadcast %c2_i32_247 : i32 to vector<8x128xi32>
    %692 = arith.cmpi eq, %418, %691 : vector<8x128xi32>
    %c4_i32_248 = arith.constant 4 : i32
    %693 = vector.broadcast %c4_i32_248 : i32 to vector<8x128xi32>
    %694 = arith.cmpi eq, %419, %693 : vector<8x128xi32>
    %695 = arith.andi %692, %694 : vector<8x128xi1>
    %cst_249 = arith.constant 0.000000e+00 : f32
    %696 = vector.broadcast %152 : f32 to vector<8x128xf32>
    %697 = vector.broadcast %cst_249 : f32 to vector<8x128xf32>
    %698 = arith.select %695, %696, %697 : vector<8x128xi1>, vector<8x128xf32>
    %699 = arith.addf %690, %698 : vector<8x128xf32>
    %c2_i32_250 = arith.constant 2 : i32
    %700 = vector.broadcast %c2_i32_250 : i32 to vector<8x128xi32>
    %701 = arith.cmpi eq, %418, %700 : vector<8x128xi32>
    %c5_i32_251 = arith.constant 5 : i32
    %702 = vector.broadcast %c5_i32_251 : i32 to vector<8x128xi32>
    %703 = arith.cmpi eq, %419, %702 : vector<8x128xi32>
    %704 = arith.andi %701, %703 : vector<8x128xi1>
    %cst_252 = arith.constant 0.000000e+00 : f32
    %705 = vector.broadcast %184 : f32 to vector<8x128xf32>
    %706 = vector.broadcast %cst_252 : f32 to vector<8x128xf32>
    %707 = arith.select %704, %705, %706 : vector<8x128xi1>, vector<8x128xf32>
    %708 = arith.addf %699, %707 : vector<8x128xf32>
    %c2_i32_253 = arith.constant 2 : i32
    %709 = vector.broadcast %c2_i32_253 : i32 to vector<8x128xi32>
    %710 = arith.cmpi eq, %418, %709 : vector<8x128xi32>
    %c6_i32_254 = arith.constant 6 : i32
    %711 = vector.broadcast %c6_i32_254 : i32 to vector<8x128xi32>
    %712 = arith.cmpi eq, %419, %711 : vector<8x128xi32>
    %713 = arith.andi %710, %712 : vector<8x128xi1>
    %cst_255 = arith.constant 0.000000e+00 : f32
    %714 = vector.broadcast %216 : f32 to vector<8x128xf32>
    %715 = vector.broadcast %cst_255 : f32 to vector<8x128xf32>
    %716 = arith.select %713, %714, %715 : vector<8x128xi1>, vector<8x128xf32>
    %717 = arith.addf %708, %716 : vector<8x128xf32>
    %c2_i32_256 = arith.constant 2 : i32
    %718 = vector.broadcast %c2_i32_256 : i32 to vector<8x128xi32>
    %719 = arith.cmpi eq, %418, %718 : vector<8x128xi32>
    %c7_i32_257 = arith.constant 7 : i32
    %720 = vector.broadcast %c7_i32_257 : i32 to vector<8x128xi32>
    %721 = arith.cmpi eq, %419, %720 : vector<8x128xi32>
    %722 = arith.andi %719, %721 : vector<8x128xi1>
    %cst_258 = arith.constant 0.000000e+00 : f32
    %723 = vector.broadcast %248 : f32 to vector<8x128xf32>
    %724 = vector.broadcast %cst_258 : f32 to vector<8x128xf32>
    %725 = arith.select %722, %723, %724 : vector<8x128xi1>, vector<8x128xf32>
    %726 = arith.addf %717, %725 : vector<8x128xf32>
    %c2_i32_259 = arith.constant 2 : i32
    %727 = vector.broadcast %c2_i32_259 : i32 to vector<8x128xi32>
    %728 = arith.cmpi eq, %418, %727 : vector<8x128xi32>
    %c8_i32_260 = arith.constant 8 : i32
    %729 = vector.broadcast %c8_i32_260 : i32 to vector<8x128xi32>
    %730 = arith.cmpi eq, %419, %729 : vector<8x128xi32>
    %731 = arith.andi %728, %730 : vector<8x128xi1>
    %cst_261 = arith.constant 0.000000e+00 : f32
    %732 = vector.broadcast %280 : f32 to vector<8x128xf32>
    %733 = vector.broadcast %cst_261 : f32 to vector<8x128xf32>
    %734 = arith.select %731, %732, %733 : vector<8x128xi1>, vector<8x128xf32>
    %735 = arith.addf %726, %734 : vector<8x128xf32>
    %c2_i32_262 = arith.constant 2 : i32
    %736 = vector.broadcast %c2_i32_262 : i32 to vector<8x128xi32>
    %737 = arith.cmpi eq, %418, %736 : vector<8x128xi32>
    %c9_i32_263 = arith.constant 9 : i32
    %738 = vector.broadcast %c9_i32_263 : i32 to vector<8x128xi32>
    %739 = arith.cmpi eq, %419, %738 : vector<8x128xi32>
    %740 = arith.andi %737, %739 : vector<8x128xi1>
    %cst_264 = arith.constant 0.000000e+00 : f32
    %741 = vector.broadcast %312 : f32 to vector<8x128xf32>
    %742 = vector.broadcast %cst_264 : f32 to vector<8x128xf32>
    %743 = arith.select %740, %741, %742 : vector<8x128xi1>, vector<8x128xf32>
    %744 = arith.addf %735, %743 : vector<8x128xf32>
    %c2_i32_265 = arith.constant 2 : i32
    %745 = vector.broadcast %c2_i32_265 : i32 to vector<8x128xi32>
    %746 = arith.cmpi eq, %418, %745 : vector<8x128xi32>
    %c10_i32_266 = arith.constant 10 : i32
    %747 = vector.broadcast %c10_i32_266 : i32 to vector<8x128xi32>
    %748 = arith.cmpi eq, %419, %747 : vector<8x128xi32>
    %749 = arith.andi %746, %748 : vector<8x128xi1>
    %cst_267 = arith.constant 0.000000e+00 : f32
    %750 = vector.broadcast %344 : f32 to vector<8x128xf32>
    %751 = vector.broadcast %cst_267 : f32 to vector<8x128xf32>
    %752 = arith.select %749, %750, %751 : vector<8x128xi1>, vector<8x128xf32>
    %753 = arith.addf %744, %752 : vector<8x128xf32>
    %c2_i32_268 = arith.constant 2 : i32
    %754 = vector.broadcast %c2_i32_268 : i32 to vector<8x128xi32>
    %755 = arith.cmpi eq, %418, %754 : vector<8x128xi32>
    %c11_i32_269 = arith.constant 11 : i32
    %756 = vector.broadcast %c11_i32_269 : i32 to vector<8x128xi32>
    %757 = arith.cmpi eq, %419, %756 : vector<8x128xi32>
    %758 = arith.andi %755, %757 : vector<8x128xi1>
    %cst_270 = arith.constant 0.000000e+00 : f32
    %759 = vector.broadcast %376 : f32 to vector<8x128xf32>
    %760 = vector.broadcast %cst_270 : f32 to vector<8x128xf32>
    %761 = arith.select %758, %759, %760 : vector<8x128xi1>, vector<8x128xf32>
    %762 = arith.addf %753, %761 : vector<8x128xf32>
    %c2_i32_271 = arith.constant 2 : i32
    %763 = vector.broadcast %c2_i32_271 : i32 to vector<8x128xi32>
    %764 = arith.cmpi eq, %418, %763 : vector<8x128xi32>
    %c12_i32_272 = arith.constant 12 : i32
    %765 = vector.broadcast %c12_i32_272 : i32 to vector<8x128xi32>
    %766 = arith.cmpi eq, %419, %765 : vector<8x128xi32>
    %767 = arith.andi %764, %766 : vector<8x128xi1>
    %cst_273 = arith.constant 0.000000e+00 : f32
    %768 = vector.broadcast %408 : f32 to vector<8x128xf32>
    %769 = vector.broadcast %cst_273 : f32 to vector<8x128xf32>
    %770 = arith.select %767, %768, %769 : vector<8x128xi1>, vector<8x128xf32>
    %771 = arith.addf %762, %770 : vector<8x128xf32>
    %c3_i32_274 = arith.constant 3 : i32
    %772 = vector.broadcast %c3_i32_274 : i32 to vector<8x128xi32>
    %773 = arith.cmpi eq, %418, %772 : vector<8x128xi32>
    %c0_i32_275 = arith.constant 0 : i32
    %774 = vector.broadcast %c0_i32_275 : i32 to vector<8x128xi32>
    %775 = arith.cmpi eq, %419, %774 : vector<8x128xi32>
    %776 = arith.andi %773, %775 : vector<8x128xi1>
    %cst_276 = arith.constant 0.000000e+00 : f32
    %777 = vector.broadcast %29 : f32 to vector<8x128xf32>
    %778 = vector.broadcast %cst_276 : f32 to vector<8x128xf32>
    %779 = arith.select %776, %777, %778 : vector<8x128xi1>, vector<8x128xf32>
    %780 = arith.addf %771, %779 : vector<8x128xf32>
    %c3_i32_277 = arith.constant 3 : i32
    %781 = vector.broadcast %c3_i32_277 : i32 to vector<8x128xi32>
    %782 = arith.cmpi eq, %418, %781 : vector<8x128xi32>
    %c1_i32_278 = arith.constant 1 : i32
    %783 = vector.broadcast %c1_i32_278 : i32 to vector<8x128xi32>
    %784 = arith.cmpi eq, %419, %783 : vector<8x128xi32>
    %785 = arith.andi %782, %784 : vector<8x128xi1>
    %cst_279 = arith.constant 0.000000e+00 : f32
    %786 = vector.broadcast %61 : f32 to vector<8x128xf32>
    %787 = vector.broadcast %cst_279 : f32 to vector<8x128xf32>
    %788 = arith.select %785, %786, %787 : vector<8x128xi1>, vector<8x128xf32>
    %789 = arith.addf %780, %788 : vector<8x128xf32>
    %c3_i32_280 = arith.constant 3 : i32
    %790 = vector.broadcast %c3_i32_280 : i32 to vector<8x128xi32>
    %791 = arith.cmpi eq, %418, %790 : vector<8x128xi32>
    %c2_i32_281 = arith.constant 2 : i32
    %792 = vector.broadcast %c2_i32_281 : i32 to vector<8x128xi32>
    %793 = arith.cmpi eq, %419, %792 : vector<8x128xi32>
    %794 = arith.andi %791, %793 : vector<8x128xi1>
    %cst_282 = arith.constant 0.000000e+00 : f32
    %795 = vector.broadcast %93 : f32 to vector<8x128xf32>
    %796 = vector.broadcast %cst_282 : f32 to vector<8x128xf32>
    %797 = arith.select %794, %795, %796 : vector<8x128xi1>, vector<8x128xf32>
    %798 = arith.addf %789, %797 : vector<8x128xf32>
    %c3_i32_283 = arith.constant 3 : i32
    %799 = vector.broadcast %c3_i32_283 : i32 to vector<8x128xi32>
    %800 = arith.cmpi eq, %418, %799 : vector<8x128xi32>
    %c3_i32_284 = arith.constant 3 : i32
    %801 = vector.broadcast %c3_i32_284 : i32 to vector<8x128xi32>
    %802 = arith.cmpi eq, %419, %801 : vector<8x128xi32>
    %803 = arith.andi %800, %802 : vector<8x128xi1>
    %cst_285 = arith.constant 0.000000e+00 : f32
    %804 = vector.broadcast %125 : f32 to vector<8x128xf32>
    %805 = vector.broadcast %cst_285 : f32 to vector<8x128xf32>
    %806 = arith.select %803, %804, %805 : vector<8x128xi1>, vector<8x128xf32>
    %807 = arith.addf %798, %806 : vector<8x128xf32>
    %c3_i32_286 = arith.constant 3 : i32
    %808 = vector.broadcast %c3_i32_286 : i32 to vector<8x128xi32>
    %809 = arith.cmpi eq, %418, %808 : vector<8x128xi32>
    %c4_i32_287 = arith.constant 4 : i32
    %810 = vector.broadcast %c4_i32_287 : i32 to vector<8x128xi32>
    %811 = arith.cmpi eq, %419, %810 : vector<8x128xi32>
    %812 = arith.andi %809, %811 : vector<8x128xi1>
    %cst_288 = arith.constant 0.000000e+00 : f32
    %813 = vector.broadcast %157 : f32 to vector<8x128xf32>
    %814 = vector.broadcast %cst_288 : f32 to vector<8x128xf32>
    %815 = arith.select %812, %813, %814 : vector<8x128xi1>, vector<8x128xf32>
    %816 = arith.addf %807, %815 : vector<8x128xf32>
    %c3_i32_289 = arith.constant 3 : i32
    %817 = vector.broadcast %c3_i32_289 : i32 to vector<8x128xi32>
    %818 = arith.cmpi eq, %418, %817 : vector<8x128xi32>
    %c5_i32_290 = arith.constant 5 : i32
    %819 = vector.broadcast %c5_i32_290 : i32 to vector<8x128xi32>
    %820 = arith.cmpi eq, %419, %819 : vector<8x128xi32>
    %821 = arith.andi %818, %820 : vector<8x128xi1>
    %cst_291 = arith.constant 0.000000e+00 : f32
    %822 = vector.broadcast %189 : f32 to vector<8x128xf32>
    %823 = vector.broadcast %cst_291 : f32 to vector<8x128xf32>
    %824 = arith.select %821, %822, %823 : vector<8x128xi1>, vector<8x128xf32>
    %825 = arith.addf %816, %824 : vector<8x128xf32>
    %c3_i32_292 = arith.constant 3 : i32
    %826 = vector.broadcast %c3_i32_292 : i32 to vector<8x128xi32>
    %827 = arith.cmpi eq, %418, %826 : vector<8x128xi32>
    %c6_i32_293 = arith.constant 6 : i32
    %828 = vector.broadcast %c6_i32_293 : i32 to vector<8x128xi32>
    %829 = arith.cmpi eq, %419, %828 : vector<8x128xi32>
    %830 = arith.andi %827, %829 : vector<8x128xi1>
    %cst_294 = arith.constant 0.000000e+00 : f32
    %831 = vector.broadcast %221 : f32 to vector<8x128xf32>
    %832 = vector.broadcast %cst_294 : f32 to vector<8x128xf32>
    %833 = arith.select %830, %831, %832 : vector<8x128xi1>, vector<8x128xf32>
    %834 = arith.addf %825, %833 : vector<8x128xf32>
    %c3_i32_295 = arith.constant 3 : i32
    %835 = vector.broadcast %c3_i32_295 : i32 to vector<8x128xi32>
    %836 = arith.cmpi eq, %418, %835 : vector<8x128xi32>
    %c7_i32_296 = arith.constant 7 : i32
    %837 = vector.broadcast %c7_i32_296 : i32 to vector<8x128xi32>
    %838 = arith.cmpi eq, %419, %837 : vector<8x128xi32>
    %839 = arith.andi %836, %838 : vector<8x128xi1>
    %cst_297 = arith.constant 0.000000e+00 : f32
    %840 = vector.broadcast %253 : f32 to vector<8x128xf32>
    %841 = vector.broadcast %cst_297 : f32 to vector<8x128xf32>
    %842 = arith.select %839, %840, %841 : vector<8x128xi1>, vector<8x128xf32>
    %843 = arith.addf %834, %842 : vector<8x128xf32>
    %c3_i32_298 = arith.constant 3 : i32
    %844 = vector.broadcast %c3_i32_298 : i32 to vector<8x128xi32>
    %845 = arith.cmpi eq, %418, %844 : vector<8x128xi32>
    %c8_i32_299 = arith.constant 8 : i32
    %846 = vector.broadcast %c8_i32_299 : i32 to vector<8x128xi32>
    %847 = arith.cmpi eq, %419, %846 : vector<8x128xi32>
    %848 = arith.andi %845, %847 : vector<8x128xi1>
    %cst_300 = arith.constant 0.000000e+00 : f32
    %849 = vector.broadcast %285 : f32 to vector<8x128xf32>
    %850 = vector.broadcast %cst_300 : f32 to vector<8x128xf32>
    %851 = arith.select %848, %849, %850 : vector<8x128xi1>, vector<8x128xf32>
    %852 = arith.addf %843, %851 : vector<8x128xf32>
    %c3_i32_301 = arith.constant 3 : i32
    %853 = vector.broadcast %c3_i32_301 : i32 to vector<8x128xi32>
    %854 = arith.cmpi eq, %418, %853 : vector<8x128xi32>
    %c9_i32_302 = arith.constant 9 : i32
    %855 = vector.broadcast %c9_i32_302 : i32 to vector<8x128xi32>
    %856 = arith.cmpi eq, %419, %855 : vector<8x128xi32>
    %857 = arith.andi %854, %856 : vector<8x128xi1>
    %cst_303 = arith.constant 0.000000e+00 : f32
    %858 = vector.broadcast %317 : f32 to vector<8x128xf32>
    %859 = vector.broadcast %cst_303 : f32 to vector<8x128xf32>
    %860 = arith.select %857, %858, %859 : vector<8x128xi1>, vector<8x128xf32>
    %861 = arith.addf %852, %860 : vector<8x128xf32>
    %c3_i32_304 = arith.constant 3 : i32
    %862 = vector.broadcast %c3_i32_304 : i32 to vector<8x128xi32>
    %863 = arith.cmpi eq, %418, %862 : vector<8x128xi32>
    %c10_i32_305 = arith.constant 10 : i32
    %864 = vector.broadcast %c10_i32_305 : i32 to vector<8x128xi32>
    %865 = arith.cmpi eq, %419, %864 : vector<8x128xi32>
    %866 = arith.andi %863, %865 : vector<8x128xi1>
    %cst_306 = arith.constant 0.000000e+00 : f32
    %867 = vector.broadcast %349 : f32 to vector<8x128xf32>
    %868 = vector.broadcast %cst_306 : f32 to vector<8x128xf32>
    %869 = arith.select %866, %867, %868 : vector<8x128xi1>, vector<8x128xf32>
    %870 = arith.addf %861, %869 : vector<8x128xf32>
    %c3_i32_307 = arith.constant 3 : i32
    %871 = vector.broadcast %c3_i32_307 : i32 to vector<8x128xi32>
    %872 = arith.cmpi eq, %418, %871 : vector<8x128xi32>
    %c11_i32_308 = arith.constant 11 : i32
    %873 = vector.broadcast %c11_i32_308 : i32 to vector<8x128xi32>
    %874 = arith.cmpi eq, %419, %873 : vector<8x128xi32>
    %875 = arith.andi %872, %874 : vector<8x128xi1>
    %cst_309 = arith.constant 0.000000e+00 : f32
    %876 = vector.broadcast %381 : f32 to vector<8x128xf32>
    %877 = vector.broadcast %cst_309 : f32 to vector<8x128xf32>
    %878 = arith.select %875, %876, %877 : vector<8x128xi1>, vector<8x128xf32>
    %879 = arith.addf %870, %878 : vector<8x128xf32>
    %c3_i32_310 = arith.constant 3 : i32
    %880 = vector.broadcast %c3_i32_310 : i32 to vector<8x128xi32>
    %881 = arith.cmpi eq, %418, %880 : vector<8x128xi32>
    %c12_i32_311 = arith.constant 12 : i32
    %882 = vector.broadcast %c12_i32_311 : i32 to vector<8x128xi32>
    %883 = arith.cmpi eq, %419, %882 : vector<8x128xi32>
    %884 = arith.andi %881, %883 : vector<8x128xi1>
    %cst_312 = arith.constant 0.000000e+00 : f32
    %885 = vector.broadcast %413 : f32 to vector<8x128xf32>
    %886 = vector.broadcast %cst_312 : f32 to vector<8x128xf32>
    %887 = arith.select %884, %885, %886 : vector<8x128xi1>, vector<8x128xf32>
    %888 = arith.addf %879, %887 : vector<8x128xf32>
    %c4_i32_313 = arith.constant 4 : i32
    %889 = vector.broadcast %c4_i32_313 : i32 to vector<8x128xi32>
    %890 = arith.cmpi eq, %418, %889 : vector<8x128xi32>
    %c0_i32_314 = arith.constant 0 : i32
    %891 = vector.broadcast %c0_i32_314 : i32 to vector<8x128xi32>
    %892 = arith.cmpi eq, %419, %891 : vector<8x128xi32>
    %893 = arith.andi %890, %892 : vector<8x128xi1>
    %cst_315 = arith.constant 0.000000e+00 : f32
    %894 = vector.broadcast %33 : f32 to vector<8x128xf32>
    %895 = vector.broadcast %cst_315 : f32 to vector<8x128xf32>
    %896 = arith.select %893, %894, %895 : vector<8x128xi1>, vector<8x128xf32>
    %897 = arith.addf %888, %896 : vector<8x128xf32>
    %c4_i32_316 = arith.constant 4 : i32
    %898 = vector.broadcast %c4_i32_316 : i32 to vector<8x128xi32>
    %899 = arith.cmpi eq, %418, %898 : vector<8x128xi32>
    %c1_i32_317 = arith.constant 1 : i32
    %900 = vector.broadcast %c1_i32_317 : i32 to vector<8x128xi32>
    %901 = arith.cmpi eq, %419, %900 : vector<8x128xi32>
    %902 = arith.andi %899, %901 : vector<8x128xi1>
    %cst_318 = arith.constant 0.000000e+00 : f32
    %903 = vector.broadcast %65 : f32 to vector<8x128xf32>
    %904 = vector.broadcast %cst_318 : f32 to vector<8x128xf32>
    %905 = arith.select %902, %903, %904 : vector<8x128xi1>, vector<8x128xf32>
    %906 = arith.addf %897, %905 : vector<8x128xf32>
    %c4_i32_319 = arith.constant 4 : i32
    %907 = vector.broadcast %c4_i32_319 : i32 to vector<8x128xi32>
    %908 = arith.cmpi eq, %418, %907 : vector<8x128xi32>
    %c2_i32_320 = arith.constant 2 : i32
    %909 = vector.broadcast %c2_i32_320 : i32 to vector<8x128xi32>
    %910 = arith.cmpi eq, %419, %909 : vector<8x128xi32>
    %911 = arith.andi %908, %910 : vector<8x128xi1>
    %cst_321 = arith.constant 0.000000e+00 : f32
    %912 = vector.broadcast %97 : f32 to vector<8x128xf32>
    %913 = vector.broadcast %cst_321 : f32 to vector<8x128xf32>
    %914 = arith.select %911, %912, %913 : vector<8x128xi1>, vector<8x128xf32>
    %915 = arith.addf %906, %914 : vector<8x128xf32>
    %c4_i32_322 = arith.constant 4 : i32
    %916 = vector.broadcast %c4_i32_322 : i32 to vector<8x128xi32>
    %917 = arith.cmpi eq, %418, %916 : vector<8x128xi32>
    %c3_i32_323 = arith.constant 3 : i32
    %918 = vector.broadcast %c3_i32_323 : i32 to vector<8x128xi32>
    %919 = arith.cmpi eq, %419, %918 : vector<8x128xi32>
    %920 = arith.andi %917, %919 : vector<8x128xi1>
    %cst_324 = arith.constant 0.000000e+00 : f32
    %921 = vector.broadcast %129 : f32 to vector<8x128xf32>
    %922 = vector.broadcast %cst_324 : f32 to vector<8x128xf32>
    %923 = arith.select %920, %921, %922 : vector<8x128xi1>, vector<8x128xf32>
    %924 = arith.addf %915, %923 : vector<8x128xf32>
    %c4_i32_325 = arith.constant 4 : i32
    %925 = vector.broadcast %c4_i32_325 : i32 to vector<8x128xi32>
    %926 = arith.cmpi eq, %418, %925 : vector<8x128xi32>
    %c4_i32_326 = arith.constant 4 : i32
    %927 = vector.broadcast %c4_i32_326 : i32 to vector<8x128xi32>
    %928 = arith.cmpi eq, %419, %927 : vector<8x128xi32>
    %929 = arith.andi %926, %928 : vector<8x128xi1>
    %cst_327 = arith.constant 0.000000e+00 : f32
    %930 = vector.broadcast %161 : f32 to vector<8x128xf32>
    %931 = vector.broadcast %cst_327 : f32 to vector<8x128xf32>
    %932 = arith.select %929, %930, %931 : vector<8x128xi1>, vector<8x128xf32>
    %933 = arith.addf %924, %932 : vector<8x128xf32>
    %c4_i32_328 = arith.constant 4 : i32
    %934 = vector.broadcast %c4_i32_328 : i32 to vector<8x128xi32>
    %935 = arith.cmpi eq, %418, %934 : vector<8x128xi32>
    %c5_i32_329 = arith.constant 5 : i32
    %936 = vector.broadcast %c5_i32_329 : i32 to vector<8x128xi32>
    %937 = arith.cmpi eq, %419, %936 : vector<8x128xi32>
    %938 = arith.andi %935, %937 : vector<8x128xi1>
    %cst_330 = arith.constant 0.000000e+00 : f32
    %939 = vector.broadcast %193 : f32 to vector<8x128xf32>
    %940 = vector.broadcast %cst_330 : f32 to vector<8x128xf32>
    %941 = arith.select %938, %939, %940 : vector<8x128xi1>, vector<8x128xf32>
    %942 = arith.addf %933, %941 : vector<8x128xf32>
    %c4_i32_331 = arith.constant 4 : i32
    %943 = vector.broadcast %c4_i32_331 : i32 to vector<8x128xi32>
    %944 = arith.cmpi eq, %418, %943 : vector<8x128xi32>
    %c6_i32_332 = arith.constant 6 : i32
    %945 = vector.broadcast %c6_i32_332 : i32 to vector<8x128xi32>
    %946 = arith.cmpi eq, %419, %945 : vector<8x128xi32>
    %947 = arith.andi %944, %946 : vector<8x128xi1>
    %cst_333 = arith.constant 0.000000e+00 : f32
    %948 = vector.broadcast %225 : f32 to vector<8x128xf32>
    %949 = vector.broadcast %cst_333 : f32 to vector<8x128xf32>
    %950 = arith.select %947, %948, %949 : vector<8x128xi1>, vector<8x128xf32>
    %951 = arith.addf %942, %950 : vector<8x128xf32>
    %c4_i32_334 = arith.constant 4 : i32
    %952 = vector.broadcast %c4_i32_334 : i32 to vector<8x128xi32>
    %953 = arith.cmpi eq, %418, %952 : vector<8x128xi32>
    %c7_i32_335 = arith.constant 7 : i32
    %954 = vector.broadcast %c7_i32_335 : i32 to vector<8x128xi32>
    %955 = arith.cmpi eq, %419, %954 : vector<8x128xi32>
    %956 = arith.andi %953, %955 : vector<8x128xi1>
    %cst_336 = arith.constant 0.000000e+00 : f32
    %957 = vector.broadcast %257 : f32 to vector<8x128xf32>
    %958 = vector.broadcast %cst_336 : f32 to vector<8x128xf32>
    %959 = arith.select %956, %957, %958 : vector<8x128xi1>, vector<8x128xf32>
    %960 = arith.addf %951, %959 : vector<8x128xf32>
    %c4_i32_337 = arith.constant 4 : i32
    %961 = vector.broadcast %c4_i32_337 : i32 to vector<8x128xi32>
    %962 = arith.cmpi eq, %418, %961 : vector<8x128xi32>
    %c8_i32_338 = arith.constant 8 : i32
    %963 = vector.broadcast %c8_i32_338 : i32 to vector<8x128xi32>
    %964 = arith.cmpi eq, %419, %963 : vector<8x128xi32>
    %965 = arith.andi %962, %964 : vector<8x128xi1>
    %cst_339 = arith.constant 0.000000e+00 : f32
    %966 = vector.broadcast %289 : f32 to vector<8x128xf32>
    %967 = vector.broadcast %cst_339 : f32 to vector<8x128xf32>
    %968 = arith.select %965, %966, %967 : vector<8x128xi1>, vector<8x128xf32>
    %969 = arith.addf %960, %968 : vector<8x128xf32>
    %c4_i32_340 = arith.constant 4 : i32
    %970 = vector.broadcast %c4_i32_340 : i32 to vector<8x128xi32>
    %971 = arith.cmpi eq, %418, %970 : vector<8x128xi32>
    %c9_i32_341 = arith.constant 9 : i32
    %972 = vector.broadcast %c9_i32_341 : i32 to vector<8x128xi32>
    %973 = arith.cmpi eq, %419, %972 : vector<8x128xi32>
    %974 = arith.andi %971, %973 : vector<8x128xi1>
    %cst_342 = arith.constant 0.000000e+00 : f32
    %975 = vector.broadcast %321 : f32 to vector<8x128xf32>
    %976 = vector.broadcast %cst_342 : f32 to vector<8x128xf32>
    %977 = arith.select %974, %975, %976 : vector<8x128xi1>, vector<8x128xf32>
    %978 = arith.addf %969, %977 : vector<8x128xf32>
    %c4_i32_343 = arith.constant 4 : i32
    %979 = vector.broadcast %c4_i32_343 : i32 to vector<8x128xi32>
    %980 = arith.cmpi eq, %418, %979 : vector<8x128xi32>
    %c10_i32_344 = arith.constant 10 : i32
    %981 = vector.broadcast %c10_i32_344 : i32 to vector<8x128xi32>
    %982 = arith.cmpi eq, %419, %981 : vector<8x128xi32>
    %983 = arith.andi %980, %982 : vector<8x128xi1>
    %cst_345 = arith.constant 0.000000e+00 : f32
    %984 = vector.broadcast %353 : f32 to vector<8x128xf32>
    %985 = vector.broadcast %cst_345 : f32 to vector<8x128xf32>
    %986 = arith.select %983, %984, %985 : vector<8x128xi1>, vector<8x128xf32>
    %987 = arith.addf %978, %986 : vector<8x128xf32>
    %c4_i32_346 = arith.constant 4 : i32
    %988 = vector.broadcast %c4_i32_346 : i32 to vector<8x128xi32>
    %989 = arith.cmpi eq, %418, %988 : vector<8x128xi32>
    %c11_i32_347 = arith.constant 11 : i32
    %990 = vector.broadcast %c11_i32_347 : i32 to vector<8x128xi32>
    %991 = arith.cmpi eq, %419, %990 : vector<8x128xi32>
    %992 = arith.andi %989, %991 : vector<8x128xi1>
    %cst_348 = arith.constant 0.000000e+00 : f32
    %993 = vector.broadcast %385 : f32 to vector<8x128xf32>
    %994 = vector.broadcast %cst_348 : f32 to vector<8x128xf32>
    %995 = arith.select %992, %993, %994 : vector<8x128xi1>, vector<8x128xf32>
    %996 = arith.addf %987, %995 : vector<8x128xf32>
    %c4_i32_349 = arith.constant 4 : i32
    %997 = vector.broadcast %c4_i32_349 : i32 to vector<8x128xi32>
    %998 = arith.cmpi eq, %418, %997 : vector<8x128xi32>
    %c12_i32_350 = arith.constant 12 : i32
    %999 = vector.broadcast %c12_i32_350 : i32 to vector<8x128xi32>
    %1000 = arith.cmpi eq, %419, %999 : vector<8x128xi32>
    %1001 = arith.andi %998, %1000 : vector<8x128xi1>
    %cst_351 = arith.constant 0.000000e+00 : f32
    %1002 = vector.broadcast %417 : f32 to vector<8x128xf32>
    %1003 = vector.broadcast %cst_351 : f32 to vector<8x128xf32>
    %1004 = arith.select %1001, %1002, %1003 : vector<8x128xi1>, vector<8x128xf32>
    %1005 = arith.addf %996, %1004 : vector<8x128xf32>
    %c0_352 = arith.constant 0 : index
    %c0_353 = arith.constant 0 : index
    %c0_354 = arith.constant 0 : index
    %c0_355 = arith.constant 0 : index
    %1006 = vector.load %arg5[%c0_352, %c0_353, %c0_354, %c0_355] : memref<1x1x8x128xf32, #tpu.memory_space<vmem>>, vector<1x1x8x128xf32>
    %1007 = vector.shape_cast %1006 : vector<1x1x8x128xf32> to vector<8x128xf32>
    %1008 = vector.shape_cast %1005 : vector<8x128xf32> to vector<1x1x8x128xf32>
    tpu.vector_store %arg5[%c0_352, %c0_353, %c0_354, %c0_355], %1008 {strides = array<i32>} : memref<1x1x8x128xf32, #tpu.memory_space<vmem>>, vector<1x1x8x128xf32>,
    return
  }
  func.func @transform_0(%arg0: i32, %arg1: i32) -> (i32, i32, i32, i32) {
    %c0_i32 = arith.constant 0 : i32
    %c0_i32_0 = arith.constant 0 : i32
    %c0_i32_1 = arith.constant 0 : i32
    return %arg0, %c0_i32, %arg1, %c0_i32_0 : i32, i32, i32, i32
  }
  func.func @transform_1(%arg0: i32, %arg1: i32) -> (i32, i32, i32, i32) {
    %c0_i32 = arith.constant 0 : i32
    %c0_i32_0 = arith.constant 0 : i32
    %c0_i32_1 = arith.constant 0 : i32
    return %arg0, %c0_i32, %arg1, %c0_i32_0 : i32, i32, i32, i32
  }
  func.func @transform_2(%arg0: i32, %arg1: i32) -> (i32, i32, i32) {
    %c0_i32 = arith.constant 0 : i32
    %c0_i32_0 = arith.constant 0 : i32
    return %arg0, %arg1, %c0_i32 : i32, i32, i32
  }
  func.func @transform_3(%arg0: i32, %arg1: i32) -> (i32, i32, i32, i32) {
    %c0_i32 = arith.constant 0 : i32
    %c0_i32_0 = arith.constant 0 : i32
    %c0_i32_1 = arith.constant 0 : i32
    return %arg0, %arg1, %c0_i32, %c0_i32_0 : i32, i32, i32, i32
  }
}

</mosaic_0001>

<bundles_post_ra>
// kernel: tpu_custom_call.1
= control target key start
LH: loop header
LB: loop body
LE: loop exit
PB: predicated region body
PF: predicated region fallthrough
CT: control target
= control target key end

     0   :  { %s2863_s0 = inlined_call_operand.hbm [shape: f32[2,14,8,128], index: 0, kind: input, shape index: {}]   ;;  %s2864_s1 = inlined_call_operand.hbm [shape: f32[2,14,8,128], index: 1, kind: input, shape index: {}]   ;;  %s2865_s2 = inlined_call_operand.hbm [shape: s32[2,8,128], index: 2, kind: input, shape index: {}]   ;;  %s2866_s3 = inlined_call_operand.hbm [shape: f32[2,1,8,128], index: 3, kind: output, shape index: {}]  }
   0x1   :  { %2898 = sst [smem:[#allocation22_spill]] %s2863_s0 }
   0x2   :  { %2899 = sst [smem:[#allocation23_spill]] %s2864_s1 }
   0x3   :  { %2900 = sst [smem:[#allocation24_spill]] %s2865_s2 }
   0x4   :  { %2901 = sst [smem:[#allocation25_spill]] %s2866_s3 }
   0x5   :  { %8 = vsyncpa [#allocation3], 0 }
   0x6   :  { %10 = vsyncpa [#allocation3 + $0x1], 0 }
   0x7   :  { %11 = vsyncpa [#allocation6], 0 }
   0x8   :  { %13 = vsyncpa [#allocation6 + $0x1], 0 }
   0x9   :  { %14 = vsyncpa [#allocation4], 0 }
   0xa   :  { %16 = vsyncpa [#allocation4 + $0x1], 0  ;;  %s1909_s12 = smov 0   ;;  %s1911_s13 = smov 0  }
   0xb   :  { %s1913_s14 = smov 0   ;;  %s1915_s15 = smov 0  }
   0xc   :  { %s1917_s16 = smov 0   ;;  %s1919_s17 = smov 0  }
   0xd LB: > { %2902 = sst [smem:[#allocation12_spill]] %s1860_s12  ;;  %s1940_s18 = sadd.s32 4294967295, %s1880_s17   ;;  %s1880_s17 = sphi %s1919_s17, %s22_s17   ;;  %s1876_s16 = sphi %s1917_s16, %s3041_s16   ;;  %s1872_s15 = sphi %s1915_s15, %s3040_s15   ;;  %s1868_s14 = sphi %s1913_s14, %s3039_s14   ;;  %s1864_s13 = sphi %s1911_s13, %s3038_s13   ;;  %s1860_s12 = sphi %s1909_s12, %s3037_s12  }
   0xe   : > { %2903 = sst [smem:[#allocation13_spill]] %s1864_s13  ;;  %s1441_s19 = sadd.s32 4294967294, %s1880_s17  }
   0xf   : > { %2904 = sst [smem:[#allocation14_spill]] %s1868_s14  ;;  %s34_s20 = sadd.s32 1, %s1876_s16 }
  0x10   : > { %2905 = sst [smem:[#allocation15_spill]] %s1876_s16  ;;  %s43_s21 = sadd.s32 1, %s1868_s14 }
  0x11   : > { %2906 = sst [smem:[#allocation16_spill]] %s1880_s17  ;;  %p36_p0 = scmp.ge.s32.totalorder %s34_s20, 2 }
  0x12   : > { %p50_p1 = scmp.ne.s32.totalorder %s1868_s14, %s1864_s13  ;;  %p51_p2 = scmp.eq.s32.totalorder %s1880_s17, 0 }
  0x13   : > { %p56_p3 = scmp.ne.s32.totalorder %s1864_s13, %s1860_s12  ;;  %s3043_s20 = smov (%p36_p0, %s34_s20), 0 }
  0x14   : > { %2907 = sst [smem:[#allocation17_spill]] %s3043_s20  ;;  %p1952_p4 = por %p51_p2, %p50_p1 }
  0x15   : > { %p57_p5 = scmp.eq.s32.totalorder %s1940_s18, 0  ;;  %s38_s23 = ssub.s32 %s1876_s16, %s3043_s20 }
  0x16   : > { %p138_p6 = scmp.eq.s32.totalorder %s1940_s18, 1  ;;  %p41_p7 = scmp.eq.s32.totalorder %s38_s23, 0 }
  0x17   : > { %p1960_p8 = por %p57_p5, %p56_p3  ;;  %p144_p10 = scmp.eq.s32.totalorder %s1441_s19, 1 }
  0x18   : > { %p1964_p9 = por %p138_p6, %p50_p1  ;;  %p1651_p13 = scmp.lt.s32.totalorder %s1880_s17, 2 }
  0x19   : > { %s2909_s24 = scalar_select %p1960_p8, 1, 0 }
  0x1a   : > { %s2910_s25 = scalar_select %p1964_p9, 1, 0 }
  0x1b   : > { %s1969_s26 = scalar_select %p41_p7, %s1868_s14, %s43_s21  }
  0x1c   : > { %2911 = sst [smem:[#allocation18_spill]] %s2910_s25  ;;  %p1971_p11 = por %p144_p10, %p56_p3 }
  0x1d   : > { %2912 = sst [smem:[#allocation19_spill]] %s1969_s26  ;;  %s1978_s28 = sand.u32 1, %s1868_s14  }
  0x1e   : > { %s2913_s27 = scalar_select %p1971_p11, 1, 0 }
  0x1f   : > { %s1494_s29 = smul.u32 112, %s1978_s28  ;;  %p1984_p0 = pnand %p1651_p13, %p1952_p4 }
  0x20   : > { %2914 = sst [smem:[#allocation20_spill]] %s2913_s27  ;;  %s1495_s30 = smul.u32 1792, %s1876_s16 }
  0x21   : > { %s2915_s4 = scalar_select %p1984_p0, 1, 0 }
  0x22   : > { %s186_s5 = sand.u32 1, %s1880_s17   ;;  %s2916_s1 = sld [smem:[#allocation23_spill]] }
  0x23   : > { %s190_s9 = scalar_lea.vmem [#allocation5], %s1494_s29  ;;  %s2002_s11 = scalar_lea.sflag [#allocation6], %s186_s5 }
  0x24   : > { %s198_s10 = sshll.u32 %s190_s9, 4  ;;  %p2008_p4 = pneg %p1984_p0  ;;  %s1999_s10 = int_to_ptr.vmem [resolvable:$true] %s198_s10 }
  0x28   : > { %s1994_s8 = scalar_lea.hbm %s2916_s1, %s1495_s30  ;;  %s1709_s6 = scalar_lea.hbm %s2916_s1, 3584 }
  0x29   : > { %s1704_s19 = scalar_lea.hbm %s1994_s8, 1792  ;;  %p1710_p7 = scmp.lt.u32.totalorder %s1994_s8, %s2916_s1 }
  0x2a   : > { %p1705_p3 = scmp.ne.s32.totalorder %s1994_s8, %s1704_s19  ;;  %p1711_p10 = scmp.lt.u32.totalorder %s1709_s6, %s1704_s19 }
  0x2b   : > { %p1713_p12 = scmp.lt.u32.totalorder %s1704_s19, %s1994_s8 }
  0x2c   : > { %p1707_p5 = pnand %p2008_p4, %p1705_p3  ;;  %p1712_p13 = por %p1711_p10, %p1710_p7 }
  0x2e   : > { %p1708_p6 = pneg %p1707_p5  ;;  %p1714_p1 = por %p1713_p12, %p1712_p13 }
  0x30   : > { %p1715_p2 = pnand %p1714_p1, %p1708_p6 }
  0x32   : > { %1718 = shalt.err (!%p1715_p2)
}
  0x33   : > { %s1719_s5 = scalar_lea.vmem %s1999_s10, 1792  ;;  %s1882_s22 = smov [#allocation5]  }
  0x34   : > { %p1720_p3 = scmp.ne.s32.totalorder %s1999_s10, %s1719_s5  ;;  %s1724_s23 = sshll.u32 %s1882_s22, 4  ;;  %s1725_s23 = int_to_ptr.vmem [resolvable:$false] %s1724_s23 }
  0x35   : > { %s1726_s7 = scalar_lea.vmem %s1725_s23, 3584  ;;  %p1727_p9 = scmp.lt.s32.totalorder %s1999_s10, %s1725_s23 }
  0x36   : > { %p1722_p5 = pnand %p1720_p3, %p2008_p4  ;;  %p1728_p8 = scmp.lt.s32.totalorder %s1726_s7, %s1719_s5 }
  0x38   : > { %p1723_p11 = pneg %p1722_p5  ;;  %p1729_p7 = por %p1728_p8, %p1727_p9 }
  0x3a   : > { %p1730_p10 = pnand %p1729_p7, %p1723_p11 }
  0x3c   : > { %1733 = shalt.err (!%p1730_p10)
}
  0x3d   : > { %s2869_s19 = smov 128   ;;  %s2870_s6 = smov 8  }
  0x3e   : > { %1643 = dma.hbm_to_vmem [thread:$0]  (!%p1984_p0), %s1994_s8, 1792, %s1999_s10, %s2002_s11, %s2869_s19, %s2869_s19, %s2870_s6  }
  0x3f   : > { %p2918_p8 = scmp.lt.s32.totalorder %s1880_s17, 3  ;;  %p2919_p9 = scmp.ge.s32.totalorder %s1880_s17, 1 }
  0x40   : > { %s2921_s0 = sld [smem:[#allocation22_spill]]  ;;  %s168_s7 = scalar_lea.vmem [#allocation2], %s1494_s29 }
  0x41   : > { %p2039_p11 = pnand %p2919_p9, %p2918_p8  ;;  %s176_s1 = sshll.u32 %s168_s7, 4  ;;  %s2053_s1 = int_to_ptr.vmem [resolvable:$true] %s176_s1 }
  0x42   : > { %s1446_s8 = sshll.u32 %s1978_s28, 3  ;;  %s165_s10 = scalar_lea.sflag [#allocation3], %s1978_s28 }
  0x43   : > { %s2920_s9 = scalar_select %p2039_p11, 1, 0 }
  0x46   : > { %s2048_s23 = scalar_lea.hbm %s2921_s0, %s1495_s30  ;;  %s1739_s30 = scalar_lea.hbm %s2921_s0, 3584 }
  0x47   : > { %s1734_s19 = scalar_lea.hbm %s2048_s23, 1792  ;;  %p1740_p6 = scmp.lt.u32.totalorder %s2048_s23, %s2921_s0 }
  0x48   : > { %p1735_p12 = scmp.ne.s32.totalorder %s2048_s23, %s1734_s19  ;;  %p1741_p13 = scmp.lt.u32.totalorder %s1739_s30, %s1734_s19 }
  0x49   : > { %p1743_p5 = scmp.lt.u32.totalorder %s1734_s19, %s2048_s23 }
  0x4a   : > { %p1737_p1 = pnand %p1735_p12, %p2008_p4  ;;  %p1742_p3 = por %p1741_p13, %p1740_p6 }
  0x4c   : > { %p1738_p2 = pneg %p1737_p1  ;;  %p1744_p7 = por %p1743_p5, %p1742_p3 }
  0x4e   : > { %p1745_p10 = pnand %p1744_p7, %p1738_p2 }
  0x50   : > { %1748 = shalt.err (!%p1745_p10)
}
  0x51   : > { %s1749_s29 = scalar_lea.vmem %s2053_s1, 1792  ;;  %s1885_s6 = smov [#allocation2]  }
  0x52   : > { %p1750_p8 = scmp.ne.s32.totalorder %s2053_s1, %s1749_s29  ;;  %s1754_s7 = sshll.u32 %s1885_s6, 4  ;;  %s1755_s7 = int_to_ptr.vmem [resolvable:$false] %s1754_s7 }
  0x53   : > { %s1756_s20 = scalar_lea.vmem %s1755_s7, 3584  ;;  %p1757_p1 = scmp.lt.s32.totalorder %s2053_s1, %s1755_s7 }
  0x54   : > { %p1752_p9 = pnand %p1750_p8, %p2008_p4  ;;  %p1758_p11 = scmp.lt.s32.totalorder %s1756_s20, %s1749_s29 }
  0x56   : > { %p1753_p12 = pneg %p1752_p9  ;;  %p1759_p6 = por %p1758_p11, %p1757_p1 }
  0x58   : > { %p1760_p13 = pnand %p1759_p6, %p1753_p12 }
  0x5a   : > { %1763 = shalt.err (!%p1760_p13)
}
  0x5b   : > { %s2922_s19 = smov 8   ;;  %s2923_s5 = smov 128  }
  0x5c   : > { %1640 = dma.hbm_to_vmem [thread:$0]  (!%p1984_p0), %s2048_s23, 1792, %s2053_s1, %s165_s10, %s2923_s5, %s2923_s5, %s2922_s19  }
  0x5d   : > { %s1447_s30 = sshll.u32 %s1876_s16, 7  ;;  %s212_s22 = scalar_lea.vmem [#allocation7], %s1446_s8 }
  0x5e   : > { %s220_s29 = sshll.u32 %s212_s22, 4  ;;  %s2924_s2 = sld [smem:[#allocation24_spill]]  ;;  %s221_s29 = int_to_ptr.vmem [resolvable:$true] %s220_s29 }
  0x64   : > { %s218_s20 = scalar_lea.hbm %s2924_s2, %s1447_s30  ;;  %s1769_s17 = scalar_lea.hbm %s2924_s2, 256 }
  0x65   : > { %s1764_s0 = scalar_lea.hbm %s218_s20, 128  ;;  %p1770_p5 = scmp.lt.u32.totalorder %s218_s20, %s2924_s2 }
  0x66   : > { %p1765_p11 = scmp.ne.s32.totalorder %s218_s20, %s1764_s0  ;;  %p1771_p7 = scmp.lt.u32.totalorder %s1769_s17, %s1764_s0 }
  0x67   : > { %p1773_p8 = scmp.lt.u32.totalorder %s1764_s0, %s218_s20 }
  0x68   : > { %p1767_p2 = pnand %p1765_p11, %p2008_p4  ;;  %p1772_p10 = por %p1771_p7, %p1770_p5 }
  0x6a   : > { %p1768_p3 = pneg %p1767_p2  ;;  %p1774_p9 = por %p1773_p8, %p1772_p10 }
  0x6c   : > { %p1775_p12 = pnand %p1774_p9, %p1768_p3 }
  0x6e   : > { %1778 = shalt.err (!%p1775_p12)
}
  0x6f   : > { %s1779_s28 = scalar_lea.vmem %s221_s29, 128  ;;  %s1886_s23 = smov [#allocation7]  }
  0x70   : > { %p1780_p1 = scmp.ne.s32.totalorder %s221_s29, %s1779_s28  ;;  %s1784_s8 = sshll.u32 %s1886_s23, 4  ;;  %s1785_s8 = int_to_ptr.vmem [resolvable:$false] %s1784_s8 }
  0x71   : > { %s1786_s14 = scalar_lea.vmem %s1785_s8, 256  ;;  %p1787_p11 = scmp.lt.s32.totalorder %s221_s29, %s1785_s8 }
  0x72   : > { %p1782_p6 = pnand %p1780_p1, %p2008_p4  ;;  %p1788_p2 = scmp.lt.s32.totalorder %s1786_s14, %s1779_s28 }
  0x74   : > { %p1783_p13 = pneg %p1782_p6  ;;  %p1789_p0 = por %p1788_p2, %p1787_p11 }
  0x76   : > { %p1790_p5 = pnand %p1789_p0, %p1783_p13 }
  0x78   : > { %1793 = shalt.err (!%p1790_p5)
}
  0x79   : > { %p2925_p7 = scmp.ne.s32.totalorder %s2915_s4, 0  ;;  %p2926_p3 = scmp.ne.s32.totalorder %s2920_s9, 0 }
  0x7b   : > { %1646 = dma.hbm_to_vmem [thread:$0]  (!%p2925_p7), %s218_s20, 128, %s221_s29, %s2002_s11  }
  0x7c   : > { %229 = sbr.rel (%p2926_p3) target bundleno = 589 (0x24d), region = 32 }
  0x83   : > { %s2104_s0 = sand.u32 1, %s1864_s13   ;;  %p2928_p4 = scmp.ne.s32.totalorder %s2909_s24, 0 }
  0x84   : > { %2927 = sst [smem:[#allocation21_spill]] %s2104_s0  ;;  %s1498_s17 = smul.u32 112, %s2104_s0 }
  0x85   : > { %s232_s26 = scalar_lea.sflag [#allocation3], %s2104_s0 }
  0x86   : > { %s2108_s27 = scalar_lea.vmem [#allocation2], %s1498_s17 }
  0x87   : > { %1847 = dma.done.wait (%p2928_p4), %s232_s26, 1792  }
  0x88   : > { %1849 = vsyncadd (%p2928_p4), %s232_s26, 4294965504  ;;  %s240_s4 = sand.u32 1, %s1940_s18   ;;  %s2115_s21 = scalar_lea.vmem [#allocation5], %s1498_s17 }
  0x89   : > { %s241_s11 = scalar_lea.sflag [#allocation6], %s240_s4 }
  0x8a   : > { %1851 = dma.done.wait (%p2928_p4), %s241_s11, 1920  }
  0x8b   : > { %1853 = vsyncadd (%p2928_p4), %s241_s11, 4294965376  ;;  %s2889_s9 = sshll.u32 %s2104_s0, 3  ;;  %v1453_v0 = vld [vmem:[%s2115_s21 + $0x8] sm:$0xff]  ;;  %v1887_v5 = vmov 0.0   ;;  %v1455_v8 = vld [vmem:[%s2108_s27 + $0x10] sm:$0xff] }
  0x8c   : > { %v1452_v1 = vld [vmem:[%s2108_s27 + $0x8] sm:$0xff]  ;;  %s253_s10 = scalar_lea.vmem [#allocation7], %s2889_s9  ;;  %v324_v3 = vmul.f32 %v1453_v0, %v1453_v0  ;;  %v360_v10 = vmul.f32 %v1455_v8, %v1455_v8  ;;  %v1456_v12 = vld [vmem:[%s2115_s21 + $0x10] sm:$0xff]  ;;  %v1458_v19 = vld [vmem:[%s2108_s27 + $0x18] sm:$0xff] }
  0x8d   : > { %v2126_v2 = vld [vmem:[%s253_s10] sm:$0xff]  ;;  %v304_v4 = vmul.f32 %v1452_v1, %v1452_v1  ;;  %v380_v17 = vmul.f32 %v1456_v12, %v1456_v12  ;;  %v416_v23 = vmul.f32 %v1458_v19, %v1458_v19  ;;  %v1464_v36 = vld [vmem:[%s2108_s27 + $0x28] sm:$0xff]  ;;  %v1467_v44 = vld [vmem:[%s2108_s27 + $0x30] sm:$0xff] }
  0x8e   : > { %vm287_vm0 = vcmp.eq.s32.totalorder %v2126_v2, 1  ;;  %vm343_vm1 = vcmp.eq.s32.totalorder %v2126_v2, 2  ;;  %325 = vadd.xlane.f32.xlu1 %v324_v3  ;;  %vm679_vm2 = vcmp.eq.s32.totalorder %v2126_v2, 8  ;;  %vm735_vm3 = vcmp.eq.s32.totalorder %v2126_v2, 9  ;;  %v1459_v26 = vld [vmem:[%s2115_s21 + $0x18] sm:$0xff]  ;;  %v1461_v30 = vld [vmem:[%s2108_s27 + $0x20] sm:$0xff] }
  0x8f   : > { %v1451_v6 = vsel %vm287_vm0, 1.0, %v1887_v5  ;;  %305 = vadd.xlane.f32.xlu0 %v304_v4  ;;  %v1454_v9 = vsel %vm343_vm1, 1.0, %v1887_v5  ;;  %v2136_v15 = vsel %vm679_vm2, 1.0, %v1887_v5  ;;  %vm399_vm4 = vcmp.eq.s32.totalorder %v2126_v2, 3  ;;  %v1462_v32 = vld [vmem:[%s2115_s21 + $0x20] sm:$0xff]  ;;  %v1465_v40 = vld [vmem:[%s2115_s21 + $0x28] sm:$0xff] }
  0x90   : > { %v314_v7 = vmul.f32 %v1453_v0, %v1451_v6  ;;  %v350_v11 = vmul.f32 %v1455_v8, %v1454_v9  ;;  %v370_v13 = vmul.f32 %v1456_v12, %v1454_v9  ;;  %v294_v14 = vmul.f32 %v1452_v1, %v1451_v6  ;;  %v1468_v46 = vld [vmem:[%s2115_s21 + $0x30] sm:$0xff]  ;;  %v1470_v50 = vld [vmem:[%s2108_s27 + $0x38] sm:$0xff]  ;;  %v1473_v57 = vld [vmem:[%s2108_s27 + $0x40] sm:$0xff] }
  0x91   : > { %v2141_v16 = vsel %vm735_vm3, 1.0, %v1887_v5  ;;  %vm791_vm5 = vcmp.eq.s32.totalorder %v2126_v2, 10  ;;  %vm847_vm6 = vcmp.eq.s32.totalorder %v2126_v2, 11  ;;  %v1457_v20 = vsel %vm399_vm4, 1.0, %v1887_v5  ;;  %v1471_v54 = vld [vmem:[%s2115_s21 + $0x38] sm:$0xff]  ;;  %v1474_v59 = vld [vmem:[%s2115_s21 + $0x40] sm:$0xff] }
  0x92   : > { %315 = vadd.xlane.f32.xlu1 %v314_v7  ;;  %v2145_v18 = vsel %vm791_vm5, 1.0, %v1887_v5  ;;  %v2151_v21 = vsel %vm847_vm6, 1.0, %v1887_v5  ;;  %vm903_vm7 = vcmp.eq.s32.totalorder %v2126_v2, 12  ;;  %vm959_vm8 = vcmp.eq.s32.totalorder %v2126_v2, 13  ;;  %v1476_v63 = vld [vmem:[%s2108_s27 + $0x48] sm:$0xff]  ;;  %v1480_v7 = vld [vmem:[%s2115_s21 + $0x50] sm:$0xff] }
  0x93   : > { %334 = vadd.xlane.f32.xlu0 %v1451_v6  ;;  %v2155_v22 = vsel %vm903_vm7, 1.0, %v1887_v5  ;;  %v406_v24 = vmul.f32 %v1458_v19, %v1457_v20  ;;  %v2159_v25 = vsel %vm959_vm8, 1.0, %v1887_v5  ;;  %vm455_vm9 = vcmp.eq.s32.totalorder %v2126_v2, 4 }
  0x94   : > { %v436_v27 = vmul.f32 %v1459_v26, %v1459_v26  ;;  %v426_v28 = vmul.f32 %v1459_v26, %v1457_v20  ;;  %v1460_v29 = vsel %vm455_vm9, 1.0, %v1887_v5  ;;  %v472_v34 = vmul.f32 %v1461_v30, %v1461_v30 }
  0x95   : > { %v462_v31 = vmul.f32 %v1461_v30, %v1460_v29  ;;  %v482_v33 = vmul.f32 %v1462_v32, %v1460_v29  ;;  %vm511_vm10 = vcmp.eq.s32.totalorder %v2126_v2, 5  ;;  %v492_v35 = vmul.f32 %v1462_v32, %v1462_v32 }
  0x96   : > { %351 = vadd.xlane.f32.xlu1 %v350_v11  ;;  %v1463_v37 = vsel %vm511_vm10, 1.0, %v1887_v5  ;;  %v528_v38 = vmul.f32 %v1464_v36, %v1464_v36  ;;  %vm567_vm11 = vcmp.eq.s32.totalorder %v2126_v2, 6  ;;  %v548_v41 = vmul.f32 %v1465_v40, %v1465_v40 }
  0x97   : > { %361 = vadd.xlane.f32.xlu0 %v360_v10  ;;  %v518_v39 = vmul.f32 %v1464_v36, %v1463_v37  ;;  %v538_v42 = vmul.f32 %v1465_v40, %v1463_v37  ;;  %v1466_v43 = vsel %vm567_vm11, 1.0, %v1887_v5  ;;  %v584_v48 = vmul.f32 %v1467_v44, %v1467_v44 }
  0x98   : > { %v574_v45 = vmul.f32 %v1467_v44, %v1466_v43  ;;  %v594_v47 = vmul.f32 %v1468_v46, %v1466_v43  ;;  %vm623_vm12 = vcmp.eq.s32.totalorder %v2126_v2, 7  ;;  %v604_v49 = vmul.f32 %v1468_v46, %v1468_v46  ;;  %v1477_v2 = vld [vmem:[%s2115_s21 + $0x48] sm:$0xff] }
  0x99   : > { %v1469_v51 = vsel %vm623_vm12, 1.0, %v1887_v5  ;;  %v640_v52 = vmul.f32 %v1470_v50, %v1470_v50  ;;  %v660_v55 = vmul.f32 %v1471_v54, %v1471_v54  ;;  %v686_v58 = vmul.f32 %v1473_v57, %v2136_v15  ;;  %v1479_v5 = vld [vmem:[%s2108_s27 + $0x50] sm:$0xff] }
  0x9a   : > { %371 = vadd.xlane.f32.xlu1 %v370_v13  ;;  %v630_v53 = vmul.f32 %v1470_v50, %v1469_v51  ;;  %v650_v56 = vmul.f32 %v1471_v54, %v1469_v51  ;;  %v706_v60 = vmul.f32 %v1474_v59, %v2136_v15  ;;  %v696_v61 = vmul.f32 %v1473_v57, %v1473_v57 }
  0x9b   : > { %295 = vadd.xlane.f32.xlu0 %v294_v14  ;;  %v716_v62 = vmul.f32 %v1474_v59, %v1474_v59  ;;  %v752_v0 = vmul.f32 %v1476_v63, %v1476_v63  ;;  %v742_v1 = vmul.f32 %v1476_v63, %v2141_v16  ;;  %v772_v3 = vmul.f32 %v1477_v2, %v1477_v2  ;;  %v1482_v14 = vld [vmem:[%s2108_s27 + $0x58] sm:$0xff] }
  0x9c   : > { %v762_v4 = vmul.f32 %v1477_v2, %v2141_v16  ;;  %v798_v6 = vmul.f32 %v1479_v5, %v2145_v18  ;;  %v818_v8 = vmul.f32 %v1480_v7, %v2145_v18  ;;  %v1015_v10 = vlaneseq }
  0x9d   : > { %v828_v11 = vmul.f32 %v1480_v7, %v1480_v7  ;;  %v2953_v54 = vmov 0 }
  0x9e   : > { %390 = vadd.xlane.f32.xlu1 %v1454_v9  ;;  %v808_v9 = vmul.f32 %v1479_v5, %v1479_v5  ;;  %v2192_v12 = vshrl.u32 %v1015_v10, 7  ;;  %v2194_v13 = vand.u32 127, %v1015_v10 }
  0x9f   : > { %381 = vadd.xlane.f32.xlu0 %v380_v17  ;;  %v1483_v17 = vld [vmem:[%s2115_s21 + $0x58] sm:$0xff] }
  0xa0   : > { %vm2881_vm13 = vcmp.eq.s32.totalorder %v2194_v13, 0  ;;  %vm1191_vm14 = vcmp.eq.s32.totalorder %v2192_v12, 3  ;;  %vm2884_vm15 = vcmp.eq.s32.totalorder %v2192_v12, 4  ;;  %vm2879_vm2 = vcmp.eq.s32.totalorder %v2194_v13, 1 }
  0xa1   : > { %vm2207_vm0 = vmand %vm1191_vm14, %vm2881_vm13  ;;  %vm2878_vm5 = vcmp.eq.s32.totalorder %v2194_v13, 2  ;;  %vm2877_vm8 = vcmp.eq.s32.totalorder %v2194_v13, 3  ;;  %vm2880_vm11 = vcmp.eq.s32.totalorder %v2194_v13, 4 }
  0xa2   : > { %417 = vadd.xlane.f32.xlu1 %v416_v23  ;;  %vm2215_vm1 = vmand %vm2884_vm15, %vm2881_vm13  ;;  %v874_v23 = vmul.f32 %v1483_v17, %v2151_v21  ;;  %vm2883_vm13 = vcmp.eq.s32.totalorder %v2194_v13, 6 }
  0xa3   : > { %407 = vadd.xlane.f32.xlu0 %v406_v24  ;;  %v1485_v24 = vld [vmem:[%s2108_s27 + $0x60] sm:$0xff]  ;;  %vm2226_vm3 = vmand %vm1191_vm14, %vm2879_vm2 }
  0xa4   : > { %vm2235_vm4 = vmand %vm2884_vm15, %vm2879_vm2 }
  0xa5   : > { %vm2247_vm6 = vmand %vm1191_vm14, %vm2878_vm5 }
  0xa6   : > { %437 = vadd.xlane.f32.xlu1 %v436_v27  ;;  %v910_v27 = vmul.f32 %v1485_v24, %v2155_v22  ;;  %vm2255_vm7 = vmand %vm2884_vm15, %vm2878_vm5  ;;  %vm2882_vm5 = vcmp.eq.s32.totalorder %v2194_v13, 5 }
  0xa7   : > { %427 = vadd.xlane.f32.xlu0 %v426_v28  ;;  %vm2269_vm9 = vmand %vm1191_vm14, %vm2877_vm8 }
  0xa8   : > { %vm2277_vm10 = vmand %vm2884_vm15, %vm2877_vm8 }
  0xa9   : > { %vm2287_vm12 = vmand %vm1191_vm14, %vm2880_vm11 }
  0xaa   : > { %463 = vadd.xlane.f32.xlu1 %v462_v31  ;;  %v920_v31 = vmul.f32 %v1485_v24, %v1485_v24  ;;  %vm2295_vm8 = vmand %vm2884_vm15, %vm2880_vm11 }
  0xab   : > { %446 = vadd.xlane.f32.xlu0 %v1457_v20  ;;  %v884_v20 = vmul.f32 %v1483_v17, %v1483_v17  ;;  %vm2304_vm2 = vmand %vm1191_vm14, %vm2882_vm5 }
  0xac   : > { %vm2312_vm11 = vmand %vm2884_vm15, %vm2882_vm5 }
  0xad   : > { %vm2329_vm5 = vmand %vm2884_vm15, %vm2883_vm13 }
  0xae   : > { %483 = vadd.xlane.f32.xlu1 %v482_v33 }
  0xaf   : > { %473 = vadd.xlane.f32.xlu0 %v472_v34  ;;  %v1488_v34 = vld [vmem:[%s2108_s27 + $0x68] sm:$0xff] }
  0xb0   : > { %v976_v36 = vmul.f32 %v1488_v34, %v1488_v34 }
  0xb2   : > { %502 = vadd.xlane.f32.xlu1 %v1460_v29  ;;  %v1486_v29 = vld [vmem:[%s2115_s21 + $0x60] sm:$0xff] }
  0xb3   : > { %493 = vadd.xlane.f32.xlu0 %v492_v35  ;;  %v930_v30 = vmul.f32 %v1486_v29, %v2155_v22  ;;  %v940_v33 = vmul.f32 %v1486_v29, %v1486_v29  ;;  %v966_v35 = vmul.f32 %v1488_v34, %v2159_v25 }
  0xb6   : > { %529 = vadd.xlane.f32.xlu1 %v528_v38 }
  0xb7   : > { %519 = vadd.xlane.f32.xlu0 %v518_v39 }
  0xba   : > { %549 = vadd.xlane.f32.xlu1 %v548_v41 }
  0xbb   : > { %539 = vadd.xlane.f32.xlu0 %v538_v42 }
  0xbe   : > { %575 = vadd.xlane.f32.xlu1 %v574_v45 }
  0xbf   : > { %558 = vadd.xlane.f32.xlu0 %v1463_v37  ;;  %v1489_v37 = vld [vmem:[%s2115_s21 + $0x68] sm:$0xff] }
  0xc0   : > { %v986_v38 = vmul.f32 %v1489_v37, %v2159_v25  ;;  %v996_v39 = vmul.f32 %v1489_v37, %v1489_v37  ;;  %v2957_v37 = vmov 0 }
  0xc2   : > { %595 = vadd.xlane.f32.xlu1 %v594_v47 }
  0xc3   : > { %585 = vadd.xlane.f32.xlu0 %v584_v48 }
  0xc6   : > { %614 = vadd.xlane.f32.xlu1 %v1466_v43 }
  0xc7   : > { %605 = vadd.xlane.f32.xlu0 %v604_v49 }
  0xca   : > { %641 = vadd.xlane.f32.xlu1 %v640_v52 }
  0xcb   : > { %631 = vadd.xlane.f32.xlu0 %v630_v53 }
  0xce   : > { %661 = vadd.xlane.f32.xlu1 %v660_v55 }
  0xcf   : > { %651 = vadd.xlane.f32.xlu0 %v650_v56 }
  0xd2   : > { %687 = vadd.xlane.f32.xlu1 %v686_v58  ;;  %v2955_v58 = vmov 0 }
  0xd3   : > { %670 = vadd.xlane.f32.xlu0 %v1469_v51  ;;  %v2956_v58 = vsel %vm2329_vm5, 4294967295, %v2955_v58  ;;  %vm2959_vm5 = vcmp.eq.s32.totalorder %v2192_v12, 4 }
  0xd6   : > { %707 = vadd.xlane.f32.xlu1 %v706_v60 }
  0xd7   : > { %697 = vadd.xlane.f32.xlu0 %v696_v61 }
  0xda   : > { %726 = vadd.xlane.f32.xlu1 %v2136_v15  ;;  %v864_v15 = vmul.f32 %v1482_v14, %v1482_v14 }
  0xdb   : > { %717 = vadd.xlane.f32.xlu0 %v716_v62 }
  0xde   : > { %753 = vadd.xlane.f32.xlu1 %v752_v0 }
  0xdf   : > { %743 = vadd.xlane.f32.xlu0 %v742_v1 }
  0xe2   : > { %773 = vadd.xlane.f32.xlu1 %v772_v3 }
  0xe3   : > { %763 = vadd.xlane.f32.xlu0 %v762_v4 }
  0xe6   : > { %799 = vadd.xlane.f32.xlu1 %v798_v6 }
  0xe7   : > { %782 = vadd.xlane.f32.xlu0 %v2141_v16  ;;  %v854_v16 = vmul.f32 %v1482_v14, %v2151_v21 }
  0xea   : > { %819 = vadd.xlane.f32.xlu1 %v818_v8 }
  0xeb   : > { %809 = vadd.xlane.f32.xlu0 %v808_v9 }
  0xee   : > { %838 = vadd.xlane.f32.xlu1 %v2145_v18 }
  0xef   : > { %829 = vadd.xlane.f32.xlu0 %v828_v11 }
  0xf2   : > { %865 = vadd.xlane.f32.xlu1 %v864_v15 }
  0xf3   : > { %855 = vadd.xlane.f32.xlu0 %v854_v16 }
  0xf6   : > { %885 = vadd.xlane.f32.xlu1 %v884_v20 }
  0xf7   : > { %875 = vadd.xlane.f32.xlu0 %v874_v23 }
  0xfa   : > { %911 = vadd.xlane.f32.xlu1 %v910_v27 }
  0xfb   : > { %894 = vadd.xlane.f32.xlu0 %v2151_v21 }
  0xfe   : > { %931 = vadd.xlane.f32.xlu1 %v930_v30 }
  0xff   : > { %921 = vadd.xlane.f32.xlu0 %v920_v31 }
 0x102   : > { %950 = vadd.xlane.f32.xlu1 %v2155_v22 }
 0x103   : > { %941 = vadd.xlane.f32.xlu0 %v940_v33 }
 0x106   : > { %977 = vadd.xlane.f32.xlu1 %v976_v36 }
 0x107   : > { %967 = vadd.xlane.f32.xlu0 %v966_v35 }
 0x10a   : > { %997 = vadd.xlane.f32.xlu1 %v996_v39 }
 0x10b   : > { %987 = vadd.xlane.f32.xlu0 %v986_v38 }
 0x10f   : > { %1006 = vadd.xlane.f32.xlu0 %v2159_v25  ;;  %v2949_v25 = vmov 0 }
 0x110   : > { %v2950_v25 = vsel %vm2304_vm2, 4294967295, %v2949_v25  ;;  %vm2321_vm2 = vmand %vm1191_vm14, %vm2883_vm13  ;;  %vm2885_vm13 = vcmp.eq.s32.totalorder %v2194_v13, 7 }
 0x111   : > { %v2954_v54 = vsel %vm2321_vm2, 4294967295, %v2953_v54  ;;  %vm2338_vm15 = vmand %vm1191_vm14, %vm2885_vm13 }
 0x112   : > { %v2958_v37 = vsel %vm2338_vm15, 4294967295, %v2957_v37  ;;  %vm2346_vm2 = vmand %vm2959_vm5, %vm2885_vm13  ;;  %vm2886_vm5 = vcmp.eq.s32.totalorder %v2194_v13, 8 }
 0x113   : > { %vm2355_vm13 = vmand %vm1191_vm14, %vm2886_vm5 }
 0x11b   : > { %v326_v43 = vpop.xlane.xlu1 %325 }
 0x11c   : > { %v306_v44 = vpop.xlane.xlu0 %305  ;;  %v327_v47 = vrot.slane %v326_v43, 4 }
 0x11d   : > { %v307_v46 = vrot.slane %v306_v44, 4 }
 0x11e   : > { %v328_v51 = vadd.f32 %v327_v47, %v326_v43 }
 0x11f   : > { %v308_v48 = vadd.f32 %v307_v46, %v306_v44  ;;  %v316_v50 = vpop.xlane.xlu1 %315 }
 0x120   : > { %v335_v49 = vpop.xlane.xlu0 %334  ;;  %v317_v53 = vrot.slane %v316_v50, 4  ;;  %v329_v61 = vrot.slane %v328_v51, 2 }
 0x121   : > { %v336_v52 = vrot.slane %v335_v49, 4  ;;  %v309_v55 = vrot.slane %v308_v48, 2 }
 0x122   : > { %v318_v63 = vadd.f32 %v317_v53, %v316_v50  ;;  %v330_v9 = vadd.f32 %v329_v61, %v328_v51 }
 0x123   : > { %v352_v57 = vpop.xlane.xlu1 %351  ;;  %v337_v62 = vadd.f32 %v336_v52, %v335_v49  ;;  %v310_v4 = vadd.f32 %v309_v55, %v308_v48  ;;  %v2960_v52 = vmov 0 }
 0x124   : > { %v362_v56 = vpop.xlane.xlu0 %361  ;;  %v353_v60 = vrot.slane %v352_v57, 4  ;;  %v319_v8 = vrot.slane %v318_v63, 2  ;;  %v331_v31 = vrot.slane %v330_v9, 1  ;;  %v2961_v52 = vsel %vm2346_vm2, 4294967295, %v2960_v52 }
 0x125   : > { %v363_v59 = vrot.slane %v362_v56, 4  ;;  %v338_v7 = vrot.slane %v337_v62, 2  ;;  %v311_v20 = vrot.slane %v310_v4, 1  ;;  %vm2964_vm2 = vcmp.eq.s32.totalorder %v2192_v12, 4 }
 0x126   : > { %v354_v1 = vadd.f32 %v353_v60, %v352_v57  ;;  %v320_v30 = vadd.f32 %v319_v8, %v318_v63  ;;  %vm2363_vm15 = vmand %vm2964_vm2, %vm2886_vm5  ;;  %vm2887_vm2 = vcmp.eq.s32.totalorder %v2194_v13, 9 }
 0x127   : > { %v364_v0 = vadd.f32 %v363_v59, %v362_v56  ;;  %v372_v2 = vpop.xlane.xlu1 %371  ;;  %v339_v33 = vadd.f32 %v338_v7, %v337_v62  ;;  %v312_v43 = vadd.f32 %v311_v20, %v310_v4  ;;  %v332_v56 = vadd.f32 %v331_v31, %v330_v9  ;;  %vm2372_vm5 = vmand %vm1191_vm14, %vm2887_vm2 }
 0x128   : > { %v296_v3 = vpop.xlane.xlu0 %295  ;;  %v373_v5 = vrot.slane %v372_v2, 4  ;;  %v355_v15 = vrot.slane %v354_v1, 2  ;;  %v321_v55 = vrot.slane %v320_v30, 1 }
 0x129   : > { %v297_v6 = vrot.slane %v296_v3, 4  ;;  %v365_v14 = vrot.slane %v364_v0, 2  ;;  %v340_v57 = vrot.slane %v339_v33, 1 }
 0x12a   : > { %v374_v10 = vadd.f32 %v373_v5, %v372_v2  ;;  %v356_v44 = vadd.f32 %v355_v15, %v354_v1 }
 0x12b   : > { %v298_v11 = vadd.f32 %v297_v6, %v296_v3  ;;  %v391_v16 = vpop.xlane.xlu1 %390  ;;  %v366_v46 = vadd.f32 %v365_v14, %v364_v0 }
 0x12c   : > { %v382_v17 = vpop.xlane.xlu0 %381  ;;  %v375_v23 = vrot.slane %v374_v10, 2  ;;  %v392_v27 = vrot.slane %v391_v16, 4  ;;  %v357_v2 = vrot.slane %v356_v44, 1 }
 0x12d   : > { %v299_v24 = vrot.slane %v298_v11, 2  ;;  %v383_v29 = vrot.slane %v382_v17, 4  ;;  %v367_v3 = vrot.slane %v366_v46, 1 }
 0x12e   : > { %v393_v34 = vadd.f32 %v392_v27, %v391_v16  ;;  %v376_v47 = vadd.f32 %v375_v23, %v374_v10  ;;  %v322_v10 = vadd.f32 %v321_v55, %v320_v30  ;;  %v358_v23 = vadd.f32 %v357_v2, %v356_v44 }
 0x12f   : > { %v384_v35 = vadd.f32 %v383_v29, %v382_v17  ;;  %v300_v36 = vadd.f32 %v299_v24, %v298_v11  ;;  %v418_v38 = vpop.xlane.xlu1 %417  ;;  %v341_v11 = vadd.f32 %v340_v57, %v339_v33  ;;  %v368_v24 = vadd.f32 %v367_v3, %v366_v46 }
 0x130   : > { %v408_v39 = vpop.xlane.xlu0 %407  ;;  %v394_v48 = vrot.slane %v393_v34, 2  ;;  %v419_v50 = vrot.slane %v418_v38, 4  ;;  %v377_v4 = vrot.slane %v376_v47, 1 }
 0x131   : > { %v385_v49 = vrot.slane %v384_v35, 2  ;;  %v409_v51 = vrot.slane %v408_v39, 4  ;;  %v301_v53 = vrot.slane %v300_v36, 1 }
 0x132   : > { %v420_v59 = vadd.f32 %v419_v50, %v418_v38  ;;  %v395_v62 = vadd.f32 %v394_v48, %v393_v34  ;;  %v378_v27 = vadd.f32 %v377_v4, %v376_v47  ;;  %v2965_v50 = vmov 0 }
 0x133   : > { %v410_v60 = vadd.f32 %v409_v51, %v408_v39  ;;  %v386_v61 = vadd.f32 %v385_v49, %v384_v35  ;;  %v438_v63 = vpop.xlane.xlu1 %437  ;;  %v302_v1 = vadd.f32 %v301_v53, %v300_v36  ;;  %v2962_v36 = vmov 0 }
 0x134   : > { %v428_v0 = vpop.xlane.xlu0 %427  ;;  %v421_v5 = vrot.slane %v420_v59, 2  ;;  %v439_v7 = vrot.slane %v438_v63, 4  ;;  %v396_v9 = vrot.slane %v395_v62, 1  ;;  %v2963_v36 = vsel %vm2355_vm13, 4294967295, %v2962_v36 }
 0x135   : > { %v411_v6 = vrot.slane %v410_v60, 2  ;;  %v429_v8 = vrot.slane %v428_v0, 4  ;;  %1499 = vpush %v302_v1  ;;  %v387_v14 = vrot.slane %v386_v61, 1  ;;  %v2966_v50 = vsel %vm2363_vm15, 4294967295, %v2965_v50 }
 0x136   : > { %v440_v15 = vadd.f32 %v439_v7, %v438_v63  ;;  %1501 = vpush %v312_v43  ;;  %v422_v20 = vadd.f32 %v421_v5, %v420_v59  ;;  %v397_v39 = vadd.f32 %v396_v9, %v395_v62  ;;  %vm2969_vm15 = vcmp.eq.s32.totalorder %v2192_v12, 4 }
 0x137   : > { %v430_v16 = vadd.f32 %v429_v8, %v428_v0  ;;  %v412_v17 = vadd.f32 %v411_v6, %v410_v60  ;;  %1503 = vpush %v322_v10  ;;  %v464_v29 = vpop.xlane.xlu1 %463  ;;  %v388_v38 = vadd.f32 %v387_v14, %v386_v61  ;;  %vm2380_vm13 = vmand %vm2969_vm15, %vm2887_vm2  ;;  %vm2888_vm15 = vcmp.eq.s32.totalorder %v2194_v13, 10 }
 0x138   : > { %v447_v31 = vpop.xlane.xlu0 %446  ;;  %v441_v34 = vrot.slane %v440_v15, 2  ;;  %1505 = vpush %v332_v56  ;;  %v465_v30 = vrot.slane %v464_v29, 4  ;;  %v423_v44 = vrot.slane %v422_v20, 1  ;;  %vm2389_vm2 = vmand %vm1191_vm14, %vm2888_vm15 }
 0x139   : > { %v431_v35 = vrot.slane %v430_v16, 2  ;;  %v448_v33 = vrot.slane %v447_v31, 4  ;;  %1507 = vpush %v341_v11  ;;  %v413_v43 = vrot.slane %v412_v17, 1 }
 0x13a   : > { %1509 = vpush %v358_v23  ;;  %v466_v46 = vadd.f32 %v465_v30, %v464_v29  ;;  %v442_v49 = vadd.f32 %v441_v34, %v440_v15  ;;  %v424_v56 = vadd.f32 %v423_v44, %v422_v20 }
 0x13b   : > { %v449_v47 = vadd.f32 %v448_v33, %v447_v31  ;;  %v432_v48 = vadd.f32 %v431_v35, %v430_v16  ;;  %1511 = vpush %v368_v24  ;;  %v484_v51 = vpop.xlane.xlu1 %483  ;;  %v414_v55 = vadd.f32 %v413_v43, %v412_v17  ;;  %v2967_v24 = vmov 0 }
 0x13c   : > { %v474_v53 = vpop.xlane.xlu0 %473  ;;  %1513 = vpush %v378_v27  ;;  %v467_v57 = vrot.slane %v466_v46, 2  ;;  %v485_v60 = vrot.slane %v484_v51, 4  ;;  %v443_v63 = vrot.slane %v442_v49, 1  ;;  %v2968_v24 = vsel %vm2372_vm5, 4294967295, %v2967_v24 }
 0x13d   : > { %v450_v59 = vrot.slane %v449_v47, 2  ;;  %v475_v61 = vrot.slane %v474_v53, 4  ;;  %1515 = vpush %v388_v38  ;;  %v433_v62 = vrot.slane %v432_v48, 1 }
 0x13e   : > { %1517 = vpush %v397_v39  ;;  %v486_v0 = vadd.f32 %v485_v60, %v484_v51  ;;  %v468_v3 = vadd.f32 %v467_v57, %v466_v46  ;;  %v444_v7 = vadd.f32 %v443_v63, %v442_v49  ;;  %v2970_v39 = vmov 0 }
 0x13f   : > { %v476_v1 = vadd.f32 %v475_v61, %v474_v53  ;;  %v451_v2 = vadd.f32 %v450_v59, %v449_v47  ;;  %1519 = vpush %v414_v55  ;;  %v503_v4 = vpop.xlane.xlu1 %502  ;;  %v434_v6 = vadd.f32 %v433_v62, %v432_v48  ;;  %v2971_v39 = vsel %vm2380_vm13, 4294967295, %v2970_v39 }
 0x140   : > { %v494_v5 = vpop.xlane.xlu0 %493  ;;  %v487_v8 = vrot.slane %v486_v0, 2  ;;  %1521 = vpush %v424_v56  ;;  %v504_v11 = vrot.slane %v503_v4, 4  ;;  %v469_v15 = vrot.slane %v468_v3, 1  ;;  %vm2974_vm13 = vcmp.eq.s32.totalorder %v2192_v12, 4 }
 0x141   : > { %v477_v10 = vrot.slane %v476_v1, 2  ;;  %v495_v14 = vrot.slane %v494_v5, 4  ;;  %1523 = vpush %v434_v6  ;;  %v452_v9 = vrot.slane %v451_v2, 1  ;;  %vm2397_vm5 = vmand %vm2974_vm13, %vm2888_vm15  ;;  %vm1075_vm13 = vcmp.eq.s32.totalorder %v2194_v13, 11 }
 0x142   : > { %v505_v16 = vadd.f32 %v504_v11, %v503_v4  ;;  %1525 = vpush %v444_v7  ;;  %v488_v23 = vadd.f32 %v487_v8, %v486_v0  ;;  %v470_v34 = vadd.f32 %v469_v15, %v468_v3  ;;  %vm2406_vm15 = vmand %vm1191_vm14, %vm1075_vm13 }
 0x143   : > { %v496_v17 = vadd.f32 %v495_v14, %v494_v5  ;;  %v478_v20 = vadd.f32 %v477_v10, %v476_v1  ;;  %v530_v27 = vpop.xlane.xlu1 %529  ;;  %v453_v31 = vadd.f32 %v452_v9, %v451_v2  ;;  %v2972_v9 = vmov 0 }
 0x144   : > { %v520_v29 = vpop.xlane.xlu0 %519  ;;  %v506_v35 = vrot.slane %v505_v16, 2  ;;  %v531_v33 = vrot.slane %v530_v27, 4  ;;  %v489_v44 = vrot.slane %v488_v23, 1  ;;  %v2973_v9 = vsel %vm2389_vm2, 4294967295, %v2972_v9 }
 0x145   : > { %v497_v30 = vrot.slane %v496_v17, 2  ;;  %v521_v38 = vrot.slane %v520_v29, 4  ;;  %1527 = vpush %v453_v31  ;;  %v479_v43 = vrot.slane %v478_v20, 1 }
 0x146   : > { %v532_v46 = vadd.f32 %v531_v33, %v530_v27  ;;  %1529 = vpush %v470_v34  ;;  %v507_v49 = vadd.f32 %v506_v35, %v505_v16  ;;  %v490_v56 = vadd.f32 %v489_v44, %v488_v23 }
 0x147   : > { %v522_v47 = vadd.f32 %v521_v38, %v520_v29  ;;  %v498_v48 = vadd.f32 %v497_v30, %v496_v17  ;;  %v550_v51 = vpop.xlane.xlu1 %549  ;;  %v480_v55 = vadd.f32 %v479_v43, %v478_v20  ;;  %v2975_v17 = vmov 0 }
 0x148   : > { %v540_v53 = vpop.xlane.xlu0 %539  ;;  %v533_v57 = vrot.slane %v532_v46, 2  ;;  %v551_v60 = vrot.slane %v550_v51, 4  ;;  %v508_v63 = vrot.slane %v507_v49, 1  ;;  %v2976_v17 = vsel %vm2397_vm5, 4294967295, %v2975_v17 }
 0x149   : > { %v523_v59 = vrot.slane %v522_v47, 2  ;;  %v541_v61 = vrot.slane %v540_v53, 4  ;;  %1531 = vpush %v480_v55  ;;  %v499_v62 = vrot.slane %v498_v48, 1  ;;  %vm2979_vm5 = vcmp.eq.s32.totalorder %v2192_v12, 4 }
 0x14a   : > { %v552_v0 = vadd.f32 %v551_v60, %v550_v51  ;;  %1533 = vpush %v490_v56  ;;  %v534_v3 = vadd.f32 %v533_v57, %v532_v46  ;;  %v509_v7 = vadd.f32 %v508_v63, %v507_v49  ;;  %vm2414_vm2 = vmand %vm2979_vm5, %vm1075_vm13  ;;  %vm2990_vm5 = vnez %v2966_v50 }
 0x14b   : > { %v542_v1 = vadd.f32 %v541_v61, %v540_v53  ;;  %v524_v2 = vadd.f32 %v523_v59, %v522_v47  ;;  %v576_v4 = vpop.xlane.xlu1 %575  ;;  %v500_v6 = vadd.f32 %v499_v62, %v498_v48 }
 0x14c   : > { %v559_v5 = vpop.xlane.xlu0 %558  ;;  %v553_v8 = vrot.slane %v552_v0, 2  ;;  %v577_v11 = vrot.slane %v576_v4, 4  ;;  %v535_v16 = vrot.slane %v534_v3, 1 }
 0x14d   : > { %v543_v10 = vrot.slane %v542_v1, 2  ;;  %v560_v14 = vrot.slane %v559_v5, 4  ;;  %1535 = vpush %v500_v6  ;;  %v525_v15 = vrot.slane %v524_v2, 1 }
 0x14e   : > { %v578_v20 = vadd.f32 %v577_v11, %v576_v4  ;;  %1537 = vpush %v509_v7  ;;  %v554_v29 = vadd.f32 %v553_v8, %v552_v0  ;;  %v536_v30 = vadd.f32 %v535_v16, %v534_v3 }
 0x14f   : > { %v561_v23 = vadd.f32 %v560_v14, %v559_v5  ;;  %v544_v27 = vadd.f32 %v543_v10, %v542_v1  ;;  %v596_v31 = vpop.xlane.xlu1 %595  ;;  %v526_v35 = vadd.f32 %v525_v15, %v524_v2 }
 0x150   : > { %v586_v34 = vpop.xlane.xlu0 %585  ;;  %v579_v33 = vrot.slane %v578_v20, 2  ;;  %v597_v43 = vrot.slane %v596_v31, 4  ;;  %v555_v47 = vrot.slane %v554_v29, 1 }
 0x151   : > { %v562_v38 = vrot.slane %v561_v23, 2  ;;  %v587_v44 = vrot.slane %v586_v34, 4  ;;  %1539 = vpush %v526_v35  ;;  %v545_v46 = vrot.slane %v544_v27, 1 }
 0x152   : > { %v598_v48 = vadd.f32 %v597_v43, %v596_v31  ;;  %1541 = vpush %v536_v30  ;;  %v580_v53 = vadd.f32 %v579_v33, %v578_v20  ;;  %v556_v59 = vadd.f32 %v555_v47, %v554_v29 }
 0x153   : > { %v588_v49 = vadd.f32 %v587_v44, %v586_v34  ;;  %v563_v51 = vadd.f32 %v562_v38, %v561_v23  ;;  %v615_v55 = vpop.xlane.xlu1 %614  ;;  %v546_v57 = vadd.f32 %v545_v46, %v544_v27 }
 0x154   : > { %v606_v56 = vpop.xlane.xlu0 %605  ;;  %v599_v60 = vrot.slane %v598_v48, 2  ;;  %v616_v62 = vrot.slane %v615_v55, 4  ;;  %v581_v2 = vrot.slane %v580_v53, 1 }
 0x155   : > { %v589_v61 = vrot.slane %v588_v49, 2  ;;  %v607_v63 = vrot.slane %v606_v56, 4  ;;  %1543 = vpush %v546_v57  ;;  %v564_v1 = vrot.slane %v563_v51, 1 }
 0x156   : > { %v617_v4 = vadd.f32 %v616_v62, %v615_v55  ;;  %1545 = vpush %v556_v59  ;;  %v600_v7 = vadd.f32 %v599_v60, %v598_v48  ;;  %v582_v14 = vadd.f32 %v581_v2, %v580_v53 }
 0x157   : > { %v608_v5 = vadd.f32 %v607_v63, %v606_v56  ;;  %v590_v6 = vadd.f32 %v589_v61, %v588_v49  ;;  %v642_v8 = vpop.xlane.xlu1 %641  ;;  %v565_v11 = vadd.f32 %v564_v1, %v563_v51 }
 0x158   : > { %v632_v10 = vpop.xlane.xlu0 %631  ;;  %v618_v15 = vrot.slane %v617_v4, 2  ;;  %v643_v20 = vrot.slane %v642_v8, 4  ;;  %v601_v29 = vrot.slane %v600_v7, 1 }
 0x159   : > { %v609_v16 = vrot.slane %v608_v5, 2  ;;  %v633_v23 = vrot.slane %v632_v10, 4  ;;  %1547 = vpush %v565_v11  ;;  %v591_v27 = vrot.slane %v590_v6, 1 }
 0x15a   : > { %v644_v31 = vadd.f32 %v643_v20, %v642_v8  ;;  %1549 = vpush %v582_v14  ;;  %v619_v30 = vadd.f32 %v618_v15, %v617_v4  ;;  %v602_v44 = vadd.f32 %v601_v29, %v600_v7 }
 0x15b   : > { %v634_v34 = vadd.f32 %v633_v23, %v632_v10  ;;  %v610_v35 = vadd.f32 %v609_v16, %v608_v5  ;;  %v662_v33 = vpop.xlane.xlu1 %661  ;;  %v592_v43 = vadd.f32 %v591_v27, %v590_v6 }
 0x15c   : > { %v652_v38 = vpop.xlane.xlu0 %651  ;;  %v645_v46 = vrot.slane %v644_v31, 2  ;;  %v663_v48 = vrot.slane %v662_v33, 4  ;;  %v620_v53 = vrot.slane %v619_v30, 1 }
 0x15d   : > { %v635_v47 = vrot.slane %v634_v34, 2  ;;  %v653_v49 = vrot.slane %v652_v38, 4  ;;  %1551 = vpush %v592_v43  ;;  %v611_v51 = vrot.slane %v610_v35, 1 }
 0x15e   : > { %v664_v55 = vadd.f32 %v663_v48, %v662_v33  ;;  %1553 = vpush %v602_v44  ;;  %v646_v59 = vadd.f32 %v645_v46, %v644_v31  ;;  %v621_v63 = vadd.f32 %v620_v53, %v619_v30 }
 0x15f   : > { %v654_v56 = vadd.f32 %v653_v49, %v652_v38  ;;  %v636_v57 = vadd.f32 %v635_v47, %v634_v34  ;;  %v688_v60 = vpop.xlane.xlu1 %687  ;;  %v612_v62 = vadd.f32 %v611_v51, %v610_v35 }
 0x160   : > { %v671_v61 = vpop.xlane.xlu0 %670  ;;  %v665_v1 = vrot.slane %v664_v55, 2  ;;  %v689_v4 = vrot.slane %v688_v60, 4  ;;  %v647_v7 = vrot.slane %v646_v59, 1 }
 0x161   : > { %v655_v2 = vrot.slane %v654_v56, 2  ;;  %v672_v5 = vrot.slane %v671_v61, 4  ;;  %1555 = vpush %v612_v62  ;;  %v637_v6 = vrot.slane %v636_v57, 1 }
 0x162   : > { %v690_v8 = vadd.f32 %v689_v4, %v688_v60  ;;  %1557 = vpush %v621_v63  ;;  %v666_v14 = vadd.f32 %v665_v1, %v664_v55  ;;  %v648_v23 = vadd.f32 %v647_v7, %v646_v59 }
 0x163   : > { %v673_v10 = vadd.f32 %v672_v5, %v671_v61  ;;  %v656_v11 = vadd.f32 %v655_v2, %v654_v56  ;;  %v708_v15 = vpop.xlane.xlu1 %707  ;;  %v638_v20 = vadd.f32 %v637_v6, %v636_v57 }
 0x164   : > { %v698_v16 = vpop.xlane.xlu0 %697  ;;  %v691_v27 = vrot.slane %v690_v8, 2  ;;  %v667_v34 = vrot.slane %v666_v14, 1  ;;  %v709_v35 = vrot.slane %v708_v15, 4 }
 0x165   : > { %v674_v29 = vrot.slane %v673_v10, 2  ;;  %1559 = vpush %v638_v20  ;;  %v657_v31 = vrot.slane %v656_v11, 1  ;;  %v699_v30 = vrot.slane %v698_v16, 4 }
 0x166   : > { %1561 = vpush %v648_v23  ;;  %s2418_s18 = spop %1499  ;;  %v668_v44 = vadd.f32 %v667_v34, %v666_v14  ;;  %v692_v47 = vadd.f32 %v691_v27, %v690_v8  ;;  %v710_v48 = vadd.f32 %v709_v35, %v708_v15 }
 0x167   : > { %s2420_s24 = spop %1501  ;;  %v727_v33 = vpop.xlane.xlu1 %726  ;;  %v658_v43 = vadd.f32 %v657_v31, %v656_v11  ;;  %v675_v46 = vadd.f32 %v674_v29, %v673_v10  ;;  %v700_v49 = vadd.f32 %v699_v30, %v698_v16 }
 0x168   : > { %v718_v38 = vpop.xlane.xlu0 %717  ;;  %s2422_s19 = spop %1503  ;;  %v728_v53 = vrot.slane %v727_v33, 4  ;;  %v693_v63 = vrot.slane %v692_v47, 1  ;;  %v711_v19 = vrot.slane %v710_v48, 2 }
 0x169   : > { %s1506_s5 = spop %1505  ;;  %1563 = vpush %v658_v43  ;;  %v719_v57 = vrot.slane %v718_v38, 4  ;;  %v676_v61 = vrot.slane %v675_v46, 1  ;;  %v701_v2 = vrot.slane %v700_v49, 2 }
 0x16a   : > { %v1193_v51 = vstv %s1506_s5  ;;  %s1508_s30 = spop %1507  ;;  %1565 = vpush %v668_v44  ;;  %v729_v4 = vadd.f32 %v728_v53, %v727_v33  ;;  %v694_v15 = vadd.f32 %v693_v63, %v692_v47  ;;  %v712_v34 = vadd.f32 %v711_v19, %v710_v48 }
 0x16b   : > { %v2426_v55 = vsel %vm2207_vm0, %v1193_v51, 0.0  ;;  %v1246_v56 = vstv %s1508_s30  ;;  %s2428_s22 = spop %1509  ;;  %v754_v59 = vpop.xlane.xlu1 %753  ;;  %v720_v5 = vadd.f32 %v719_v57, %v718_v38  ;;  %v677_v7 = vadd.f32 %v676_v61, %v675_v46 }
 0x16c   : > { %v744_v60 = vpop.xlane.xlu0 %743  ;;  %v2432_v62 = vsel %vm2215_vm1, %v1246_v56, 0.0  ;;  %s2434_s29 = spop %1511  ;;  %v755_v14 = vrot.slane %v754_v59, 4  ;;  %v702_v29 = vadd.f32 %v701_v2, %v700_v49  ;;  %v730_v26 = vrot.slane %v729_v4, 2 }
 0x16d   : > { %s2436_s6 = spop %1513  ;;  %v745_v1 = vrot.slane %v744_v60, 4  ;;  %1567 = vpush %v677_v7  ;;  %v721_v31 = vrot.slane %v720_v5, 2  ;;  %v713_v44 = vrot.slane %v712_v34, 1  ;;  %vm2982_vm0 = vnez %v2950_v25 }
 0x16e   : > { %s1516_s7 = spop %1515  ;;  %1569 = vpush %v694_v15  ;;  %v756_v33 = vadd.f32 %v755_v14, %v754_v59  ;;  %v703_v28 = vrot.slane %v702_v29, 1  ;;  %v731_v48 = vadd.f32 %v730_v26, %v729_v4  ;;  %vm2983_vm1 = vnez %v2954_v54 }
 0x16f   : > { %v1197_v6 = vstv %s1516_s7  ;;  %s1518_s20 = spop %1517  ;;  %v774_v8 = vpop.xlane.xlu1 %773  ;;  %v746_v20 = vadd.f32 %v745_v1, %v744_v60  ;;  %v714_v56 = vadd.f32 %v713_v44, %v712_v34  ;;  %v722_v57 = vadd.f32 %v721_v31, %v720_v5 }
 0x170   : > { %v764_v10 = vpop.xlane.xlu0 %763  ;;  %v2440_v18 = vsel %vm2226_vm3, %v1197_v6, 0.0  ;;  %v1250_v11 = vstv %s1518_s20  ;;  %s2442_s1 = spop %1519  ;;  %v775_v23 = vrot.slane %v774_v8, 4  ;;  %v704_v49 = vadd.f32 %v703_v28, %v702_v29 }
 0x171   : > { %v2446_v16 = vsel %vm2235_vm4, %v1250_v11, 0.0  ;;  %s2448_s28 = spop %1521  ;;  %v765_v27 = vrot.slane %v764_v10, 4  ;;  %v747_v43 = vrot.slane %v746_v20, 2  ;;  %v757_v59 = vrot.slane %v756_v33, 2 }
 0x172   : > { %s2450_s23 = spop %1523  ;;  %v776_v47 = vadd.f32 %v775_v23, %v774_v8  ;;  %1571 = vpush %v704_v49  ;;  %v723_v2 = vrot.slane %v722_v57, 1  ;;  %v732_v6 = vrot.slane %v731_v48, 1  ;;  %vm2984_vm3 = vnez %v2956_v58 }
 0x173   : > { %s1526_s8 = spop %1525  ;;  %v800_v35 = vpop.xlane.xlu1 %799  ;;  %v766_v51 = vadd.f32 %v765_v27, %v764_v10  ;;  %1573 = vpush %v714_v56  ;;  %v748_v14 = vadd.f32 %v747_v43, %v746_v20  ;;  %v758_v27 = vadd.f32 %v757_v59, %v756_v33  ;;  %vm2985_vm4 = vnez %v2958_v37 }
 0x174   : > { %v783_v30 = vpop.xlane.xlu0 %782  ;;  %v1201_v38 = vstv %s1526_s8  ;;  %v801_v1 = vrot.slane %v800_v35, 4  ;;  %v777_v7 = vrot.slane %v776_v47, 2  ;;  %v724_v10 = vadd.f32 %v723_v2, %v722_v57 }
 0x175   : > { %v2454_v46 = vsel %vm2247_vm6, %v1201_v38, 0.0  ;;  %v784_v53 = vrot.slane %v783_v30, 4  ;;  %v767_v4 = vrot.slane %v766_v51, 2  ;;  %v733_v11 = vadd.f32 %v732_v6, %v731_v48 }
 0x176   : > { %s1528_s14 = spop %1527  ;;  %v802_v21 = vadd.f32 %v801_v1, %v800_v35  ;;  %1575 = vpush %v724_v10  ;;  %v749_v26 = vrot.slane %v748_v14, 1  ;;  %v778_v20 = vadd.f32 %v777_v7, %v776_v47  ;;  %vm2986_vm6 = vnez %v2961_v52 }
 0x177   : > { %v1254_v60 = vstv %s1528_s14  ;;  %v820_v61 = vpop.xlane.xlu1 %819  ;;  %v785_v32 = vadd.f32 %v784_v53, %v783_v30  ;;  %s2460_s17 = spop %1529  ;;  %1577 = vpush %v733_v11  ;;  %v759_v30 = vrot.slane %v758_v27, 1  ;;  %v768_v44 = vadd.f32 %v767_v4, %v766_v51 }
 0x178   : > { %v810_v63 = vpop.xlane.xlu0 %809  ;;  %v2458_v19 = vsel %vm2255_vm7, %v1254_v60, 0.0  ;;  %v821_v8 = vrot.slane %v820_v61, 4  ;;  %v750_v38 = vadd.f32 %v749_v26, %v748_v14  ;;  %v803_v35 = vrot.slane %v802_v21, 2 }
 0x179   : > { %v811_v5 = vrot.slane %v810_v63, 4  ;;  %v786_v29 = vrot.slane %v785_v32, 2  ;;  %v760_v33 = vadd.f32 %v759_v30, %v758_v27  ;;  %v769_v48 = vrot.slane %v768_v44, 1 }
 0x17a   : > { %s2462_s26 = spop %1531  ;;  %v822_v31 = vadd.f32 %v821_v8, %v820_v61  ;;  %1579 = vpush %v750_v38  ;;  %v779_v60 = vrot.slane %v778_v20, 1  ;;  %v804_v10 = vadd.f32 %v803_v35, %v802_v21  ;;  %vm1019_vm7 = vcmp.eq.s32.totalorder %v2192_v12, 0 }
 0x17b   : > { %v839_v15 = vpop.xlane.xlu1 %838  ;;  %s2464_s27 = spop %1533  ;;  %v812_v34 = vadd.f32 %v811_v5, %v810_v63  ;;  %1581 = vpush %v760_v33  ;;  %v770_v2 = vadd.f32 %v769_v48, %v768_v44  ;;  %v787_v7 = vadd.f32 %v786_v29, %v785_v32  ;;  %v1037_v50 = vstv %s2460_s17 }
 0x17c   : > { %v830_v23 = vpop.xlane.xlu0 %829  ;;  %v840_v56 = vrot.slane %v839_v15, 4  ;;  %v823_v59 = vrot.slane %v822_v31, 2  ;;  %v780_v6 = vadd.f32 %v779_v60, %v778_v20  ;;  %v805_v22 = vrot.slane %v804_v10, 1 }
 0x17d   : > { %v831_v28 = vrot.slane %v830_v23, 4  ;;  %v813_v1 = vrot.slane %v812_v34, 2  ;;  %1583 = vpush %v770_v2  ;;  %v788_v14 = vrot.slane %v787_v7, 1  ;;  %v1091_v0 = vstv %s2434_s29  ;;  %s1491_s29 = sshll.u32 %s1872_s15, 7 }
 0x17e   : > { %s1536_s4 = spop %1535  ;;  %v841_v5 = vadd.f32 %v840_v56, %v839_v15  ;;  %1585 = vpush %v780_v6  ;;  %v824_v30 = vadd.f32 %v823_v59, %v822_v31  ;;  %v806_v44 = vadd.f32 %v805_v22, %v804_v10  ;;  %v1095_v3 = vstv %s2448_s28 }
 0x17f   : > { %v1205_v43 = vstv %s1536_s4  ;;  %s1538_s11 = spop %1537  ;;  %v866_v49 = vpop.xlane.xlu1 %865  ;;  %v832_v51 = vadd.f32 %v831_v28, %v830_v23  ;;  %v789_v26 = vadd.f32 %v788_v14, %v787_v7  ;;  %v814_v29 = vadd.f32 %v813_v1, %v812_v34 }
 0x180   : > { %v856_v53 = vpop.xlane.xlu0 %855  ;;  %v2468_v57 = vsel %vm2269_vm9, %v1205_v43, 0.0  ;;  %v1258_v61 = vstv %s1538_s11  ;;  %v867_v63 = vrot.slane %v866_v49, 4  ;;  %v842_v38 = vrot.slane %v841_v5, 2 }
 0x181   : > { %v2472_v47 = vsel %vm2277_vm10, %v1258_v61, 0.0  ;;  %v857_v4 = vrot.slane %v856_v53, 4  ;;  %v833_v23 = vrot.slane %v832_v51, 2  ;;  %1587 = vpush %v789_v26  ;;  %v825_v35 = vrot.slane %v824_v30, 1 }
 0x182   : > { %s2474_s21 = spop %1539  ;;  %v868_v11 = vadd.f32 %v867_v63, %v866_v49  ;;  %v815_v49 = vrot.slane %v814_v29, 1  ;;  %1589 = vpush %v806_v44  ;;  %v843_v6 = vadd.f32 %v842_v38, %v841_v5  ;;  %vm2988_vm9 = vcmp.eq.s32.totalorder %v2194_v13, 0 }
 0x183   : > { %v886_v40 = vpop.xlane.xlu1 %885  ;;  %s2476_s10 = spop %1541  ;;  %v858_v21 = vadd.f32 %v857_v4, %v856_v53  ;;  %v826_v61 = vadd.f32 %v825_v35, %v824_v30  ;;  %v834_v63 = vadd.f32 %v833_v23, %v832_v51  ;;  %vm1021_vm10 = vmand %vm1019_vm7, %vm2988_vm9  ;;  %vm2994_vm9 = vcmp.eq.s32.totalorder %v2194_v13, 5 }
 0x184   : > { %v876_v8 = vpop.xlane.xlu0 %875  ;;  %v887_v27 = vrot.slane %v886_v40, 4  ;;  %v869_v43 = vrot.slane %v868_v11, 2  ;;  %v816_v60 = vadd.f32 %v815_v49, %v814_v29 }
 0x185   : > { %v877_v32 = vrot.slane %v876_v8, 4  ;;  %v859_v1 = vrot.slane %v858_v21, 2 }
 0x186   : > { %s2478_s5 = spop %1543  ;;  %v888_v33 = vadd.f32 %v887_v27, %v886_v40  ;;  %1591 = vpush %v816_v60  ;;  %v835_v40 = vrot.slane %v834_v63, 1  ;;  %v870_v30 = vadd.f32 %v869_v43, %v868_v11 }
 0x187   : > { %s1546_s30 = spop %1545  ;;  %v912_v28 = vpop.xlane.xlu1 %911  ;;  %v878_v31 = vadd.f32 %v877_v32, %v876_v8  ;;  %1593 = vpush %v826_v61  ;;  %v844_v8 = vrot.slane %v843_v6, 1  ;;  %v860_v29 = vadd.f32 %v859_v1, %v858_v21 }
 0x188   : > { %v895_v15 = vpop.xlane.xlu0 %894  ;;  %v1209_v20 = vstv %s1546_s30  ;;  %v913_v48 = vrot.slane %v912_v28, 4  ;;  %v889_v14 = vrot.slane %v888_v33, 2  ;;  %v836_v23 = vadd.f32 %v835_v40, %v834_v63 }
 0x189   : > { %v2482_v56 = vsel %vm2287_vm12, %v1209_v20, 0.0  ;;  %v896_v34 = vrot.slane %v895_v15, 4  ;;  %v879_v51 = vrot.slane %v878_v31, 2  ;;  %v845_v32 = vadd.f32 %v844_v8, %v843_v6 }
 0x18a   : > { %s1548_s7 = spop %1547  ;;  %v914_v2 = vadd.f32 %v913_v48, %v912_v28  ;;  %1595 = vpush %v836_v23  ;;  %v861_v44 = vrot.slane %v860_v29, 1  ;;  %v871_v20 = vrot.slane %v870_v30, 1  ;;  %v890_v60 = vadd.f32 %v889_v14, %v888_v33 }
 0x18b   : > { %v932_v53 = vpop.xlane.xlu1 %931  ;;  %v1262_v7 = vstv %s1548_s7  ;;  %v897_v4 = vadd.f32 %v896_v34, %v895_v15  ;;  %s2488_s20 = spop %1549  ;;  %1597 = vpush %v845_v32  ;;  %v880_v34 = vadd.f32 %v879_v51, %v878_v31 }
 0x18c   : > { %v922_v59 = vpop.xlane.xlu0 %921  ;;  %v2486_v41 = vsel %vm2295_vm8, %v1262_v7, 0.0  ;;  %v933_v10 = vrot.slane %v932_v53, 4  ;;  %v915_v42 = vrot.slane %v914_v2, 2  ;;  %v862_v21 = vadd.f32 %v861_v44, %v860_v29 }
 0x18d   : > { %v923_v27 = vrot.slane %v922_v59, 4  ;;  %v898_v28 = vrot.slane %v897_v4, 2  ;;  %v872_v11 = vadd.f32 %v871_v20, %v870_v30  ;;  %v891_v1 = vrot.slane %v890_v60, 1 }
 0x18e   : > { %v934_v22 = vadd.f32 %v933_v10, %v932_v53  ;;  %s2490_s8 = spop %1551  ;;  %1599 = vpush %v862_v21  ;;  %vm2987_vm8 = vnez %v2963_v36 }
 0x18f   : > { %v951_v5 = vpop.xlane.xlu1 %950  ;;  %v924_v15 = vadd.f32 %v923_v27, %v922_v59  ;;  %s2492_s14 = spop %1553  ;;  %v881_v59 = vrot.slane %v880_v34, 1  ;;  %v899_v10 = vadd.f32 %v898_v28, %v897_v4  ;;  %1601 = vpush %v872_v11  ;;  %v892_v33 = vadd.f32 %v891_v1, %v890_v60 }
 0x190   : > { %v942_v26 = vpop.xlane.xlu0 %941  ;;  %v935_v38 = vrot.slane %v934_v22, 2  ;;  %v952_v49 = vrot.slane %v951_v5, 4  ;;  %v916_v27 = vadd.f32 %v915_v42, %v914_v2 }
 0x191   : > { %v925_v35 = vrot.slane %v924_v15, 2  ;;  %v943_v48 = vrot.slane %v942_v26, 4  ;;  %v882_v31 = vadd.f32 %v881_v59, %v880_v34  ;;  %v900_v23 = vrot.slane %v899_v10, 1 }
 0x192   : > { %s1556_s4 = spop %1555  ;;  %v953_v43 = vadd.f32 %v952_v49, %v951_v5  ;;  %v936_v32 = vadd.f32 %v935_v38, %v934_v22  ;;  %v917_v45 = vrot.slane %v916_v27, 1 }
 0x193   : > { %s1558_s11 = spop %1557  ;;  %v1213_v63 = vstv %s1556_s4  ;;  %v944_v53 = vadd.f32 %v943_v48, %v942_v26  ;;  %v978_v25 = vpop.xlane.xlu1 %977  ;;  %1603 = vpush %v882_v31  ;;  %v926_v4 = vadd.f32 %v925_v35, %v924_v15  ;;  %v901_v30 = vadd.f32 %v900_v23, %v899_v10 }
 0x194   : > { %v968_v61 = vpop.xlane.xlu0 %967  ;;  %v2496_v6 = vsel %vm2982_vm0, %v1213_v63, 0.0  ;;  %v1266_v7 = vstv %s1558_s11  ;;  %v954_v26 = vrot.slane %v953_v43, 2  ;;  %1605 = vpush %v892_v33  ;;  %v937_v44 = vrot.slane %v936_v32, 1 }
 0x195   : > { %v969_v40 = vrot.slane %v968_v61, 4  ;;  %v2500_v14 = vsel %vm2312_vm11, %v1266_v7, 0.0  ;;  %v945_v8 = vrot.slane %v944_v53, 2  ;;  %v927_v28 = vrot.slane %v926_v4, 1  ;;  %1607 = vpush %v901_v30 }
 0x196   : > { %s2502_s30 = spop %1559  ;;  %v918_v20 = vadd.f32 %v917_v45, %v916_v27  ;;  %v938_v60 = vadd.f32 %v937_v44, %v936_v32  ;;  %v955_v15 = vadd.f32 %v954_v26, %v953_v43  ;;  %vm2989_vm11 = vcmp.eq.s32.totalorder %v2194_v13, 1 }
 0x197   : > { %v970_v51 = vadd.f32 %v969_v40, %v968_v61  ;;  %s2504_s7 = spop %1561  ;;  %v946_v42 = vadd.f32 %v945_v8, %v944_v53  ;;  %v998_v49 = vpop.xlane.xlu1 %997  ;;  %v928_v34 = vadd.f32 %v927_v28, %v926_v4  ;;  %v979_v61 = vrot.slane %v978_v25, 4  ;;  %vm1026_vm12 = vmand %vm1019_vm7, %vm2989_vm11 }
 0x198   : > { %v988_v5 = vpop.xlane.xlu0 %987  ;;  %1609 = vpush %v918_v20  ;;  %v956_v11 = vrot.slane %v955_v15, 1  ;;  %v999_v63 = vrot.slane %v998_v49, 4  ;;  %vm2991_vm0 = vcmp.eq.s32.totalorder %v2194_v13, 2  ;;  %vm2995_vm11 = vnez %v2968_v24 }
 0x199   : > { %v971_v29 = vrot.slane %v970_v51, 2  ;;  %v947_v38 = vrot.slane %v946_v42, 1  ;;  %v989_v21 = vrot.slane %v988_v5, 4  ;;  %1611 = vpush %v928_v34  ;;  %v980_v7 = vadd.f32 %v979_v61, %v978_v25 }
 0x19a   : > { %s2506_s4 = spop %1563  ;;  %1613 = vpush %v938_v60  ;;  %v957_v10 = vadd.f32 %v956_v11, %v955_v15  ;;  %v1000_v31 = vadd.f32 %v999_v63, %v998_v49  ;;  %v1022_v15 = vstv %s2418_s18 }
 0x19b   : > { %s1566_s11 = spop %1565  ;;  %v972_v35 = vadd.f32 %v971_v29, %v970_v51  ;;  %v948_v53 = vadd.f32 %v947_v38, %v946_v42  ;;  %v990_v40 = vadd.f32 %v989_v21, %v988_v5  ;;  %v981_v33 = vrot.slane %v980_v7, 2 }
 0x19c   : > { %v1217_v2 = vstv %s1566_s11  ;;  %v1007_v48 = vpop.xlane.xlu0 %1006  ;;  %v1001_v23 = vrot.slane %v1000_v31, 2  ;;  %v1027_v38 = vstv %s2428_s22  ;;  %v1023_v61 = vsel %vm1021_vm10, %v1022_v15, 0.0  ;;  %vm1046_vm10 = vmand %vm1019_vm7, %vm2994_vm9 }
 0x19d   : > { %v2510_v22 = vsel %vm2983_vm1, %v1217_v2, 0.0  ;;  %v1008_v59 = vrot.slane %v1007_v48, 4  ;;  %v973_v1 = vrot.slane %v972_v35, 1  ;;  %1615 = vpush %v948_v53  ;;  %v991_v8 = vrot.slane %v990_v40, 2  ;;  %vm1031_vm1 = vmand %vm1019_vm7, %vm2991_vm0 }
 0x19e   : > { %s1568_s11 = spop %1567  ;;  %1617 = vpush %v957_v10  ;;  %v982_v4 = vadd.f32 %v981_v33, %v980_v7  ;;  %v1002_v5 = vadd.f32 %v1001_v23, %v1000_v31  ;;  %v1028_v21 = vsel %vm1026_vm12, %v1027_v38, 0.0  ;;  %vm2996_vm12 = vnez %v2971_v39 }
 0x19f   : > { %v1009_v54 = vadd.f32 %v1008_v59, %v1007_v48  ;;  %v974_v43 = vadd.f32 %v973_v1, %v972_v35  ;;  %v1270_v51 = vstv %s1568_s11  ;;  %v992_v25 = vadd.f32 %v991_v8, %v990_v40  ;;  %s2516_s11 = spop %1569 }
 0x1a0   : > { %v2514_v26 = vsel %vm2984_vm3, %v1270_v51, 0.0  ;;  %v983_v29 = vrot.slane %v982_v4, 1  ;;  %v1003_v45 = vrot.slane %v1002_v5, 1  ;;  %v1032_v35 = vstv %s2442_s1 }
 0x1a1   : > { %v1010_v27 = vrot.slane %v1009_v54, 2  ;;  %1619 = vpush %v974_v43  ;;  %v993_v30 = vrot.slane %v992_v25, 1  ;;  %vm2992_vm3 = vcmp.eq.s32.totalorder %v2194_v13, 3  ;;  %v1033_v11 = vsel %vm1031_vm1, %v1032_v35, 0.0 }
 0x1a2   : > { %v984_v44 = vadd.f32 %v983_v29, %v982_v4  ;;  %v1004_v2 = vadd.f32 %v1003_v45, %v1002_v5  ;;  %v1029_v63 = vadd.f32 %v1028_v21, %v1023_v61  ;;  %v1042_v59 = vstv %s2474_s21 }
 0x1a3   : > { %v1011_v32 = vadd.f32 %v1010_v27, %v1009_v54  ;;  %v994_v20 = vadd.f32 %v993_v30, %v992_v25  ;;  %s2518_s9 = spop %1571  ;;  %v1047_v40 = vstv %s2488_s20  ;;  %v1052_v8 = vstv %s2502_s30 }
 0x1a4   : > { %1621 = vpush %v984_v44  ;;  %s2520_s2 = spop %1573  ;;  %v1034_v7 = vadd.f32 %v1033_v11, %v1029_v63  ;;  %v1048_v51 = vsel %vm1046_vm10, %v1047_v40, 0.0  ;;  %vm2998_vm1 = vcmp.eq.s32.totalorder %v2194_v13, 7  ;;  %v1057_v23 = vstv %s2516_s11 }
 0x1a5   : > { %v1012_v28 = vrot.slane %v1011_v32, 1  ;;  %1623 = vpush %v994_v20  ;;  %vm3001_vm10 = vnez %v2973_v9  ;;  %v1087_v61 = vstv %s2420_s24  ;;  %v1099_v40 = vstv %s2462_s26 }
 0x1a6   : > { %1625 = vpush %v1004_v2 }
 0x1a7   : > { %v1013_v42 = vadd.f32 %v1012_v28, %v1011_v32  ;;  %s1576_s16 = spop %1575 }
 0x1a8   : > { %v1221_v58 = vstv %s1576_s16  ;;  %s1578_s13 = spop %1577 }
 0x1a9   : > { %1627 = vpush %v1013_v42  ;;  %v2524_v49 = vsel %vm2985_vm4, %v1221_v58, 0.0  ;;  %v1274_v48 = vstv %s1578_s13  ;;  %vm1036_vm4 = vmand %vm1019_vm7, %vm2992_vm3 }
 0x1aa   : > { %v2528_v34 = vsel %vm2986_vm6, %v1274_v48, 0.0  ;;  %vm2993_vm6 = vcmp.eq.s32.totalorder %v2194_v13, 4  ;;  %v1038_v53 = vsel %vm1036_vm4, %v1037_v50, 0.0  ;;  %vm1056_vm3 = vmand %vm1019_vm7, %vm2998_vm1  ;;  %vm2999_vm4 = vcmp.eq.s32.totalorder %v2194_v13, 8 }
 0x1ab   : > { %s2530_s12 = spop %1579  ;;  %v1039_v33 = vadd.f32 %v1038_v53, %v1034_v7  ;;  %v1058_v25 = vsel %vm1056_vm3, %v1057_v23, 0.0  ;;  %vm1080_vm1 = vcmp.eq.s32.totalorder %v2194_v13, 12  ;;  %vm1085_vm3 = vcmp.eq.s32.totalorder %v2192_v12, 1 }
 0x1ac   : > { %s2532_s3 = spop %1581  ;;  %v1062_v4 = vstv %s2530_s12 }
 0x1ae   : > { %s2534_s25 = spop %1583 }
 0x1af   : > { %s1586_s0 = spop %1585 }
 0x1b0   : > { %v1225_v60 = vstv %s1586_s0 }
 0x1b1   : > { %v2539_v37 = vsel %vm2987_vm8, %v1225_v60, 0.0  ;;  %vm1041_vm8 = vmand %vm1019_vm7, %vm2993_vm6 }
 0x1b2   : > { %s1588_s13 = spop %1587  ;;  %v1043_v54 = vsel %vm1041_vm8, %v1042_v59, 0.0  ;;  %vm1061_vm6 = vmand %vm1019_vm7, %vm2999_vm4  ;;  %vm3000_vm8 = vcmp.eq.s32.totalorder %v2194_v13, 9 }
 0x1b3   : > { %v1278_v52 = vstv %s1588_s13  ;;  %s2560_s16 = spop %1589  ;;  %v1044_v24 = vadd.f32 %v1043_v54, %v1039_v33  ;;  %vm1066_vm9 = vmand %vm1019_vm7, %vm3000_vm8  ;;  %v1063_v30 = vsel %vm1061_vm6, %v1062_v4, 0.0  ;;  %vm3004_vm6 = vcmp.eq.s32.totalorder %v2194_v13, 0 }
 0x1b4   : > { %v2553_v36 = vsel %vm2990_vm5, %v1278_v52, 0.0  ;;  %vm2997_vm5 = vcmp.eq.s32.totalorder %v2194_v13, 6  ;;  %v1067_v32 = vstv %s2560_s16  ;;  %vm1081_vm4 = vmand %vm1019_vm7, %vm1080_vm1  ;;  %v1103_v33 = vstv %s2476_s10  ;;  %s3030_s10 = sld [smem:[#allocation25_spill]] }
 0x1b5   : > { %vm1051_vm0 = vmand %vm1019_vm7, %vm2997_vm5  ;;  %v1049_v27 = vadd.f32 %v1048_v51, %v1044_v24  ;;  %v1068_v2 = vsel %vm1066_vm9, %v1067_v32, 0.0  ;;  %vm3003_vm5 = vnez %v2976_v17  ;;  %vm3006_vm9 = vcmp.eq.s32.totalorder %v2194_v13, 2 }
 0x1b6   : > { %v1053_v39 = vsel %vm1051_vm0, %v1052_v8, 0.0  ;;  %vm1076_vm0 = vmand %vm1019_vm7, %vm1075_vm13  ;;  %v1107_v24 = vstv %s2490_s8 }
 0x1b7   : > { %s2562_s0 = spop %1591  ;;  %v1054_v5 = vadd.f32 %v1053_v39, %v1049_v27  ;;  %vm1086_vm8 = vmand %vm1085_vm3, %vm3004_vm6  ;;  %vm3010_vm6 = vcmp.eq.s32.totalorder %v2194_v13, 6  ;;  %v1111_v27 = vstv %s2504_s7 }
 0x1b8   : > { %s2569_s18 = spop %1593  ;;  %v1088_v53 = vsel %vm1086_vm8, %v1087_v61, 0.0  ;;  %vm1110_vm8 = vmand %vm1085_vm3, %vm3010_vm6 }
 0x1b9   : > { %v1059_v28 = vadd.f32 %v1058_v25, %v1054_v5  ;;  %v1115_v5 = vstv %s2518_s9  ;;  %vm1134_vm6 = vmand %vm1085_vm3, %vm1080_vm1  ;;  %s3026_s9 = sld [smem:[#allocation21_spill]] }
 0x1bb   : > { %s1596_s22 = spop %1595  ;;  %v1064_v58 = vadd.f32 %v1063_v30, %v1059_v28  ;;  %v1119_v30 = vstv %s2532_s3 }
 0x1bc   : > { %v1229_v1 = vstv %s1596_s22  ;;  %s1598_s1 = spop %1597 }
 0x1bd   : > { %v2583_v10 = vsel %vm2995_vm11, %v1229_v1, 0.0  ;;  %v1282_v31 = vstv %s1598_s1  ;;  %vm3002_vm11 = vcmp.eq.s32.totalorder %v2194_v13, 10  ;;  %v1069_v60 = vadd.f32 %v1068_v2, %v1064_v58 }
 0x1be   : > { %v2587_v43 = vsel %vm2996_vm12, %v1282_v31, 0.0  ;;  %vm1071_vm12 = vmand %vm1019_vm7, %vm3002_vm11 }
 0x1bf   : > { %s1600_s17 = spop %1599  ;;  %s1299_s8 = scalar_lea.sflag [#allocation4], %s3026_s9 }
 0x1c0   : > { %s2599_s21 = spop %1601  ;;  %v1072_v44 = vstv %s1600_s17 }
 0x1c1   : > { %v1073_v48 = vsel %vm1071_vm12, %v1072_v44, 0.0  ;;  %vm3008_vm12 = vcmp.eq.s32.totalorder %v2194_v13, 4 }
 0x1c2   : > { %v1074_v52 = vadd.f32 %v1073_v48, %v1069_v60 }
 0x1c4   : > { %s2606_s20 = spop %1603 }
 0x1c5   : > { %s1606_s30 = spop %1605 }
 0x1c6   : > { %v1233_v29 = vstv %s1606_s30  ;;  %s1608_s11 = spop %1607 }
 0x1c7   : > { %v2615_v45 = vsel %vm3001_vm10, %v1233_v29, 0.0  ;;  %v1286_v20 = vstv %s1608_s11  ;;  %vm1094_vm10 = vmand %vm1085_vm3, %vm3006_vm9  ;;  %v1112_v29 = vsel %vm1110_vm8, %v1111_v27, 0.0  ;;  %vm3012_vm9 = vcmp.eq.s32.totalorder %v2194_v13, 8 }
 0x1c8   : > { %v2623_v42 = vsel %vm3003_vm5, %v1286_v20, 0.0  ;;  %v1096_v54 = vsel %vm1094_vm10, %v1095_v3, 0.0  ;;  %vm1102_vm5 = vmand %vm1085_vm3, %vm3008_vm12  ;;  %v1123_v20 = vstv %s2562_s0  ;;  %vm3014_vm12 = vcmp.eq.s32.totalorder %v2194_v13, 10 }
 0x1c9   : > { %s1610_s12 = spop %1609  ;;  %v1104_v39 = vsel %vm1102_vm5, %v1103_v33, 0.0  ;;  %vm1118_vm10 = vmand %vm1085_vm3, %vm3012_vm9  ;;  %vm3015_vm8 = vcmp.eq.s32.totalorder %v2194_v13, 0 }
 0x1ca   : > { %v1077_v9 = vstv %s1610_s12  ;;  %s2629_s13 = spop %1611  ;;  %v1120_v58 = vsel %vm1118_vm10, %v1119_v30, 0.0  ;;  %vm1126_vm5 = vmand %vm1085_vm3, %vm3014_vm12  ;;  %vm3019_vm12 = vcmp.eq.s32.totalorder %v2194_v13, 4 }
 0x1cb   : > { %s2632_s16 = spop %1613  ;;  %v1078_v17 = vsel %vm1076_vm0, %v1077_v9, 0.0  ;;  %vm3009_vm0 = vcmp.eq.s32.totalorder %v2194_v13, 5  ;;  %v1127_v9 = vstv %s2599_s21 }
 0x1cc   : > { %v1079_v21 = vadd.f32 %v1078_v17, %v1074_v52  ;;  %v1131_v17 = vstv %s2629_s13 }
 0x1ce   : > { %s1616_s22 = spop %1615 }
 0x1cf   : > { %v1237_v15 = vstv %s1616_s22  ;;  %s1618_s1 = spop %1617 }
 0x1d0   : > { %v2641_v38 = vsel %vm2406_vm15, %v1237_v15, 0.0  ;;  %v1290_v35 = vstv %s1618_s1  ;;  %vm3005_vm15 = vcmp.eq.s32.totalorder %v2194_v13, 1  ;;  %v1128_v15 = vsel %vm1126_vm5, %v1127_v9, 0.0 }
 0x1d1   : > { %v2650_v50 = vsel %vm2414_vm2, %v1290_v35, 0.0  ;;  %vm1090_vm7 = vmand %vm1085_vm3, %vm3005_vm15  ;;  %vm3007_vm2 = vcmp.eq.s32.totalorder %v2194_v13, 3  ;;  %vm3011_vm15 = vcmp.eq.s32.totalorder %v2194_v13, 7 }
 0x1d2   : > { %s1620_s17 = spop %1619  ;;  %v1092_v7 = vsel %vm1090_vm7, %v1091_v0, 0.0  ;;  %vm1098_vm11 = vmand %vm1085_vm3, %vm3007_vm2  ;;  %vm3013_vm2 = vcmp.eq.s32.totalorder %v2194_v13, 9 }
 0x1d3   : > { %v1082_v11 = vstv %s1620_s17  ;;  %v1100_v51 = vsel %vm1098_vm11, %v1099_v40, 0.0  ;;  %vm1114_vm7 = vmand %vm1085_vm3, %vm3011_vm15 }
 0x1d4   : > { %v1083_v63 = vsel %vm1081_vm4, %v1082_v11, 0.0  ;;  %vm1106_vm4 = vmand %vm1085_vm3, %vm3009_vm0  ;;  %v1116_v44 = vsel %vm1114_vm7, %v1115_v5, 0.0  ;;  %v1140_v11 = vstv %s2422_s19  ;;  %vm3016_vm7 = vcmp.eq.s32.totalorder %v2194_v13, 1  ;;  %s3027_s19 = sld [smem:[#allocation18_spill]] }
 0x1d5   : > { %v1084_v59 = vadd.f32 %v1083_v63, %v1079_v21  ;;  %v1108_v25 = vsel %vm1106_vm4, %v1107_v24, 0.0  ;;  %vm1122_vm11 = vmand %vm1085_vm3, %vm3013_vm2  ;;  %s1622_s3 = spop %1621  ;;  %vm1138_vm4 = vcmp.eq.s32.totalorder %v2192_v12, 2  ;;  %vm3018_vm2 = vcmp.eq.s32.totalorder %v2194_v13, 3 }
 0x1d6   : > { %v1124_v60 = vsel %vm1122_vm11, %v1123_v20, 0.0  ;;  %vm1130_vm0 = vmand %vm1085_vm3, %vm1075_vm13  ;;  %v1135_v61 = vstv %s1622_s3  ;;  %vm3017_vm3 = vcmp.eq.s32.totalorder %v2194_v13, 2 }
 0x1d7   : > { %v1089_v1 = vadd.f32 %v1088_v53, %v1084_v59  ;;  %v1132_v21 = vsel %vm1130_vm0, %v1131_v17, 0.0  ;;  %vm1139_vm15 = vmand %vm1138_vm4, %vm3015_vm8  ;;  %v1136_v0 = vsel %vm1134_vm6, %v1135_v61, 0.0  ;;  %v1144_v59 = vstv %s2436_s6  ;;  %s3029_s6 = sshll.u32 %s3026_s9, 3 }
 0x1d8   : > { %vm1143_vm9 = vmand %vm1138_vm4, %vm3016_vm7  ;;  %v1141_v3 = vsel %vm1139_vm15, %v1140_v11, 0.0  ;;  %vm3020_vm0 = vcmp.eq.s32.totalorder %v2194_v13, 5  ;;  %vm3021_vm8 = vcmp.eq.s32.totalorder %v2194_v13, 6  ;;  %vm3022_vm7 = vcmp.eq.s32.totalorder %v2194_v13, 7  ;;  %s285_s28 = scalar_lea.vmem [#allocation8], %s3029_s6 }
 0x1d9   : > { %v1093_v31 = vadd.f32 %v1092_v7, %v1089_v1  ;;  %vm1147_vm10 = vmand %vm1138_vm4, %vm3017_vm3  ;;  %v1148_v1 = vstv %s2450_s23  ;;  %v1145_v40 = vsel %vm1143_vm9, %v1144_v59, 0.0  ;;  %vm3023_vm3 = vcmp.eq.s32.totalorder %v2194_v13, 8  ;;  %s1313_s23 = sshll.u32 %s285_s28, 4  ;;  %s2816_s23 = int_to_ptr.vmem [resolvable:$true] %s1313_s23 }
 0x1da   : > { %vm1151_vm11 = vmand %vm1138_vm4, %vm3018_vm2  ;;  %v1149_v33 = vsel %vm1147_vm10, %v1148_v1, 0.0  ;;  %vm3024_vm2 = vcmp.eq.s32.totalorder %v2194_v13, 9  ;;  %s1794_s15 = scalar_lea.vmem %s2816_s23, 128  ;;  %p3031_p10 = scmp.ne.s32.totalorder %s3027_s19, 0 }
 0x1db   : > { %v1097_v8 = vadd.f32 %v1096_v54, %v1093_v31  ;;  %v1152_v31 = vstv %s2464_s27  ;;  %vm1155_vm5 = vmand %vm1138_vm4, %vm3019_vm12  ;;  %vm3025_vm12 = vcmp.eq.s32.totalorder %v2194_v13, 10  ;;  %p1795_p0 = scmp.ne.s32.totalorder %s2816_s23, %s1794_s15 }
 0x1dc   : > { %v1153_v24 = vsel %vm1151_vm11, %v1152_v31, 0.0  ;;  %vm1159_vm6 = vmand %vm1138_vm4, %vm3020_vm0 }
 0x1dd   : > { %v1101_v23 = vadd.f32 %v1100_v51, %v1097_v8  ;;  %v1156_v8 = vstv %s2478_s5  ;;  %vm1163_vm15 = vmand %vm1138_vm4, %vm3021_vm8  ;;  %s2814_s5 = scalar_lea.hbm %s3030_s10, %s1491_s29  ;;  %p1796_p8 = pnand %p1795_p0, %p3031_p10 }
 0x1de   : > { %v1157_v27 = vsel %vm1155_vm5, %v1156_v8, 0.0  ;;  %vm1167_vm9 = vmand %vm1138_vm4, %vm3022_vm7 }
 0x1df   : > { %v1105_v4 = vadd.f32 %v1104_v39, %v1101_v23  ;;  %v1160_v23 = vstv %s2492_s14  ;;  %vm1171_vm10 = vmand %vm1138_vm4, %vm3023_vm3  ;;  %p1797_p9 = pneg %p1796_p8  ;;  %s1888_s14 = smov [#allocation8]  }
 0x1e0   : > { %v1161_v5 = vsel %vm1159_vm6, %v1160_v23, 0.0  ;;  %vm1175_vm11 = vmand %vm1138_vm4, %vm3024_vm2  ;;  %s1798_s7 = sshll.u32 %s1888_s14, 4  ;;  %s1799_s7 = int_to_ptr.vmem [resolvable:$false] %s1798_s7 }
 0x1e1   : > { %v1109_v32 = vadd.f32 %v1108_v25, %v1105_v4  ;;  %v1164_v4 = vstv %s2506_s4  ;;  %vm1179_vm5 = vmand %vm1138_vm4, %vm3025_vm12  ;;  %s1800_s4 = scalar_lea.vmem %s1799_s7, 256  ;;  %p1801_p12 = scmp.lt.s32.totalorder %s2816_s23, %s1799_s7 }
 0x1e2   : > { %v1165_v30 = vsel %vm1163_vm15, %v1164_v4, 0.0  ;;  %vm1183_vm0 = vmand %vm1138_vm4, %vm1075_vm13  ;;  %p1802_p1 = scmp.lt.s32.totalorder %s1800_s4, %s1794_s15 }
 0x1e3   : > { %v1113_v28 = vadd.f32 %v1112_v29, %v1109_v32  ;;  %v1168_v32 = vstv %s2520_s2  ;;  %s1624_s2 = spop %1623  ;;  %vm1187_vm6 = vmand %vm1138_vm4, %vm1080_vm1 }
 0x1e4   : > { %v1169_v20 = vsel %vm1167_vm9, %v1168_v32, 0.0  ;;  %vm1240_vm13 = vmand %vm1191_vm14, %vm1080_vm1  ;;  %vm3028_vm14 = vcmp.eq.s32.totalorder %v2192_v12, 4  ;;  %p1803_p6 = por %p1802_p1, %p1801_p12 }
 0x1e5   : > { %v1117_v2 = vadd.f32 %v1116_v44, %v1113_v28  ;;  %v1172_v28 = vstv %s2534_s25  ;;  %s1626_s25 = spop %1625  ;;  %vm1293_vm4 = vmand %vm3028_vm14, %vm1080_vm1 }
 0x1e6   : > { %v1173_v9 = vsel %vm1171_vm10, %v1172_v28, 0.0  ;;  %s1628_s24 = spop %1627  ;;  %p1804_p13 = pnand %p1803_p6, %p1797_p9 }
 0x1e7   : > { %v1121_v48 = vadd.f32 %v1120_v58, %v1117_v2  ;;  %v1176_v2 = vstv %s2569_s18 }
 0x1e8   : > { %v1177_v17 = vsel %vm1175_vm11, %v1176_v2, 0.0 }
 0x1e9   : > { %v1125_v52 = vadd.f32 %v1124_v60, %v1121_v48  ;;  %v1180_v48 = vstv %s2606_s20 }
 0x1eb   : > { %v1129_v35 = vadd.f32 %v1128_v15, %v1125_v52  ;;  %v1184_v52 = vstv %s2632_s16 }
 0x1ec   : > { %v1185_v11 = vsel %vm1183_vm0, %v1184_v52, 0.0 }
 0x1ed   : > { %v1133_v63 = vadd.f32 %v1132_v21, %v1129_v35  ;;  %v1181_v35 = vsel %vm1179_vm5, %v1180_v48, 0.0  ;;  %v1188_v21 = vstv %s1624_s2 }
 0x1ef   : > { %v1137_v53 = vadd.f32 %v1136_v0, %v1133_v63  ;;  %v1189_v0 = vsel %vm1187_vm6, %v1188_v21, 0.0 }
 0x1f1   : > { %v1142_v7 = vadd.f32 %v1141_v3, %v1137_v53 }
 0x1f3   : > { %v1146_v54 = vadd.f32 %v1145_v40, %v1142_v7 }
 0x1f5   : > { %v1150_v51 = vadd.f32 %v1149_v33, %v1146_v54 }
 0x1f7   : > { %v1154_v39 = vadd.f32 %v1153_v24, %v1150_v51 }
 0x1f9   : > { %v1158_v25 = vadd.f32 %v1157_v27, %v1154_v39 }
 0x1fb   : > { %v1162_v29 = vadd.f32 %v1161_v5, %v1158_v25 }
 0x1fd   : > { %v1166_v44 = vadd.f32 %v1165_v30, %v1162_v29 }
 0x1ff   : > { %v1170_v58 = vadd.f32 %v1169_v20, %v1166_v44 }
 0x201   : > { %v1174_v60 = vadd.f32 %v1173_v9, %v1170_v58 }
 0x203   : > { %v1178_v15 = vadd.f32 %v1177_v17, %v1174_v60 }
 0x205   : > { %v1182_v61 = vadd.f32 %v1181_v35, %v1178_v15 }
 0x207   : > { %v1186_v63 = vadd.f32 %v1185_v11, %v1182_v61 }
 0x209   : > { %v1190_v59 = vadd.f32 %v1189_v0, %v1186_v63 }
 0x20b   : > { %v1195_v53 = vadd.f32 %v2426_v55, %v1190_v59 }
 0x20d   : > { %v1199_v3 = vadd.f32 %v2440_v18, %v1195_v53  ;;  %v1241_v18 = vstv %s1626_s25 }
 0x20f   : > { %v1203_v1 = vadd.f32 %v2454_v46, %v1199_v3 }
 0x211   : > { %v1207_v7 = vadd.f32 %v2468_v57, %v1203_v1  ;;  %v1242_v57 = vsel %vm1240_vm13, %v1241_v18, 0.0 }
 0x213   : > { %v1211_v40 = vadd.f32 %v2482_v56, %v1207_v7 }
 0x215   : > { %v1215_v31 = vadd.f32 %v2496_v6, %v1211_v40 }
 0x217   : > { %v1219_v54 = vadd.f32 %v2510_v22, %v1215_v31 }
 0x219   : > { %v1223_v33 = vadd.f32 %v2524_v49, %v1219_v54 }
 0x21b   : > { %v1227_v8 = vadd.f32 %v2539_v37, %v1223_v33 }
 0x21d   : > { %v1231_v51 = vadd.f32 %v2583_v10, %v1227_v8 }
 0x21f   : > { %v1235_v55 = vadd.f32 %v2615_v45, %v1231_v51 }
 0x221   : > { %v1239_v46 = vadd.f32 %v2641_v38, %v1235_v55 }
 0x223   : > { %v1243_v56 = vadd.f32 %v1242_v57, %v1239_v46 }
 0x225   : > { %v1248_v6 = vadd.f32 %v2432_v62, %v1243_v56 }
 0x227   : > { %v1252_v22 = vadd.f32 %v2446_v16, %v1248_v6 }
 0x229   : > { %v1256_v49 = vadd.f32 %v2458_v19, %v1252_v22  ;;  %v1294_v19 = vstv %s1628_s24 }
 0x22b   : > { %v1260_v37 = vadd.f32 %v2472_v47, %v1256_v49 }
 0x22d   : > { %v1264_v10 = vadd.f32 %v2486_v41, %v1260_v37  ;;  %v1295_v41 = vsel %vm1293_vm4, %v1294_v19, 0.0 }
 0x22f   : > { %v1268_v45 = vadd.f32 %v2500_v14, %v1264_v10 }
 0x231   : > { %v1272_v24 = vadd.f32 %v2514_v26, %v1268_v45 }
 0x233   : > { %v1276_v38 = vadd.f32 %v2528_v34, %v1272_v24 }
 0x235   : > { %v1280_v23 = vadd.f32 %v2553_v36, %v1276_v38 }
 0x237   : > { %v1284_v62 = vadd.f32 %v2587_v43, %v1280_v23 }
 0x239   : > { %v1288_v16 = vadd.f32 %v2623_v42, %v1284_v62 }
 0x23b   : > { %v1292_v47 = vadd.f32 %v2650_v50, %v1288_v16 }
 0x23d   : > { %v1296_v14 = vadd.f32 %v1295_v41, %v1292_v47 }
 0x23f   : > { %1297 = vst [vmem:[%s285_s28] sm:$0xff] %v1296_v14 }
 0x240   : > { %1807 = shalt.err (!%p1804_p13)
}
 0x241   : > { %s1808_s0 = scalar_lea.hbm %s2814_s5, 128  ;;  %s1812_s20 = scalar_lea.hbm %s3030_s10, 256 }
 0x242   : > { %p1809_p11 = scmp.ne.s32.totalorder %s2814_s5, %s1808_s0  ;;  %p1813_p7 = scmp.lt.u32.totalorder %s2814_s5, %s3030_s10 }
 0x243   : > { %p1814_p3 = scmp.lt.u32.totalorder %s1812_s20, %s1808_s0  ;;  %p1816_p0 = scmp.lt.u32.totalorder %s1808_s0, %s2814_s5 }
 0x244   : > { %p1810_p2 = pnand %p1809_p11, %p3031_p10 }
 0x245   : > { %p1815_p4 = por %p1814_p3, %p1813_p7 }
 0x246   : > { %p1811_p5 = pneg %p1810_p2 }
 0x247   : > { %p1817_p8 = por %p1816_p0, %p1815_p4 }
 0x249   : > { %p1818_p9 = pnand %p1817_p8, %p1811_p5 }
 0x24b   : > { %1821 = shalt.err (!%p1818_p9)
}
 0x24c   : > { %1635 = dma.vmem_to_hbm [thread:$0]  (%p3031_p10), %s2816_s23, 128, %s2814_s5, %s1299_s8  }
 0x24d PF: > { %s3032_s12 = sld [smem:[#allocation12_spill]]  ;;  %s3033_s13 = sld [smem:[#allocation20_spill]] }
 0x24e   : > { %s3034_s16 = sld [smem:[#allocation16_spill]] }
 0x253   : > { %s1325_s22 = sand.u32 1, %s3032_s12   ;;  %p3035_p12 = scmp.ne.s32.totalorder %s3033_s13, 0 }
 0x254   : > { %p3036_p1 = scmp.ge.s32.totalorder %s3034_s16, 2  ;;  %s1326_s1 = scalar_lea.sflag [#allocation4], %s1325_s22 }
 0x256   : > { %p1648_p6 = pnand %p3036_p1, %p3035_p12 }
 0x258   : > { %1855 = dma.done.wait (!%p1648_p6), %s1326_s1, 128  }
 0x259   : > { %1857 = vsyncadd (!%p1648_p6), %s1326_s1, 4294967168  ;;  %s22_s17 = sadd.s32 1, %s3034_s16   ;;  %s3037_s12 = sld [smem:[#allocation13_spill]] }
 0x25a   : > { %p19_p13 = scmp.ge.s32.totalorder %s22_s17, 4   ;;  %s3038_s13 = sld [smem:[#allocation14_spill]] }
 0x25b   : > { %s3039_s14 = sld [smem:[#allocation19_spill]]  ;;  %s3040_s15 = sld [smem:[#allocation15_spill]] }
 0x25c   : > { %s3041_s16 = sld [smem:[#allocation17_spill]]  ;;  %21 = sbr.rel (!%p19_p13) target bundleno = 13 (0xd), region = 127 }
 0x263   :  { %1331 = vsyncpa [#allocation3], 1 }
 0x264   :  { %1333 = vsyncpa [#allocation3 + $0x1], 1 }
 0x265   :  { %1334 = vsyncpa [#allocation6], 1 }
 0x266   :  { %1336 = vsyncpa [#allocation6 + $0x1], 1 }
 0x267   :  { %1337 = vsyncpa [#allocation4], 1 }
 0x268   :  { %1339 = vsyncpa [#allocation4 + $0x1], 1 }

</bundles_post_ra>
